<compile_context>
chip_gen: v6e
topology: v6e:2x2x1
jax: 0.10.0
libtpu: 0.0.40
codegen_flags: <defaults>
</compile_context>

<pallas_src>
import jax
import jax.numpy as jnp
from jax.experimental import pallas as pl
from jax.experimental.pallas import tpu as pltpu

EPS = 1e-5


def _fused_add_conv1x1_bn_kernel(x1_ref, x2_ref, w_ref, gb_ref, o_ref):
    # x1_ref, x2_ref : (Cin, M)       float32   (full X, same block every step)
    # w_ref          : (TCout, Cin)   bfloat16  (this block's output channels)
    # gb_ref         : (TCout, 2)     float32   [:,0]=gamma, [:,1]=beta
    # o_ref          : (TCout, M)     float32
    # Residual add in f32 (VPU); cast the sum to bf16 only as the MXU operand.
    x = (x1_ref[...] + x2_ref[...]).astype(jnp.bfloat16)            # (Cin, M)

    # 1x1 conv == (TCout, Cin) @ (Cin, M) on the native bf16 MXU path,
    # accumulated in f32.
    y = jnp.dot(w_ref[...], x, preferred_element_type=jnp.float32)  # (TCout, M)

    # BatchNorm (training mode): biased batch statistics over N*H*W (= columns).
    # Centered two-pass variance -> no cancellation, var >= 0 by construction.
    inv_m = jnp.float32(1.0 / y.shape[1])
    mean = jnp.sum(y, axis=1, keepdims=True) * inv_m                 # (TCout, 1)
    d = y - mean
    var = jnp.sum(d * d, axis=1, keepdims=True) * inv_m              # (TCout, 1)

    gb = gb_ref[...]
    scale = gb[:, 0:1] * jax.lax.rsqrt(var + EPS)
    o_ref[...] = (d * scale + gb[:, 1:2]).astype(o_ref.dtype)


def _num_output_blocks():
    """2 blocks on multi-TensorCore devices (v7x / megacore), 1 on v5e/v6e."""
    try:
        kind = jax.devices()[0].device_kind.lower()
    except Exception:
        return 1
    single_tc = any(t in kind for t in
                    ("v5e", "v5 lite", "v5lite", "v6e", "v6 lite", "v6lite"))
    return 1 if single_tc else 2


def fused_add_conv1x1_bn(x278, x264, weight, gamma, beta, *,
                         block_cout=None, out_dtype=jnp.float32):
    """x278, x264: NCHW [1, Cin, H, W]; weight: [Cout, Cin, 1, 1]; gamma/beta: [Cout]."""
    N, Cin, H, W = x278.shape
    assert N == 1, "transpose-free (Cout, M) layout relies on N == 1"
    Cout = weight.shape[0]
    M = H * W

    if block_cout is None:
        nblk = _num_output_blocks()
        block_cout = Cout // nblk if (Cout % nblk == 0) else Cout
    assert Cout % block_cout == 0 and block_cout % 8 == 0
    grid = (Cout // block_cout,)   # 1 step on v5e/v6e, 2 parallel steps on v7x

    # Free (view-only) reshapes -- no transposes anywhere in the wrapper.
    x1 = x278.reshape(Cin, M)
    x2 = x264.reshape(Cin, M)
    # Weight in bf16 halves its HBM/DMA footprint and picks the native bf16
    # MXU path.  (In a real model the parameter would simply be stored bf16;
    # here the one-time cast is a tiny XLA op outside the kernel.)
    w = weight.reshape(Cout, Cin).astype(jnp.bfloat16)
    gb = jnp.stack([gamma, beta], axis=1).astype(jnp.float32)        # (Cout, 2)

    cost = pl.CostEstimate(
        flops=2 * Cout * Cin * M + Cin * M + 6 * Cout * M,  # conv + add + BN
        transcendentals=Cout,                               # rsqrt per channel
        bytes_accessed=(2 * Cin * M * 4          # x1, x2 (f32)
                        + Cout * Cin * 2         # W (bf16)
                        + Cout * 2 * 4           # gamma/beta
                        + Cout * M * 4),         # output (f32)
    )

    out = pl.pallas_call(
        _fused_add_conv1x1_bn_kernel,
        out_shape=jax.ShapeDtypeStruct((Cout, M), out_dtype),
        grid_spec=pltpu.PrefetchScalarGridSpec(
            num_scalar_prefetch=0,
            grid=grid,
            in_specs=[
                pl.BlockSpec((Cin, M), lambda i: (0, 0)),             # x1 (full)
                pl.BlockSpec((Cin, M), lambda i: (0, 0)),             # x2 (full)
                pl.BlockSpec((block_cout, Cin), lambda i: (i, 0)),    # W slice
                pl.BlockSpec((block_cout, 2), lambda i: (i, 0)),      # gamma|beta
            ],
            out_specs=pl.BlockSpec((block_cout, M), lambda i: (i, 0)),
        ),
        compiler_params=pltpu.CompilerParams(
            dimension_semantics=("parallel",)),
        cost_estimate=cost,
    )(x1, x2, w, gb)

    # (Cout, M) -> NCHW, free view.
    return out.reshape(N, Cout, H, W)


def reference(x278, x264, weight, gamma, beta):
    # Pure-JAX f32 reference (NHWC path, different layout than the kernel).
    s = x278 + x264
    N, Cin, H, W = s.shape
    Cout = weight.shape[0]
    x = jnp.transpose(s, (0, 2, 3, 1)).reshape(-1, Cin)
    y = x @ weight.reshape(Cout, Cin).T
    mean = jnp.mean(y, axis=0, keepdims=True)
    var = jnp.mean((y - mean) ** 2, axis=0, keepdims=True)
    y = (y - mean) / jnp.sqrt(var + EPS) * gamma + beta
    return jnp.transpose(y.reshape(N, H, W, Cout), (0, 3, 1, 2))


if __name__ == "__main__":
    key = jax.random.PRNGKey(0)
    k1, k2, k3, k4, k5 = jax.random.split(key, 5)

    N, Cin, H, W, Cout = 1, 160, 14, 14, 960  # shapes implied by the module

    x278 = jax.random.normal(k1, (N, Cin, H, W), dtype=jnp.float32)
    x264 = jax.random.normal(k2, (N, Cin, H, W), dtype=jnp.float32)
    # deterministic synthetic parameters (no checkpoint load)
    weight = jax.random.normal(k3, (Cout, Cin, 1, 1), dtype=jnp.float32) * 0.05
    gamma = 1.0 + 0.1 * jax.random.normal(k4, (Cout,), dtype=jnp.float32)
    beta = 0.1 * jax.random.normal(k5, (Cout,), dtype=jnp.float32)

    out = fused_add_conv1x1_bn(x278, x264, weight, gamma, beta)
    out = jax.block_until_ready(out)

    ref = reference(x278, x264, weight, gamma, beta)
    assert out.shape == (N, Cout, H, W), out.shape
    # bf16 MXU operands (f32 accumulation) vs the f32 reference: expected
    # per-element error ~1e-3 RMS after BN; 2e-2 gives comfortable margin.
    assert jnp.allclose(out, ref, atol=2e-2, rtol=2e-2), \
        float(jnp.max(jnp.abs(out - ref)))

    print("KERNEL_OK")
</pallas_src>

<mosaic_0001>
module attributes {stable_mosaic.version = 11 : i64} {
  func.func @_fused_add_conv1x1_bn_kernel(%arg0: i32, %arg1: memref<160x196xf32, #tpu.memory_space<vmem>>, %arg2: memref<160x196xf32, #tpu.memory_space<vmem>>, %arg3: memref<480x160xbf16, #tpu.memory_space<vmem>>, %arg4: memref<480x2xf32, #tpu.memory_space<vmem>>, %arg5: memref<480x196xf32, #tpu.memory_space<vmem>>) attributes {dimension_semantics = [#tpu.dimension_semantics<parallel>], iteration_bounds = array<i64: 2>, scalar_prefetch = 0 : i64, scratch_operands = 0 : i64, tpu.core_type = #tpu.core_type<tc>, window_params = [{pipeline_mode = #tpu.pipeline_mode<synchronous>, transform_indices = @transform_0, window_bounds = array<i64: 160, 196>}, {pipeline_mode = #tpu.pipeline_mode<synchronous>, transform_indices = @transform_1, window_bounds = array<i64: 160, 196>}, {transform_indices = @transform_2, window_bounds = array<i64: 480, 160>}, {transform_indices = @transform_3, window_bounds = array<i64: 480, 2>}, {transform_indices = @transform_4, window_bounds = array<i64: 480, 196>}]} {
    %c0 = arith.constant 0 : index
    %c0_0 = arith.constant 0 : index
    %0 = vector.load %arg1[%c0, %c0_0] : memref<160x196xf32, #tpu.memory_space<vmem>>, vector<160x196xf32>
    %c0_1 = arith.constant 0 : index
    %c0_2 = arith.constant 0 : index
    %1 = vector.load %arg2[%c0_1, %c0_2] : memref<160x196xf32, #tpu.memory_space<vmem>>, vector<160x196xf32>
    %2 = arith.addf %0, %1 : vector<160x196xf32>
    %3 = arith.truncf %2 : vector<160x196xf32> to vector<160x196xbf16>
    %c0_3 = arith.constant 0 : index
    %c0_4 = arith.constant 0 : index
    %4 = vector.load %arg3[%c0_3, %c0_4] : memref<480x160xbf16, #tpu.memory_space<vmem>>, vector<480x160xbf16>
    %cst = arith.constant dense<0.000000e+00> : vector<480x196xf32>
    %5 = tpu.matmul %4, %3, %cst {dimension_numbers = #tpu.dot_dimension_numbers<[1], [0], [0], [1], [0, 0, 1, 1], [], []>} : vector<480x160xbf16>, vector<160x196xbf16>, vector<480x196xf32> -> vector<480x196xf32>
    %cst_5 = arith.constant dense<0.000000e+00> : vector<480xf32>
    %6 = vector.multi_reduction <add>, %5, %cst_5 [1] : vector<480x196xf32> to vector<480xf32>
    %7 = vector.shape_cast %6 : vector<480xf32> to vector<480x1xf32>
    %cst_6 = arith.constant 0.00510204071 : f32
    %8 = vector.broadcast %cst_6 : f32 to vector<480x1xf32>
    %9 = arith.mulf %7, %8 : vector<480x1xf32>
    %10 = vector.broadcast %9 : vector<480x1xf32> to vector<480x196xf32>
    %11 = arith.subf %5, %10 : vector<480x196xf32>
    %12 = arith.mulf %11, %11 : vector<480x196xf32>
    %cst_7 = arith.constant dense<0.000000e+00> : vector<480xf32>
    %13 = vector.multi_reduction <add>, %12, %cst_7 [1] : vector<480x196xf32> to vector<480xf32>
    %14 = vector.shape_cast %13 : vector<480xf32> to vector<480x1xf32>
    %cst_8 = arith.constant 0.00510204071 : f32
    %15 = vector.broadcast %cst_8 : f32 to vector<480x1xf32>
    %16 = arith.mulf %14, %15 : vector<480x1xf32>
    %c0_9 = arith.constant 0 : index
    %c0_10 = arith.constant 0 : index
    %17 = vector.load %arg4[%c0_9, %c0_10] : memref<480x2xf32, #tpu.memory_space<vmem>>, vector<480x2xf32>
    %18 = vector.extract_strided_slice %17 {offsets = [0, 0], sizes = [480, 1], strides = [1, 1]} : vector<480x2xf32> to vector<480x1xf32>
    %cst_11 = arith.constant 9.99999974E-6 : f32
    %19 = vector.broadcast %cst_11 : f32 to vector<480x1xf32>
    %20 = arith.addf %16, %19 : vector<480x1xf32>
    %21 = math.rsqrt %20 : vector<480x1xf32>
    %22 = arith.mulf %18, %21 : vector<480x1xf32>
    %23 = vector.broadcast %22 : vector<480x1xf32> to vector<480x196xf32>
    %24 = arith.mulf %11, %23 : vector<480x196xf32>
    %25 = vector.extract_strided_slice %17 {offsets = [0, 1], sizes = [480, 1], strides = [1, 1]} : vector<480x2xf32> to vector<480x1xf32>
    %26 = vector.broadcast %25 : vector<480x1xf32> to vector<480x196xf32>
    %27 = arith.addf %24, %26 : vector<480x196xf32>
    %c0_12 = arith.constant 0 : index
    %c0_13 = arith.constant 0 : index
    %28 = vector.load %arg5[%c0_12, %c0_13] : memref<480x196xf32, #tpu.memory_space<vmem>>, vector<480x196xf32>
    tpu.vector_store %arg5[%c0_12, %c0_13], %27 {strides = array<i32>} : memref<480x196xf32, #tpu.memory_space<vmem>>, vector<480x196xf32>,
    return
  }
  func.func @transform_0(%arg0: i32) -> (i32, i32) {
    %c0_i32 = arith.constant 0 : i32
    %c0_i32_0 = arith.constant 0 : i32
    %c0_i32_1 = arith.constant 0 : i32
    return %c0_i32, %c0_i32_0 : i32, i32
  }
  func.func @transform_1(%arg0: i32) -> (i32, i32) {
    %c0_i32 = arith.constant 0 : i32
    %c0_i32_0 = arith.constant 0 : i32
    %c0_i32_1 = arith.constant 0 : i32
    return %c0_i32, %c0_i32_0 : i32, i32
  }
  func.func @transform_2(%arg0: i32) -> (i32, i32) {
    %c0_i32 = arith.constant 0 : i32
    %c0_i32_0 = arith.constant 0 : i32
    return %arg0, %c0_i32 : i32, i32
  }
  func.func @transform_3(%arg0: i32) -> (i32, i32) {
    %c0_i32 = arith.constant 0 : i32
    %c0_i32_0 = arith.constant 0 : i32
    return %arg0, %c0_i32 : i32, i32
  }
  func.func @transform_4(%arg0: i32) -> (i32, i32) {
    %c0_i32 = arith.constant 0 : i32
    %c0_i32_0 = arith.constant 0 : i32
    return %arg0, %c0_i32 : i32, i32
  }
}

</mosaic_0001>

<bundles_post_ra>
// kernel: tpu_custom_call.1
= control target key start
LH: loop header
LB: loop body
LE: loop exit
PB: predicated region body
PF: predicated region fallthrough
CT: control target
= control target key end

     0   :  { %s3677_s15 = smov 0   ;;  %s5775_s0 = inlined_call_operand.vmem [shape: f32[160,196], index: 0, kind: input, shape index: {}]   ;;  %s5776_s1 = inlined_call_operand.vmem [shape: f32[160,196], index: 1, kind: input, shape index: {}]   ;;  %s5777_s2 = inlined_call_operand.vmem [shape: bf16[960,160], index: 2, kind: input, shape index: {}]   ;;  %s5778_s3 = inlined_call_operand.vmem [shape: f32[960,2], index: 3, kind: input, shape index: {}]   ;;  %s5779_s4 = inlined_call_operand.vmem [shape: f32[960,196], index: 4, kind: output, shape index: {}]  }
   0x1 LB: > { %s3234_s16 = sadd.s32 4294967295, %s3648_s15   ;;  %p3238_p0 = scmp.ge.s32.totalorder %s3648_s15, 1  ;;  %s3648_s15 = sphi %s3677_s15, %s14_s15  }
   0x2   : > { %p175_p1 = scmp.lt.s32.totalorder %s3648_s15, 3 }
   0x4   : > { %p176_p2 = pnand %p3238_p0, %p175_p1 }
   0x6   : > { %179 = sbr.rel (%p176_p2) target bundleno = 824 (0x338), region = 36 }
   0xb   : > { %v258_v0 = vld [vmem:[%s5775_s0 + $0xe8] sm:$0xff]  ;;  %v260_v1 = vld [vmem:[%s5775_s0 + $0xf8] sm:$0xff]  ;;  %s208_s23 = smul.u32 60, %s3234_s16  ;;  %v257_v5 = vld [vmem:[%s5775_s0 + $0xe0] sm:$0xff]  ;;  %v5780_v7 = vmov 1   ;;  %vm699_vm0 = vcmask 261120  }
   0xc   : > { %v298_v2 = vld [vmem:[%s5776_s1 + $0xe8] sm:$0xff]  ;;  %v300_v3 = vld [vmem:[%s5776_s1 + $0xf8] sm:$0xff]  ;;  %v259_v6 = vld [vmem:[%s5775_s0 + $0xf0] sm:$0xff]  ;;  %3369 = vset.pattern.permute.xlu0 %v5780_v7  ;;  %3368 = vset.pattern.permute.xlu1 %v5780_v7  ;;  %vm1123_vm1 = vcmask 556032  }
   0xd   : > { %v338_v4 = vadd.f32 %v298_v2, %v258_v0  ;;  %v340_v8 = vadd.f32 %v300_v3, %v260_v1  ;;  %v297_v9 = vld [vmem:[%s5776_s1 + $0xe0] sm:$0xff]  ;;  %v299_v10 = vld [vmem:[%s5776_s1 + $0xf0] sm:$0xff]  ;;  %v254_v11 = vld [vmem:[%s5775_s0 + $0xc8] sm:$0xff]  ;;  %p209_p3 = scmp.lt.s32.totalorder %s208_s23, 119 }
   0xe   : > { %v337_v12 = vadd.f32 %v297_v9, %v257_v5  ;;  %v339_v13 = vadd.f32 %v299_v10, %v259_v6  ;;  %v256_v14 = vld [vmem:[%s5775_s0 + $0xd8] sm:$0xff]  ;;  %v294_v15 = vld [vmem:[%s5776_s1 + $0xc8] sm:$0xff]  ;;  %v253_v20 = vld [vmem:[%s5775_s0 + $0xc0] sm:$0xff] }
   0xf   : > { %v296_v16 = vld [vmem:[%s5776_s1 + $0xd8] sm:$0xff]  ;;  %v364_v17 = vpack.c.bf16 %v340_v8, %v338_v4  ;;  %v334_v18 = vadd.f32 %v294_v15, %v254_v11  ;;  %s6405_s23 = smov (!%p209_p3, %s208_s23), 119  ;;  %v255_v21 = vld [vmem:[%s5775_s0 + $0xd0] sm:$0xff]  ;;  %v293_v22 = vld [vmem:[%s5776_s1 + $0xc0] sm:$0xff] }
  0x10   : > { %v336_v19 = vadd.f32 %v296_v16, %v256_v14  ;;  %v363_v23 = vpack.c.bf16 %v339_v13, %v337_v12  ;;  %v295_v24 = vld [vmem:[%s5776_s1 + $0xd0] sm:$0xff]  ;;  %v333_v25 = vadd.f32 %v293_v22, %v253_v20  ;;  %v250_v26 = vld [vmem:[%s5775_s0 + $0xa8] sm:$0xff]  ;;  %v252_v27 = vld [vmem:[%s5775_s0 + $0xb8] sm:$0xff]  ;;  %s3336_s30 = sshll.u32 %s6405_s23, 3 }
  0x11   : > { %790 = vmatprep.subr.bf16.mxu0 %v364_v17  ;;  %3338 = vmatprep.subr.bf16.mxu1 %v364_v17  ;;  %v335_v29 = vadd.f32 %v295_v24, %v255_v21  ;;  %v290_v30 = vld [vmem:[%s5776_s1 + $0xa8] sm:$0xff]  ;;  %v292_v31 = vld [vmem:[%s5776_s1 + $0xb8] sm:$0xff]  ;;  %v249_v32 = vld [vmem:[%s5775_s0 + $0xa0] sm:$0xff]  ;;  %s3758_s13 = scalar_lea.vmem %s5778_s3, %s3336_s30  ;;  %s3950_s21 = scalar_lea.vmem %s5777_s2, %s3336_s30 }
  0x12   : > { %v362_v28 = vpack.c.bf16 %v336_v19, %v334_v18  ;;  %791 = vmatpush1.bf16.msra.mxu0 %v363_v23  ;;  %3348 = vmatpush1.bf16.msra.mxu1 %v363_v23  ;;  %v330_v33 = vadd.f32 %v290_v30, %v250_v26  ;;  %v332_v34 = vadd.f32 %v292_v31, %v252_v27  ;;  %v251_v35 = vld [vmem:[%s5775_s0 + $0xb0] sm:$0xff]  ;;  %v289_v36 = vld [vmem:[%s5776_s1 + $0xa0] sm:$0xff]  ;;  %v1965_v38 = vld [vmem:[%s3758_s13 + $0x8] sm:$0xff]  ;;  %s3337_s30 = sshll.u32 %s6405_s23, 4 }
  0x13   : > { %v291_v37 = vld [vmem:[%s5776_s1 + $0xb0] sm:$0xff]  ;;  %v1964_v39 = vld [vmem:[%s3758_s13] sm:$0xff]  ;;  %v361_v40 = vpack.c.bf16 %v335_v29, %v333_v25  ;;  %v329_v41 = vadd.f32 %v289_v36, %v249_v32  ;;  %2631 = vperm.xlu0 %3369, %v1965_v38   ;;  %v246_v45 = vld [vmem:[%s5775_s0 + $0x88] sm:$0xff]  ;;  %s5352_s29 = scalar_lea.vmem %s5779_s4, %s3337_s30 }
  0x14   : > { %792 = vmatprep.subr.bf16.mxu0 %v362_v28  ;;  %3339 = vmatprep.subr.bf16.mxu1 %v362_v28  ;;  %v331_v42 = vadd.f32 %v291_v37, %v251_v35  ;;  %v360_v43 = vpack.c.bf16 %v332_v34, %v330_v33  ;;  %v1968_v44 = vld [vmem:[%s3758_s13 + $0x20] sm:$0xff]  ;;  %v248_v46 = vld [vmem:[%s5775_s0 + $0x98] sm:$0xff]  ;;  %v1966_v47 = vld [vmem:[%s3758_s13 + $0x10] sm:$0xff] }
  0x15   : > { %2626 = vperm.xlu1 %3368, %v1964_v39   ;;  %v286_v48 = vld [vmem:[%s5776_s1 + $0x88] sm:$0xff]  ;;  %v288_v49 = vld [vmem:[%s5776_s1 + $0x98] sm:$0xff]  ;;  %v245_v53 = vld [vmem:[%s5775_s0 + $0x80] sm:$0xff] }
  0x16   : > { %793 = vmatpush1.bf16.msra.mxu0 %v361_v40  ;;  %3349 = vmatpush1.bf16.msra.mxu1 %v361_v40  ;;  %v359_v50 = vpack.c.bf16 %v331_v42, %v329_v41  ;;  %v326_v51 = vadd.f32 %v286_v48, %v246_v45  ;;  %v328_v52 = vadd.f32 %v288_v49, %v248_v46  ;;  %v247_v54 = vld [vmem:[%s5775_s0 + $0x90] sm:$0xff]  ;;  %v285_v55 = vld [vmem:[%s5776_s1 + $0x80] sm:$0xff]  ;;  %v242_v57 = vld [vmem:[%s5775_s0 + $0x68] sm:$0xff] }
  0x17   : > { %794 = vmatprep.subr.bf16.mxu0 %v360_v43  ;;  %3340 = vmatprep.subr.bf16.mxu1 %v360_v43  ;;  %v287_v56 = vld [vmem:[%s5776_s1 + $0x90] sm:$0xff]  ;;  %v325_v59 = vadd.f32 %v285_v55, %v245_v53  ;;  %v244_v61 = vld [vmem:[%s5775_s0 + $0x78] sm:$0xff]  ;;  %v282_v62 = vld [vmem:[%s5776_s1 + $0x68] sm:$0xff] }
  0x18   : > { %2646 = vperm.xlu0 %3369, %v1968_v44   ;;  %v358_v58 = vpack.c.bf16 %v328_v52, %v326_v51  ;;  %v327_v60 = vadd.f32 %v287_v56, %v247_v54  ;;  %v284_v63 = vld [vmem:[%s5776_s1 + $0x78] sm:$0xff]  ;;  %v1970_v0 = vld [vmem:[%s3758_s13 + $0x30] sm:$0xff]  ;;  %v322_v2 = vadd.f32 %v282_v62, %v242_v57  ;;  %v241_v4 = vld [vmem:[%s5775_s0 + $0x60] sm:$0xff] }
  0x19   : > { %2636 = vperm.xlu1 %3368, %v1966_v47   ;;  %v1967_v1 = vld [vmem:[%s3758_s13 + $0x18] sm:$0xff]  ;;  %v324_v3 = vadd.f32 %v284_v63, %v244_v61  ;;  %v243_v6 = vld [vmem:[%s5775_s0 + $0x70] sm:$0xff]  ;;  %v281_v8 = vld [vmem:[%s5776_s1 + $0x60] sm:$0xff] }
  0x1a   : > { %795 = vmatpush1.bf16.msra.mxu0 %v359_v50  ;;  %3350 = vmatpush1.bf16.msra.mxu1 %v359_v50  ;;  %v357_v5 = vpack.c.bf16 %v327_v60, %v325_v59  ;;  %v283_v9 = vld [vmem:[%s5776_s1 + $0x70] sm:$0xff]  ;;  %v321_v11 = vadd.f32 %v281_v8, %v241_v4  ;;  %v238_v13 = vld [vmem:[%s5775_s0 + $0x48] sm:$0xff]  ;;  %v240_v14 = vld [vmem:[%s5775_s0 + $0x58] sm:$0xff] }
  0x1b   : > { %796 = vmatprep.subr.bf16.mxu0 %v358_v58  ;;  %3341 = vmatprep.subr.bf16.mxu1 %v358_v58  ;;  %v356_v10 = vpack.c.bf16 %v324_v3, %v322_v2  ;;  %v323_v12 = vadd.f32 %v283_v9, %v243_v6  ;;  %v278_v15 = vld [vmem:[%s5776_s1 + $0x48] sm:$0xff]  ;;  %v1972_v16 = vld [vmem:[%s3758_s13 + $0x40] sm:$0xff]  ;;  %v280_v18 = vld [vmem:[%s5776_s1 + $0x58] sm:$0xff] }
  0x1c   : > { %2656 = vperm.xlu0 %3369, %v1970_v0   ;;  %v1969_v17 = vld [vmem:[%s3758_s13 + $0x28] sm:$0xff]  ;;  %v318_v19 = vadd.f32 %v278_v15, %v238_v13  ;;  %v320_v20 = vadd.f32 %v280_v18, %v240_v14  ;;  %v237_v21 = vld [vmem:[%s5775_s0 + $0x40] sm:$0xff]  ;;  %v239_v22 = vld [vmem:[%s5775_s0 + $0x50] sm:$0xff] }
  0x1d   : > { %2641 = vperm.xlu1 %3368, %v1967_v1   ;;  %v277_v23 = vld [vmem:[%s5776_s1 + $0x40] sm:$0xff]  ;;  %v355_v24 = vpack.c.bf16 %v323_v12, %v321_v11  ;;  %v279_v25 = vld [vmem:[%s5776_s1 + $0x50] sm:$0xff]  ;;  %v234_v27 = vld [vmem:[%s5775_s0 + $0x28] sm:$0xff] }
  0x1e   : > { %797 = vmatpush1.bf16.msra.mxu0 %v357_v5  ;;  %3351 = vmatpush1.bf16.msra.mxu1 %v357_v5  ;;  %v317_v26 = vadd.f32 %v277_v23, %v237_v21  ;;  %v236_v28 = vld [vmem:[%s5775_s0 + $0x38] sm:$0xff]  ;;  %v354_v29 = vpack.c.bf16 %v320_v20, %v318_v19  ;;  %v1974_v30 = vld [vmem:[%s3758_s13 + $0x50] sm:$0xff]  ;;  %v319_v31 = vadd.f32 %v279_v25, %v239_v22  ;;  %v274_v32 = vld [vmem:[%s5776_s1 + $0x28] sm:$0xff] }
  0x1f   : > { %798 = vmatprep.subr.bf16.mxu0 %v356_v10  ;;  %3342 = vmatprep.subr.bf16.mxu1 %v356_v10  ;;  %v276_v33 = vld [vmem:[%s5776_s1 + $0x38] sm:$0xff]  ;;  %v314_v35 = vadd.f32 %v274_v32, %v234_v27  ;;  %v233_v37 = vld [vmem:[%s5775_s0 + $0x20] sm:$0xff]  ;;  %v235_v38 = vld [vmem:[%s5775_s0 + $0x30] sm:$0xff] }
  0x20   : > { %2666 = vperm.xlu0 %3369, %v1972_v16   ;;  %v1971_v34 = vld [vmem:[%s3758_s13 + $0x38] sm:$0xff]  ;;  %v316_v36 = vadd.f32 %v276_v33, %v236_v28  ;;  %v273_v39 = vld [vmem:[%s5776_s1 + $0x20] sm:$0xff]  ;;  %v275_v40 = vld [vmem:[%s5776_s1 + $0x30] sm:$0xff]  ;;  %v353_v42 = vpack.c.bf16 %v319_v31, %v317_v26 }
  0x21   : > { %2651 = vperm.xlu1 %3368, %v1969_v17   ;;  %v230_v41 = vld [vmem:[%s5775_s0 + $0x8] sm:$0xff]  ;;  %v313_v43 = vadd.f32 %v273_v39, %v233_v37  ;;  %v315_v44 = vadd.f32 %v275_v40, %v235_v38  ;;  %v232_v45 = vld [vmem:[%s5775_s0 + $0x18] sm:$0xff]  ;;  %v1976_v49 = vld [vmem:[%s3758_s13 + $0x60] sm:$0xff] }
  0x22   : > { %799 = vmatpush1.bf16.msra.mxu0 %v355_v24  ;;  %3352 = vmatpush1.bf16.msra.mxu1 %v355_v24  ;;  %v270_v46 = vld [vmem:[%s5776_s1 + $0x8] sm:$0xff]  ;;  %v272_v47 = vld [vmem:[%s5776_s1 + $0x18] sm:$0xff]  ;;  %v352_v48 = vpack.c.bf16 %v316_v36, %v314_v35  ;;  %v229_v53 = vld [vmem:[%s5775_s0] sm:$0xff] }
  0x23   : > { %800 = vmatprep.subr.bf16.mxu0 %v354_v29  ;;  %3343 = vmatprep.subr.bf16.mxu1 %v354_v29  ;;  %v1973_v50 = vld [vmem:[%s3758_s13 + $0x48] sm:$0xff]  ;;  %v310_v51 = vadd.f32 %v270_v46, %v230_v41  ;;  %v312_v52 = vadd.f32 %v272_v47, %v232_v45  ;;  %v231_v54 = vld [vmem:[%s5775_s0 + $0x10] sm:$0xff]  ;;  %v269_v55 = vld [vmem:[%s5776_s1] sm:$0xff]  ;;  %v351_v60 = vpack.c.bf16 %v315_v44, %v313_v43 }
  0x24   : > { %2676 = vperm.xlu0 %3369, %v1974_v30   ;;  %v271_v56 = vld [vmem:[%s5776_s1 + $0x10] sm:$0xff]  ;;  %v266_v57 = vld [vmem:[%s5775_s0 + $0x128] sm:$0xff]  ;;  %v268_v58 = vld [vmem:[%s5775_s0 + $0x138] sm:$0xff]  ;;  %v309_v61 = vadd.f32 %v269_v55, %v229_v53 }
  0x25   : > { %2661 = vperm.xlu1 %3368, %v1971_v34   ;;  %v306_v59 = vld [vmem:[%s5776_s1 + $0x128] sm:$0xff]  ;;  %v311_v62 = vadd.f32 %v271_v56, %v231_v54  ;;  %v308_v63 = vld [vmem:[%s5776_s1 + $0x138] sm:$0xff]  ;;  %v350_v0 = vpack.c.bf16 %v312_v52, %v310_v51  ;;  %v1978_v1 = vld [vmem:[%s3758_s13 + $0x70] sm:$0xff] }
  0x26   : > { %801 = vmatpush1.bf16.msra.mxu0 %v353_v42  ;;  %3353 = vmatpush1.bf16.msra.mxu1 %v353_v42  ;;  %v346_v2 = vadd.f32 %v306_v59, %v266_v57  ;;  %v348_v3 = vadd.f32 %v308_v63, %v268_v58  ;;  %v265_v4 = vld [vmem:[%s5775_s0 + $0x120] sm:$0xff]  ;;  %v267_v5 = vld [vmem:[%s5775_s0 + $0x130] sm:$0xff]  ;;  %v262_v9 = vld [vmem:[%s5775_s0 + $0x108] sm:$0xff] }
  0x27   : > { %802 = vmatprep.subr.bf16.mxu0 %v352_v48  ;;  %3344 = vmatprep.subr.bf16.mxu1 %v352_v48  ;;  %v305_v6 = vld [vmem:[%s5776_s1 + $0x120] sm:$0xff]  ;;  %v307_v8 = vld [vmem:[%s5776_s1 + $0x130] sm:$0xff]  ;;  %v264_v10 = vld [vmem:[%s5775_s0 + $0x118] sm:$0xff]  ;;  %v349_v14 = vpack.c.bf16 %v311_v62, %v309_v61 }
  0x28   : > { %2686 = vperm.xlu0 %3369, %v1976_v49   ;;  %v1975_v11 = vld [vmem:[%s3758_s13 + $0x58] sm:$0xff]  ;;  %v302_v12 = vld [vmem:[%s5776_s1 + $0x108] sm:$0xff]  ;;  %v345_v15 = vadd.f32 %v305_v6, %v265_v4  ;;  %v347_v16 = vadd.f32 %v307_v8, %v267_v5  ;;  %v261_v17 = vld [vmem:[%s5775_s0 + $0x100] sm:$0xff]  ;;  %v368_v19 = vpack.c.bf16 %v348_v3, %v346_v2 }
  0x29   : > { %2671 = vperm.xlu1 %3368, %v1973_v50   ;;  %v304_v13 = vld [vmem:[%s5776_s1 + $0x118] sm:$0xff]  ;;  %v263_v18 = vld [vmem:[%s5775_s0 + $0x110] sm:$0xff]  ;;  %v342_v20 = vadd.f32 %v302_v12, %v262_v9  ;;  %v301_v22 = vld [vmem:[%s5776_s1 + $0x100] sm:$0xff] }
  0x2a   : > { %803 = vmatpush1.bf16.msra.mxu0 %v351_v60  ;;  %3354 = vmatpush1.bf16.msra.mxu1 %v351_v60  ;;  %v344_v21 = vadd.f32 %v304_v13, %v264_v10  ;;  %v303_v23 = vld [vmem:[%s5776_s1 + $0x110] sm:$0xff]  ;;  %v1980_v24 = vld [vmem:[%s3758_s13 + $0x80] sm:$0xff]  ;;  %v1977_v25 = vld [vmem:[%s3758_s13 + $0x68] sm:$0xff]  ;;  %v367_v27 = vpack.c.bf16 %v347_v16, %v345_v15  ;;  %v341_v28 = vadd.f32 %v301_v22, %v261_v17 }
  0x2b   : > { %804 = vmatprep.subr.bf16.mxu0 %v350_v0  ;;  %3345 = vmatprep.subr.bf16.mxu1 %v350_v0  ;;  %v3376_v26 = vld [vmem:[%s3950_s21 + $0x4] ss:$8 sps:$4 sm:$0xff]   ;;  %v343_v29 = vadd.f32 %v303_v23, %v263_v18  ;;  %v3379_v30 = vld [vmem:[%s3950_s21 + $0xf4] ss:$8 sps:$4 sm:$0xff]   ;;  %v3374_v35 = vld [vmem:[%s3950_s21] ss:$8 sps:$4 sm:$0xff]  }
  0x2c   : > { %2696 = vperm.xlu0 %3369, %v1978_v1   ;;  %v366_v31 = vpack.c.bf16 %v344_v21, %v342_v20  ;;  %v1982_v32 = vld [vmem:[%s3758_s13 + $0x90] sm:$0xff]  ;;  %v1979_v33 = vld [vmem:[%s3758_s13 + $0x78] sm:$0xff]  ;;  %3304 = vmatprep.mubr.msk.bf16.mxu0 %vm699_vm0, %v3376_v26  ;;  %v1984_v37 = vld [vmem:[%s3758_s13 + $0xa0] sm:$0xff] }
  0x2d   : > { %2681 = vperm.xlu1 %3368, %v1975_v11   ;;  %3319 = vmatprep.mubr.msk.bf16.mxu1 %vm699_vm0, %v3379_v30  ;;  %v365_v34 = vpack.c.bf16 %v343_v29, %v341_v28  ;;  %v3377_v36 = vld [vmem:[%s3950_s21 + $0xf0] ss:$8 sps:$4 sm:$0xff]   ;;  %v1981_v38 = vld [vmem:[%s3758_s13 + $0x88] sm:$0xff]  ;;  %v3380_v39 = vld [vmem:[%s3950_s21 + $0x14] ss:$8 sps:$4 sm:$0xff]  }
  0x2e   : > { %805 = vmatpush1.bf16.msra.mxu0 %v349_v14  ;;  %3355 = vmatpush1.bf16.msra.mxu1 %v349_v14  ;;  %v3383_v40 = vld [vmem:[%s3950_s21 + $0x104] ss:$8 sps:$4 sm:$0xff]   ;;  %v1986_v41 = vld [vmem:[%s3758_s13 + $0xb0] sm:$0xff]  ;;  %v1983_v42 = vld [vmem:[%s3758_s13 + $0x98] sm:$0xff] }
  0x2f   : > { %818 = vmatprep.subr.bf16.mxu0 %v368_v19  ;;  %3346 = vmatprep.subr.bf16.mxu1 %v368_v19  ;;  %v1988_v43 = vld [vmem:[%s3758_s13 + $0xc0] sm:$0xff]  ;;  %v1985_v44 = vld [vmem:[%s3758_s13 + $0xa8] sm:$0xff]  ;;  %v3382_v45 = vld [vmem:[%s3950_s21 + $0x10] ss:$8 sps:$4 sm:$0xff]  }
  0x30   : > { %2706 = vperm.xlu0 %3369, %v1980_v24   ;;  %v3385_v46 = vld [vmem:[%s3950_s21 + $0x100] ss:$8 sps:$4 sm:$0xff]   ;;  %v3386_v47 = vld [vmem:[%s3950_s21 + $0x24] ss:$8 sps:$4 sm:$0xff]   ;;  %v3389_v48 = vld [vmem:[%s3950_s21 + $0x114] ss:$8 sps:$4 sm:$0xff]  }
  0x31   : > { %2691 = vperm.xlu1 %3368, %v1977_v25   ;;  %v1990_v49 = vld [vmem:[%s3758_s13 + $0xd0] sm:$0xff]  ;;  %v1987_v50 = vld [vmem:[%s3758_s13 + $0xb8] sm:$0xff]  ;;  %v1992_v51 = vld [vmem:[%s3758_s13 + $0xe0] sm:$0xff] }
  0x32   : > { %819 = vmatpush2.bf16.msra.mxu0 %v367_v27  ;;  %3356 = vmatpush2.bf16.msra.mxu1 %v367_v27  ;;  %v1989_v52 = vld [vmem:[%s3758_s13 + $0xc8] sm:$0xff]  ;;  %v3391_v54 = vld [vmem:[%s3950_s21 + $0x110] ss:$8 sps:$4 sm:$0xff]   ;;  %v3392_v55 = vld [vmem:[%s3950_s21 + $0x34] ss:$8 sps:$4 sm:$0xff]  }
  0x33   : > { %820 = vmatprep.subr.bf16.mxu0 %v366_v31  ;;  %3347 = vmatprep.subr.bf16.mxu1 %v366_v31  ;;  %v3388_v53 = vld [vmem:[%s3950_s21 + $0x20] ss:$8 sps:$4 sm:$0xff]   ;;  %v3395_v56 = vld [vmem:[%s3950_s21 + $0x124] ss:$8 sps:$4 sm:$0xff]   ;;  %v1994_v57 = vld [vmem:[%s3758_s13 + $0xf0] sm:$0xff] }
  0x34   : > { %2716 = vperm.xlu0 %3369, %v1982_v32   ;;  %v1991_v58 = vld [vmem:[%s3758_s13 + $0xd8] sm:$0xff]  ;;  %v1996_v59 = vld [vmem:[%s3758_s13 + $0x100] sm:$0xff]  ;;  %v1993_v60 = vld [vmem:[%s3758_s13 + $0xe8] sm:$0xff] }
  0x35   : > { %2701 = vperm.xlu1 %3368, %v1979_v33   ;;  %v3394_v61 = vld [vmem:[%s3950_s21 + $0x30] ss:$8 sps:$4 sm:$0xff]   ;;  %v3397_v62 = vld [vmem:[%s3950_s21 + $0x120] ss:$8 sps:$4 sm:$0xff]   ;;  %v3398_v63 = vld [vmem:[%s3950_s21 + $0x44] ss:$8 sps:$4 sm:$0xff]  }
  0x36   : > { %821 = vmatpush2.bf16.msra.mxu0 %v365_v34  ;;  %3357 = vmatpush2.bf16.msra.mxu1 %v365_v34  ;;  %v3401_v0 = vld [vmem:[%s3950_s21 + $0x134] ss:$8 sps:$4 sm:$0xff]   ;;  %v2000_v3 = vld [vmem:[%s3758_s13 + $0x120] sm:$0xff]  ;;  %v1997_v4 = vld [vmem:[%s3758_s13 + $0x108] sm:$0xff] }
  0x37   : > { %v1998_v1 = vld [vmem:[%s3758_s13 + $0x110] sm:$0xff]  ;;  %v1995_v2 = vld [vmem:[%s3758_s13 + $0xf8] sm:$0xff]  ;;  %v3400_v5 = vld [vmem:[%s3950_s21 + $0x40] ss:$8 sps:$4 sm:$0xff]  }
  0x38   : > { %2726 = vperm.xlu0 %3369, %v1984_v37   ;;  %v3403_v6 = vld [vmem:[%s3950_s21 + $0x130] ss:$8 sps:$4 sm:$0xff]   ;;  %v3404_v8 = vld [vmem:[%s3950_s21 + $0x54] ss:$8 sps:$4 sm:$0xff]   ;;  %v3407_v9 = vld [vmem:[%s3950_s21 + $0x144] ss:$8 sps:$4 sm:$0xff]  }
  0x39   : > { %2711 = vperm.xlu1 %3368, %v1981_v38   ;;  %823 = vmatmul.mubr.bf16.vlgmr.msra.gmra.mxu0 %v3374_v35  ;;  %v2002_v10 = vld [vmem:[%s3758_s13 + $0x130] sm:$0xff]  ;;  %v1999_v11 = vld [vmem:[%s3758_s13 + $0x118] sm:$0xff]  ;;  %v2004_v12 = vld [vmem:[%s3758_s13 + $0x140] sm:$0xff] }
  0x3a   : > { %973 = vmatmul.mubr.bf16.vlgmr.msra.gmra.mxu1 %v3377_v36  ;;  %3305 = vmatprep.mubr.msk.bf16.mxu0 %vm699_vm0, %v3380_v39  ;;  %v2001_v13 = vld [vmem:[%s3758_s13 + $0x128] sm:$0xff]  ;;  %v3406_v14 = vld [vmem:[%s3950_s21 + $0x50] ss:$8 sps:$4 sm:$0xff]   ;;  %v3413_v17 = vld [vmem:[%s3950_s21 + $0x154] ss:$8 sps:$4 sm:$0xff]  }
  0x3b   : > { %3320 = vmatprep.mubr.msk.bf16.mxu1 %vm699_vm0, %v3383_v40  ;;  %v3409_v15 = vld [vmem:[%s3950_s21 + $0x140] ss:$8 sps:$4 sm:$0xff]   ;;  %v3410_v16 = vld [vmem:[%s3950_s21 + $0x64] ss:$8 sps:$4 sm:$0xff]   ;;  %v2006_v18 = vld [vmem:[%s3758_s13 + $0x150] sm:$0xff] }
  0x3c   : > { %2736 = vperm.xlu0 %3369, %v1986_v41   ;;  %v2003_v19 = vld [vmem:[%s3758_s13 + $0x138] sm:$0xff]  ;;  %v2008_v20 = vld [vmem:[%s3758_s13 + $0x160] sm:$0xff]  ;;  %v2005_v21 = vld [vmem:[%s3758_s13 + $0x148] sm:$0xff] }
  0x3d   : > { %2721 = vperm.xlu1 %3368, %v1983_v42   ;;  %v3412_v22 = vld [vmem:[%s3950_s21 + $0x60] ss:$8 sps:$4 sm:$0xff]   ;;  %v3415_v23 = vld [vmem:[%s3950_s21 + $0x150] ss:$8 sps:$4 sm:$0xff]   ;;  %v3416_v24 = vld [vmem:[%s3950_s21 + $0x74] ss:$8 sps:$4 sm:$0xff]  }
  0x3e   : > { %v3419_v25 = vld [vmem:[%s3950_s21 + $0x164] ss:$8 sps:$4 sm:$0xff]   ;;  %v2010_v26 = vld [vmem:[%s3758_s13 + $0x170] sm:$0xff]  ;;  %v2007_v27 = vld [vmem:[%s3758_s13 + $0x158] sm:$0xff] }
  0x3f   : > { %v2012_v28 = vld [vmem:[%s3758_s13 + $0x180] sm:$0xff]  ;;  %v2009_v29 = vld [vmem:[%s3758_s13 + $0x168] sm:$0xff]  ;;  %v3418_v30 = vld [vmem:[%s3950_s21 + $0x70] ss:$8 sps:$4 sm:$0xff]  }
  0x40   : > { %2746 = vperm.xlu0 %3369, %v1988_v43   ;;  %v3421_v31 = vld [vmem:[%s3950_s21 + $0x160] ss:$8 sps:$4 sm:$0xff]   ;;  %v3422_v32 = vld [vmem:[%s3950_s21 + $0x84] ss:$8 sps:$4 sm:$0xff]   ;;  %v3425_v33 = vld [vmem:[%s3950_s21 + $0x174] ss:$8 sps:$4 sm:$0xff]  }
  0x41   : > { %2731 = vperm.xlu1 %3368, %v1985_v44   ;;  %833 = vmatmul.mubr.bf16.gmra.mxu0 %v3382_v45  ;;  %v2014_v34 = vld [vmem:[%s3758_s13 + $0x190] sm:$0xff]  ;;  %v2011_v35 = vld [vmem:[%s3758_s13 + $0x178] sm:$0xff]  ;;  %v2016_v36 = vld [vmem:[%s3758_s13 + $0x1a0] sm:$0xff] }
  0x42   : > { %983 = vmatmul.mubr.bf16.gmra.mxu1 %v3385_v46  ;;  %3306 = vmatprep.mubr.msk.bf16.mxu0 %vm699_vm0, %v3386_v47  ;;  %v2013_v37 = vld [vmem:[%s3758_s13 + $0x188] sm:$0xff]  ;;  %v3427_v39 = vld [vmem:[%s3950_s21 + $0x170] ss:$8 sps:$4 sm:$0xff]   ;;  %v3428_v40 = vld [vmem:[%s3950_s21 + $0x94] ss:$8 sps:$4 sm:$0xff]  }
  0x43   : > { %3321 = vmatprep.mubr.msk.bf16.mxu1 %vm699_vm0, %v3389_v48  ;;  %v3424_v38 = vld [vmem:[%s3950_s21 + $0x80] ss:$8 sps:$4 sm:$0xff]   ;;  %v3431_v41 = vld [vmem:[%s3950_s21 + $0x184] ss:$8 sps:$4 sm:$0xff]   ;;  %v2018_v42 = vld [vmem:[%s3758_s13 + $0x1b0] sm:$0xff] }
  0x44   : > { %2756 = vperm.xlu0 %3369, %v1990_v49   ;;  %v2015_v43 = vld [vmem:[%s3758_s13 + $0x198] sm:$0xff]  ;;  %v2020_v44 = vld [vmem:[%s3758_s13 + $0x1c0] sm:$0xff]  ;;  %v2017_v45 = vld [vmem:[%s3758_s13 + $0x1a8] sm:$0xff] }
  0x45   : > { %2741 = vperm.xlu1 %3368, %v1987_v50   ;;  %v3430_v46 = vld [vmem:[%s3950_s21 + $0x90] ss:$8 sps:$4 sm:$0xff]   ;;  %v3433_v47 = vld [vmem:[%s3950_s21 + $0x180] ss:$8 sps:$4 sm:$0xff]   ;;  %v3434_v48 = vld [vmem:[%s3950_s21 + $0xa4] ss:$8 sps:$4 sm:$0xff]  }
  0x46   : > { %v3437_v49 = vld [vmem:[%s3950_s21 + $0x194] ss:$8 sps:$4 sm:$0xff]  }
  0x47   : > { %v2019_v50 = vld [vmem:[%s3758_s13 + $0x1b8] sm:$0xff] }
  0x48   : > { %2766 = vperm.xlu0 %3369, %v1992_v51   ;;  %v2021_v51 = vld [vmem:[%s3758_s13 + $0x1c8] sm:$0xff] }
  0x49   : > { %2751 = vperm.xlu1 %3368, %v1989_v52   ;;  %843 = vmatmul.mubr.bf16.gmra.mxu0 %v3388_v53  ;;  %v3436_v52 = vld [vmem:[%s3950_s21 + $0xa0] ss:$8 sps:$4 sm:$0xff]   ;;  %v3439_v53 = vld [vmem:[%s3950_s21 + $0x190] ss:$8 sps:$4 sm:$0xff]  }
  0x4a   : > { %993 = vmatmul.mubr.bf16.gmra.mxu1 %v3391_v54  ;;  %3307 = vmatprep.mubr.msk.bf16.mxu0 %vm699_vm0, %v3392_v55  ;;  %v3440_v54 = vld [vmem:[%s3950_s21 + $0xb4] ss:$8 sps:$4 sm:$0xff]   ;;  %v3443_v55 = vld [vmem:[%s3950_s21 + $0x1a4] ss:$8 sps:$4 sm:$0xff]  }
  0x4b   : > { %3322 = vmatprep.mubr.msk.bf16.mxu1 %vm699_vm0, %v3395_v56  ;;  %v3442_v56 = vld [vmem:[%s3950_s21 + $0xb0] ss:$8 sps:$4 sm:$0xff]  }
  0x4c   : > { %2776 = vperm.xlu0 %3369, %v1994_v57   ;;  %v3445_v57 = vld [vmem:[%s3950_s21 + $0x1a0] ss:$8 sps:$4 sm:$0xff]  }
  0x4d   : > { %2761 = vperm.xlu1 %3368, %v1991_v58   ;;  %v3446_v58 = vld [vmem:[%s3950_s21 + $0xc4] ss:$8 sps:$4 sm:$0xff]  }
  0x50   : > { %2786 = vperm.xlu0 %3369, %v1996_v59   ;;  %v3449_v59 = vld [vmem:[%s3950_s21 + $0x1b4] ss:$8 sps:$4 sm:$0xff]  }
  0x51   : > { %2771 = vperm.xlu1 %3368, %v1993_v60   ;;  %853 = vmatmul.mubr.bf16.gmra.mxu0 %v3394_v61  ;;  %v3448_v60 = vld [vmem:[%s3950_s21 + $0xc0] ss:$8 sps:$4 sm:$0xff]   ;;  %v3451_v61 = vld [vmem:[%s3950_s21 + $0x1b0] ss:$8 sps:$4 sm:$0xff]  }
  0x52   : > { %1003 = vmatmul.mubr.bf16.gmra.mxu1 %v3397_v62  ;;  %3308 = vmatprep.mubr.msk.bf16.mxu0 %vm699_vm0, %v3398_v63  ;;  %v3452_v62 = vld [vmem:[%s3950_s21 + $0xd4] ss:$8 sps:$4 sm:$0xff]   ;;  %v3455_v63 = vld [vmem:[%s3950_s21 + $0x1c4] ss:$8 sps:$4 sm:$0xff]  }
  0x53   : > { %3323 = vmatprep.mubr.msk.bf16.mxu1 %vm699_vm0, %v3401_v0  ;;  %v3454_v0 = vld [vmem:[%s3950_s21 + $0xd0] ss:$8 sps:$4 sm:$0xff]  }
  0x54   : > { %2796 = vperm.xlu0 %3369, %v1998_v1   ;;  %v3457_v1 = vld [vmem:[%s3950_s21 + $0x1c0] ss:$8 sps:$4 sm:$0xff]  }
  0x55   : > { %2781 = vperm.xlu1 %3368, %v1995_v2   ;;  %v3458_v2 = vld [vmem:[%s3950_s21 + $0xe4] ss:$8 sps:$4 sm:$0xff]  }
  0x58   : > { %2806 = vperm.xlu0 %3369, %v2000_v3   ;;  %v3461_v3 = vld [vmem:[%s3950_s21 + $0x1d4] ss:$8 sps:$4 sm:$0xff]  }
  0x59   : > { %2791 = vperm.xlu1 %3368, %v1997_v4   ;;  %863 = vmatmul.mubr.bf16.gmra.mxu0 %v3400_v5  ;;  %v3460_v4 = vld [vmem:[%s3950_s21 + $0xe0] ss:$8 sps:$4 sm:$0xff]   ;;  %v3463_v5 = vld [vmem:[%s3950_s21 + $0x1d0] ss:$8 sps:$4 sm:$0xff]  }
  0x5a   : > { %1013 = vmatmul.mubr.bf16.gmra.mxu1 %v3403_v6  ;;  %3309 = vmatprep.mubr.msk.bf16.mxu0 %vm699_vm0, %v3404_v8 }
  0x5b   : > { %3324 = vmatprep.mubr.msk.bf16.mxu1 %vm699_vm0, %v3407_v9 }
  0x5c   : > { %2816 = vperm.xlu0 %3369, %v2002_v10  }
  0x5d   : > { %2801 = vperm.xlu1 %3368, %v1999_v11  }
  0x60   : > { %2826 = vperm.xlu0 %3369, %v2004_v12  }
  0x61   : > { %2811 = vperm.xlu1 %3368, %v2001_v13   ;;  %873 = vmatmul.mubr.bf16.gmra.mxu0 %v3406_v14 }
  0x62   : > { %1023 = vmatmul.mubr.bf16.gmra.mxu1 %v3409_v15  ;;  %3310 = vmatprep.mubr.msk.bf16.mxu0 %vm699_vm0, %v3410_v16 }
  0x63   : > { %3325 = vmatprep.mubr.msk.bf16.mxu1 %vm699_vm0, %v3413_v17 }
  0x64   : > { %2836 = vperm.xlu0 %3369, %v2006_v18  }
  0x65   : > { %2821 = vperm.xlu1 %3368, %v2003_v19  }
  0x68   : > { %2846 = vperm.xlu0 %3369, %v2008_v20  }
  0x69   : > { %2831 = vperm.xlu1 %3368, %v2005_v21   ;;  %883 = vmatmul.mubr.bf16.gmra.mxu0 %v3412_v22 }
  0x6a   : > { %1033 = vmatmul.mubr.bf16.gmra.mxu1 %v3415_v23  ;;  %3311 = vmatprep.mubr.msk.bf16.mxu0 %vm699_vm0, %v3416_v24 }
  0x6b   : > { %3326 = vmatprep.mubr.msk.bf16.mxu1 %vm699_vm0, %v3419_v25 }
  0x6c   : > { %2856 = vperm.xlu0 %3369, %v2010_v26  }
  0x6d   : > { %2841 = vperm.xlu1 %3368, %v2007_v27  }
  0x70   : > { %2866 = vperm.xlu0 %3369, %v2012_v28  }
  0x71   : > { %2851 = vperm.xlu1 %3368, %v2009_v29   ;;  %893 = vmatmul.mubr.bf16.gmra.mxu0 %v3418_v30 }
  0x72   : > { %1043 = vmatmul.mubr.bf16.gmra.mxu1 %v3421_v31  ;;  %3312 = vmatprep.mubr.msk.bf16.mxu0 %vm699_vm0, %v3422_v32 }
  0x73   : > { %3327 = vmatprep.mubr.msk.bf16.mxu1 %vm699_vm0, %v3425_v33 }
  0x74   : > { %2876 = vperm.xlu0 %3369, %v2014_v34  }
  0x75   : > { %2861 = vperm.xlu1 %3368, %v2011_v35  }
  0x78   : > { %2886 = vperm.xlu0 %3369, %v2016_v36  }
  0x79   : > { %2871 = vperm.xlu1 %3368, %v2013_v37   ;;  %903 = vmatmul.mubr.bf16.gmra.mxu0 %v3424_v38 }
  0x7a   : > { %1053 = vmatmul.mubr.bf16.gmra.mxu1 %v3427_v39  ;;  %3313 = vmatprep.mubr.msk.bf16.mxu0 %vm699_vm0, %v3428_v40 }
  0x7b   : > { %3328 = vmatprep.mubr.msk.bf16.mxu1 %vm699_vm0, %v3431_v41 }
  0x7c   : > { %2896 = vperm.xlu0 %3369, %v2018_v42  }
  0x7d   : > { %2881 = vperm.xlu1 %3368, %v2015_v43  }
  0x80   : > { %2906 = vperm.xlu0 %3369, %v2020_v44  }
  0x81   : > { %2891 = vperm.xlu1 %3368, %v2017_v45   ;;  %913 = vmatmul.mubr.bf16.gmra.mxu0 %v3430_v46 }
  0x82   : > { %1063 = vmatmul.mubr.bf16.gmra.mxu1 %v3433_v47  ;;  %3314 = vmatprep.mubr.msk.bf16.mxu0 %vm699_vm0, %v3434_v48 }
  0x83   : > { %3329 = vmatprep.mubr.msk.bf16.mxu1 %vm699_vm0, %v3437_v49 }
  0x85   : > { %2901 = vperm.xlu1 %3368, %v2019_v50  }
  0x89   : > { %2911 = vperm.xlu1 %3368, %v2021_v51   ;;  %923 = vmatmul.mubr.bf16.gmra.mxu0 %v3436_v52 }
  0x8a   : > { %1073 = vmatmul.mubr.bf16.gmra.mxu1 %v3439_v53  ;;  %3315 = vmatprep.mubr.msk.bf16.mxu0 %vm699_vm0, %v3440_v54 }
  0x8b   : > { %3330 = vmatprep.mubr.msk.bf16.mxu1 %vm699_vm0, %v3443_v55 }
  0x8e   : > { %v4096_v9 = vpop.permute.xlu0 %2631 }
  0x8f   : > { %5991 = vst [vmem:[#allocation4_spill] sm:$0xff] %v4096_v9 }
  0x90   : > { %v4092_v6 = vpop.permute.xlu1 %2626 }
  0x91   : > { %933 = vmatmul.mubr.bf16.gmra.mxu0 %v3442_v56  ;;  %5989 = vst [vmem:[#allocation2_spill] sm:$0xff] %v4092_v6 }
  0x92   : > { %1083 = vmatmul.mubr.bf16.gmra.mxu1 %v3445_v57  ;;  %3316 = vmatprep.mubr.msk.bf16.mxu0 %vm699_vm0, %v3446_v58 }
  0x93   : > { %3331 = vmatprep.mubr.msk.bf16.mxu1 %vm699_vm0, %v3449_v59  ;;  %v4100_v11 = vpop.permute.xlu0 %2646 }
  0x94   : > { %v4094_v8 = vpop.permute.xlu1 %2636  ;;  %5993 = vst [vmem:[#allocation6_spill] sm:$0xff] %v4100_v11 }
  0x95   : > { %5990 = vst [vmem:[#allocation3_spill] sm:$0xff] %v4094_v8 }
  0x97   : > { %v4104_v13 = vpop.permute.xlu0 %2656 }
  0x98   : > { %v4098_v10 = vpop.permute.xlu1 %2641  ;;  %5995 = vst [vmem:[#allocation8_spill] sm:$0xff] %v4104_v13 }
  0x99   : > { %943 = vmatmul.mubr.bf16.gmra.mxu0 %v3448_v60  ;;  %5992 = vst [vmem:[#allocation5_spill] sm:$0xff] %v4098_v10 }
  0x9a   : > { %1093 = vmatmul.mubr.bf16.gmra.mxu1 %v3451_v61  ;;  %3317 = vmatprep.mubr.msk.bf16.mxu0 %vm699_vm0, %v3452_v62 }
  0x9b   : > { %3332 = vmatprep.mubr.msk.bf16.mxu1 %vm699_vm0, %v3455_v63  ;;  %v4108_v15 = vpop.permute.xlu0 %2666 }
  0x9c   : > { %v4102_v12 = vpop.permute.xlu1 %2651  ;;  %5997 = vst [vmem:[#allocation10_spill] sm:$0xff] %v4108_v15 }
  0x9d   : > { %5994 = vst [vmem:[#allocation7_spill] sm:$0xff] %v4102_v12 }
  0x9f   : > { %v4116_v19 = vpop.permute.xlu0 %2676 }
  0xa0   : > { %v4106_v14 = vpop.permute.xlu1 %2661  ;;  %5999 = vst [vmem:[#allocation12_spill] sm:$0xff] %v4116_v19 }
  0xa1   : > { %953 = vmatmul.mubr.bf16.gmra.mxu0 %v3454_v0  ;;  %5996 = vst [vmem:[#allocation9_spill] sm:$0xff] %v4106_v14 }
  0xa2   : > { %1103 = vmatmul.mubr.bf16.gmra.mxu1 %v3457_v1  ;;  %3318 = vmatprep.mubr.msk.bf16.mxu0 %vm699_vm0, %v3458_v2 }
  0xa3   : > { %3333 = vmatprep.mubr.msk.bf16.mxu1 %vm699_vm0, %v3461_v3  ;;  %v4137_v30 = vpop.permute.xlu0 %2686 }
  0xa4   : > { %v4110_v16 = vpop.permute.xlu1 %2671  ;;  %6001 = vst [vmem:[#allocation14_spill] sm:$0xff] %v4137_v30 }
  0xa5   : > { %5998 = vst [vmem:[#allocation11_spill] sm:$0xff] %v4110_v16 }
  0xa7   : > { %v4165_v46 = vpop.permute.xlu0 %2696 }
  0xa8   : > { %v4129_v26 = vpop.permute.xlu1 %2681  ;;  %6003 = vst [vmem:[#allocation16_spill] sm:$0xff] %v4165_v46 }
  0xa9   : > { %963 = vmatmul.mubr.bf16.gmra.mxu0 %v3460_v4  ;;  %6000 = vst [vmem:[#allocation13_spill] sm:$0xff] %v4129_v26 }
  0xaa   : > { %1113 = vmatmul.mubr.bf16.gmra.mxu1 %v3463_v5 }
  0xab   : > { %v4187_v58 = vpop.permute.xlu0 %2706 }
  0xac   : > { %v4153_v39 = vpop.permute.xlu1 %2691  ;;  %6005 = vst [vmem:[#allocation18_spill] sm:$0xff] %v4187_v58 }
  0xad   : > { %6002 = vst [vmem:[#allocation15_spill] sm:$0xff] %v4153_v39 }
  0xb0   : > { %v4179_v54 = vpop.permute.xlu1 %2701 }
  0xb1   : > { %6004 = vst [vmem:[#allocation17_spill] sm:$0xff] %v4179_v54 }
  0xb4   : > { %v4204_v4 = vpop.permute.xlu1 %2711 }
  0xb5   : > { %6006 = vst [vmem:[#allocation19_spill] sm:$0xff] %v4204_v4 }
  0xf9   : > { %v4112_v17 = vpop.f32.mrf.mxu0 }
  0xfa   : > { %v4114_v18 = vpop.f32.mrf.mxu1 }
  0xfb   : > { %v4118_v20 = vpop.f32.mrf.mxu0 }
  0xfc   : > { %v4120_v21 = vpop.f32.mrf.mxu1  ;;  %v1124_v22 = vsel %vm1123_vm1, %v4118_v20, 0.0 }
  0xfd   : > { %v4124_v23 = vpop.f32.mrf.mxu0  ;;  %v1125_v25 = vadd.f32 %v1124_v22, %v4112_v17  ;;  %v1244_v27 = vsel %vm1123_vm1, %v4120_v21, 0.0 }
  0xfe   : > { %v4126_v24 = vpop.f32.mrf.mxu1  ;;  %v1245_v35 = vadd.f32 %v1244_v27, %v4114_v18 }
  0xff   : > { %1126 = vadd.xlane.f32.xlu0 %v1125_v25  ;;  %v4135_v29 = vpop.f32.mrf.mxu0 }
 0x100   : > { %v4133_v28 = vpop.f32.mrf.mxu1  ;;  %v1128_v36 = vsel %vm1123_vm1, %v4135_v29, 0.0 }
 0x101   : > { %v1248_v31 = vsel %vm1123_vm1, %v4133_v28, 0.0  ;;  %v4141_v32 = vpop.f32.mrf.mxu0  ;;  %v1129_v44 = vadd.f32 %v1128_v36, %v4124_v23 }
 0x102   : > { %v4143_v33 = vpop.f32.mrf.mxu1  ;;  %v1249_v34 = vadd.f32 %v1248_v31, %v4126_v24 }
 0x103   : > { %1246 = vadd.xlane.f32.xlu0 %v1245_v35  ;;  %v4149_v37 = vpop.f32.mrf.mxu0 }
 0x104   : > { %1250 = vadd.xlane.f32.xlu1 %v1249_v34  ;;  %v4151_v38 = vpop.f32.mrf.mxu1  ;;  %v1132_v40 = vsel %vm1123_vm1, %v4149_v37, 0.0  ;;  %v4215_v34 = vpop.permute.xlu0 %2716 }
 0x105   : > { %v1252_v41 = vsel %vm1123_vm1, %v4151_v38, 0.0  ;;  %v4159_v42 = vpop.f32.mrf.mxu0  ;;  %v1133_v45 = vadd.f32 %v1132_v40, %v4141_v32  ;;  %6007 = vst [vmem:[#allocation20_spill] sm:$0xff] %v4215_v34 }
 0x106   : > { %v4161_v43 = vpop.f32.mrf.mxu1  ;;  %v1253_v49 = vadd.f32 %v1252_v41, %v4143_v33 }
 0x107   : > { %1130 = vadd.xlane.f32.xlu0 %v1129_v44  ;;  %v4167_v47 = vpop.f32.mrf.mxu0 }
 0x108   : > { %1134 = vadd.xlane.f32.xlu1 %v1133_v45  ;;  %v4169_v48 = vpop.f32.mrf.mxu1  ;;  %v1136_v50 = vsel %vm1123_vm1, %v4167_v47, 0.0 }
 0x109   : > { %v4174_v51 = vpop.f32.mrf.mxu0  ;;  %v1137_v52 = vadd.f32 %v1136_v50, %v4159_v42  ;;  %v1256_v55 = vsel %vm1123_vm1, %v4169_v48, 0.0 }
 0x10a   : > { %v4177_v53 = vpop.f32.mrf.mxu1  ;;  %v1257_v62 = vadd.f32 %v1256_v55, %v4161_v43 }
 0x10b   : > { %1254 = vadd.xlane.f32.xlu0 %v1253_v49  ;;  %v4183_v56 = vpop.f32.mrf.mxu0 }
 0x10c   : > { %1138 = vadd.xlane.f32.xlu1 %v1137_v52  ;;  %v4185_v57 = vpop.f32.mrf.mxu1  ;;  %v1140_v59 = vsel %vm1123_vm1, %v4183_v56, 0.0  ;;  %v4231_v52 = vpop.permute.xlu1 %2721 }
 0x10d   : > { %v1260_v60 = vsel %vm1123_vm1, %v4185_v57, 0.0  ;;  %v4193_v61 = vpop.f32.mrf.mxu0  ;;  %v1141_v63 = vadd.f32 %v1140_v59, %v4174_v51  ;;  %6008 = vst [vmem:[#allocation21_spill] sm:$0xff] %v4231_v52 }
 0x10e   : > { %v4197_v0 = vpop.f32.mrf.mxu1  ;;  %v1261_v3 = vadd.f32 %v1260_v60, %v4177_v53 }
 0x10f   : > { %1142 = vadd.xlane.f32.xlu0 %v1141_v63  ;;  %v4199_v1 = vpop.f32.mrf.mxu0 }
 0x110   : > { %1258 = vadd.xlane.f32.xlu1 %v1257_v62  ;;  %v4201_v2 = vpop.f32.mrf.mxu1  ;;  %v1144_v5 = vsel %vm1123_vm1, %v4199_v1, 0.0  ;;  %v4238_v62 = vpop.permute.xlu0 %2726 }
 0x111   : > { %v1264_v22 = vsel %vm1123_vm1, %v4201_v2, 0.0  ;;  %v4210_v25 = vpop.f32.mrf.mxu0  ;;  %v1145_v27 = vadd.f32 %v1144_v5, %v4193_v61  ;;  %6009 = vst [vmem:[#allocation22_spill] sm:$0xff] %v4238_v62 }
 0x112   : > { %v4213_v31 = vpop.f32.mrf.mxu1  ;;  %v1265_v40 = vadd.f32 %v1264_v22, %v4197_v0 }
 0x113   : > { %1262 = vadd.xlane.f32.xlu0 %v1261_v3  ;;  %v4217_v35 = vpop.f32.mrf.mxu0 }
 0x114   : > { %1146 = vadd.xlane.f32.xlu1 %v1145_v27  ;;  %v4219_v36 = vpop.f32.mrf.mxu1  ;;  %v1148_v41 = vsel %vm1123_vm1, %v4217_v35, 0.0 }
 0x115   : > { %v1268_v44 = vsel %vm1123_vm1, %v4219_v36, 0.0  ;;  %v4226_v45 = vpop.f32.mrf.mxu0  ;;  %v1149_v49 = vadd.f32 %v1148_v41, %v4210_v25 }
 0x116   : > { %v4229_v50 = vpop.f32.mrf.mxu1  ;;  %v1269_v60 = vadd.f32 %v1268_v44, %v4213_v31 }
 0x117   : > { %1150 = vadd.xlane.f32.xlu0 %v1149_v49  ;;  %v4233_v55 = vpop.f32.mrf.mxu0  ;;  %v4254_v49 = vpop.permute.xlu1 %2731 }
 0x118   : > { %1266 = vadd.xlane.f32.xlu1 %v1265_v40  ;;  %v4235_v59 = vpop.f32.mrf.mxu1  ;;  %v1152_v63 = vsel %vm1123_vm1, %v4233_v55, 0.0  ;;  %6010 = vst [vmem:[#allocation23_spill] sm:$0xff] %v4254_v49 }
 0x119   : > { %v1272_v3 = vsel %vm1123_vm1, %v4235_v59, 0.0  ;;  %v4244_v5 = vpop.f32.mrf.mxu0  ;;  %v1153_v22 = vadd.f32 %v1152_v63, %v4226_v45 }
 0x11a   : > { %v4247_v27 = vpop.f32.mrf.mxu1  ;;  %v1273_v44 = vadd.f32 %v1272_v3, %v4229_v50 }
 0x11b   : > { %1270 = vadd.xlane.f32.xlu0 %v1269_v60  ;;  %v4249_v40 = vpop.f32.mrf.mxu0 }
 0x11c   : > { %1154 = vadd.xlane.f32.xlu1 %v1153_v22  ;;  %v4251_v41 = vpop.f32.mrf.mxu1  ;;  %v1156_v7 = vsel %vm1123_vm1, %v4249_v40, 0.0  ;;  %v4265_v22 = vpop.permute.xlu0 %2736 }
 0x11d   : > { %v1276_v62 = vsel %vm1123_vm1, %v4251_v41, 0.0  ;;  %v4260_v34 = vpop.f32.mrf.mxu0  ;;  %v1157_v63 = vadd.f32 %v1156_v7, %v4244_v5  ;;  %6011 = vst [vmem:[#allocation24_spill] sm:$0xff] %v4265_v22 }
 0x11e   : > { %v4263_v60 = vpop.f32.mrf.mxu1  ;;  %v1277_v49 = vadd.f32 %v1276_v62, %v4247_v27 }
 0x11f   : > { %1158 = vadd.xlane.f32.xlu0 %v1157_v63  ;;  %v4267_v58 = vpop.f32.mrf.mxu0 }
 0x120   : > { %1274 = vadd.xlane.f32.xlu1 %v1273_v44  ;;  %v4269_v3 = vpop.f32.mrf.mxu1  ;;  %v1160_v52 = vsel %vm1123_vm1, %v4267_v58, 0.0  ;;  %v4281_v44 = vpop.permute.xlu1 %2741 }
 0x121   : > { %v1280_v46 = vsel %vm1123_vm1, %v4269_v3, 0.0  ;;  %v4276_v4 = vpop.f32.mrf.mxu0  ;;  %v1161_v7 = vadd.f32 %v1160_v52, %v4260_v34  ;;  %6012 = vst [vmem:[#allocation25_spill] sm:$0xff] %v4281_v44  ;;  %v4288_v54 = vpop.permute.xlu0 %2746 }
 0x122   : > { %v4279_v30 = vpop.f32.mrf.mxu1  ;;  %v1281_v62 = vadd.f32 %v1280_v46, %v4263_v60  ;;  %6013 = vst [vmem:[#allocation26_spill] sm:$0xff] %v4288_v54 }
 0x123   : > { %1278 = vadd.xlane.f32.xlu0 %v1277_v49  ;;  %v4283_v63 = vpop.f32.mrf.mxu0 }
 0x124   : > { %1162 = vadd.xlane.f32.xlu1 %v1161_v7  ;;  %v4285_v22 = vpop.f32.mrf.mxu1  ;;  %v1164_v19 = vsel %vm1123_vm1, %v4283_v63, 0.0  ;;  %v4304_v54 = vpop.permute.xlu1 %2751 }
 0x125   : > { %v1284_v52 = vsel %vm1123_vm1, %v4285_v22, 0.0  ;;  %v4294_v39 = vpop.f32.mrf.mxu0  ;;  %v1165_v44 = vadd.f32 %v1164_v19, %v4276_v4  ;;  %6015 = vst [vmem:[#allocation28_spill] sm:$0xff] %v4304_v54 }
 0x126   : > { %v4297_v49 = vpop.f32.mrf.mxu1  ;;  %v1285_v46 = vadd.f32 %v1284_v52, %v4279_v30 }
 0x127   : > { %6014 = vst [vmem:[#allocation27_spill] sm:$0xff] %v4297_v49  ;;  %1166 = vadd.xlane.f32.xlu0 %v1165_v44  ;;  %v4299_v7 = vpop.f32.mrf.mxu0  ;;  %v4315_v44 = vpop.permute.xlu0 %2756 }
 0x128   : > { %1282 = vadd.xlane.f32.xlu1 %v1281_v62  ;;  %v4301_v15 = vpop.f32.mrf.mxu1  ;;  %v1168_v26 = vsel %vm1123_vm1, %v4299_v7, 0.0  ;;  %6017 = vst [vmem:[#allocation30_spill] sm:$0xff] %v4315_v44 }
 0x129   : > { %v1288_v14 = vsel %vm1123_vm1, %v4301_v15, 0.0  ;;  %v4310_v16 = vpop.f32.mrf.mxu0  ;;  %v1169_v19 = vadd.f32 %v1168_v26, %v4294_v39 }
 0x12a   : > { %v4313_v62 = vpop.f32.mrf.mxu1  ;;  %v1289_v54 = vadd.f32 %v1288_v14, %v4297_v49 }
 0x12b   : > { %6016 = vst [vmem:[#allocation29_spill] sm:$0xff] %v4313_v62  ;;  %1286 = vadd.xlane.f32.xlu0 %v1285_v46  ;;  %v4317_v13 = vpop.f32.mrf.mxu0  ;;  %v4331_v46 = vpop.permute.xlu1 %2761 }
 0x12c   : > { %1170 = vadd.xlane.f32.xlu1 %v1169_v19  ;;  %v4319_v52 = vpop.f32.mrf.mxu1  ;;  %v1172_v12 = vsel %vm1123_vm1, %v4317_v13, 0.0  ;;  %6021 = vst [vmem:[#allocation34_spill] sm:$0xff] %v4331_v46  ;;  %v4338_v9 = vpop.permute.xlu0 %2766 }
 0x12d   : > { %6018 = vst [vmem:[#allocation31_spill] sm:$0xff] %v4319_v52  ;;  %v1292_v11 = vsel %vm1123_vm1, %v4319_v52, 0.0  ;;  %v4326_v10 = vpop.f32.mrf.mxu0  ;;  %v1173_v26 = vadd.f32 %v1172_v12, %v4310_v16  ;;  %6024 = vst [vmem:[#allocation37_spill] sm:$0xff] %v4338_v9 }
 0x12e   : > { %6019 = vst [vmem:[#allocation32_spill] sm:$0xff] %v4326_v10  ;;  %v4329_v8 = vpop.f32.mrf.mxu1  ;;  %v1293_v14 = vadd.f32 %v1292_v11, %v4313_v62 }
 0x12f   : > { %6020 = vst [vmem:[#allocation33_spill] sm:$0xff] %v4329_v8  ;;  %1174 = vadd.xlane.f32.xlu0 %v1173_v26  ;;  %v4333_v19 = vpop.f32.mrf.mxu0  ;;  %v4354_v9 = vpop.permute.xlu1 %2771 }
 0x130   : > { %1290 = vadd.xlane.f32.xlu1 %v1289_v54  ;;  %6022 = vst [vmem:[#allocation35_spill] sm:$0xff] %v4333_v19  ;;  %v4335_v44 = vpop.f32.mrf.mxu1  ;;  %v1176_v6 = vsel %vm1123_vm1, %v4333_v19, 0.0  ;;  %6029 = vst [vmem:[#allocation42_spill] sm:$0xff] %v4354_v9 }
 0x131   : > { %6023 = vst [vmem:[#allocation36_spill] sm:$0xff] %v4335_v44  ;;  %v1296_v12 = vsel %vm1123_vm1, %v4335_v44, 0.0  ;;  %v4344_v52 = vpop.f32.mrf.mxu0  ;;  %v1177_v46 = vadd.f32 %v1176_v6, %v4326_v10 }
 0x132   : > { %6025 = vst [vmem:[#allocation38_spill] sm:$0xff] %v4344_v52  ;;  %v4347_v54 = vpop.f32.mrf.mxu1  ;;  %v1297_v11 = vadd.f32 %v1296_v12, %v4329_v8 }
 0x133   : > { %6026 = vst [vmem:[#allocation39_spill] sm:$0xff] %v4347_v54  ;;  %1294 = vadd.xlane.f32.xlu0 %v1293_v14  ;;  %v4349_v26 = vpop.f32.mrf.mxu0 }
 0x134   : > { %1178 = vadd.xlane.f32.xlu1 %v1177_v46  ;;  %6027 = vst [vmem:[#allocation40_spill] sm:$0xff] %v4349_v26  ;;  %v4351_v49 = vpop.f32.mrf.mxu1  ;;  %v1180_v19 = vsel %vm1123_vm1, %v4349_v26, 0.0  ;;  %v4365_v46 = vpop.permute.xlu0 %2776 }
 0x135   : > { %6028 = vst [vmem:[#allocation41_spill] sm:$0xff] %v4351_v49  ;;  %v1300_v44 = vsel %vm1123_vm1, %v4351_v49, 0.0  ;;  %v4360_v62 = vpop.f32.mrf.mxu0  ;;  %v1181_v6 = vadd.f32 %v1180_v19, %v4344_v52  ;;  %6032 = vst [vmem:[#allocation45_spill] sm:$0xff] %v4365_v46 }
 0x136   : > { %6030 = vst [vmem:[#allocation43_spill] sm:$0xff] %v4360_v62  ;;  %v4363_v14 = vpop.f32.mrf.mxu1  ;;  %v1301_v9 = vadd.f32 %v1300_v44, %v4347_v54 }
 0x137   : > { %6031 = vst [vmem:[#allocation44_spill] sm:$0xff] %v4363_v14  ;;  %1182 = vadd.xlane.f32.xlu0 %v1181_v6  ;;  %v4367_v10 = vpop.f32.mrf.mxu0 }
 0x138   : > { %1298 = vadd.xlane.f32.xlu1 %v1297_v11  ;;  %6033 = vst [vmem:[#allocation46_spill] sm:$0xff] %v4367_v10  ;;  %v4369_v12 = vpop.f32.mrf.mxu1  ;;  %v1184_v8 = vsel %vm1123_vm1, %v4367_v10, 0.0  ;;  %v4381_v11 = vpop.permute.xlu1 %2781 }
 0x139   : > { %6034 = vst [vmem:[#allocation47_spill] sm:$0xff] %v4369_v12  ;;  %v1304_v49 = vsel %vm1123_vm1, %v4369_v12, 0.0  ;;  %v4376_v26 = vpop.f32.mrf.mxu0  ;;  %v1185_v19 = vadd.f32 %v1184_v8, %v4360_v62  ;;  %6037 = vst [vmem:[#allocation50_spill] sm:$0xff] %v4381_v11  ;;  %v4388_v10 = vpop.permute.xlu0 %2786 }
 0x13a   : > { %6035 = vst [vmem:[#allocation48_spill] sm:$0xff] %v4376_v26  ;;  %v4379_v52 = vpop.f32.mrf.mxu1  ;;  %v1305_v44 = vadd.f32 %v1304_v49, %v4363_v14  ;;  %6040 = vst [vmem:[#allocation53_spill] sm:$0xff] %v4388_v10 }
 0x13b   : > { %6036 = vst [vmem:[#allocation49_spill] sm:$0xff] %v4379_v52  ;;  %1302 = vadd.xlane.f32.xlu0 %v1301_v9  ;;  %v4383_v6 = vpop.f32.mrf.mxu0 }
 0x13c   : > { %1186 = vadd.xlane.f32.xlu1 %v1185_v19  ;;  %6038 = vst [vmem:[#allocation51_spill] sm:$0xff] %v4383_v6  ;;  %v4385_v46 = vpop.f32.mrf.mxu1  ;;  %v1188_v12 = vsel %vm1123_vm1, %v4383_v6, 0.0  ;;  %v4404_v10 = vpop.permute.xlu1 %2791 }
 0x13d   : > { %6039 = vst [vmem:[#allocation52_spill] sm:$0xff] %v4385_v46  ;;  %v1308_v8 = vsel %vm1123_vm1, %v4385_v46, 0.0  ;;  %v4394_v62 = vpop.f32.mrf.mxu0  ;;  %v1189_v11 = vadd.f32 %v1188_v12, %v4376_v26  ;;  %6045 = vst [vmem:[#allocation58_spill] sm:$0xff] %v4404_v10 }
 0x13e   : > { %6041 = vst [vmem:[#allocation54_spill] sm:$0xff] %v4394_v62  ;;  %v4397_v9 = vpop.f32.mrf.mxu1  ;;  %v1309_v49 = vadd.f32 %v1308_v8, %v4379_v52 }
 0x13f   : > { %6042 = vst [vmem:[#allocation55_spill] sm:$0xff] %v4397_v9  ;;  %1190 = vadd.xlane.f32.xlu0 %v1189_v11  ;;  %v4399_v19 = vpop.f32.mrf.mxu0  ;;  %v4415_v11 = vpop.permute.xlu0 %2796 }
 0x140   : > { %1306 = vadd.xlane.f32.xlu1 %v1305_v44  ;;  %6043 = vst [vmem:[#allocation56_spill] sm:$0xff] %v4399_v19  ;;  %v4401_v54 = vpop.f32.mrf.mxu1  ;;  %v1192_v14 = vsel %vm1123_vm1, %v4399_v19, 0.0  ;;  %6048 = vst [vmem:[#allocation61_spill] sm:$0xff] %v4415_v11 }
 0x141   : > { %6044 = vst [vmem:[#allocation57_spill] sm:$0xff] %v4401_v54  ;;  %v1312_v46 = vsel %vm1123_vm1, %v4401_v54, 0.0  ;;  %v4410_v6 = vpop.f32.mrf.mxu0  ;;  %v1193_v12 = vadd.f32 %v1192_v14, %v4394_v62 }
 0x142   : > { %6046 = vst [vmem:[#allocation59_spill] sm:$0xff] %v4410_v6  ;;  %v4413_v44 = vpop.f32.mrf.mxu1  ;;  %v1313_v10 = vadd.f32 %v1312_v46, %v4397_v9 }
 0x143   : > { %6047 = vst [vmem:[#allocation60_spill] sm:$0xff] %v4413_v44  ;;  %1310 = vadd.xlane.f32.xlu0 %v1309_v49  ;;  %v4417_v26 = vpop.f32.mrf.mxu0  ;;  %v4431_v49 = vpop.permute.xlu1 %2801 }
 0x144   : > { %1194 = vadd.xlane.f32.xlu1 %v1193_v12  ;;  %6049 = vst [vmem:[#allocation62_spill] sm:$0xff] %v4417_v26  ;;  %v4419_v8 = vpop.f32.mrf.mxu1  ;;  %v1196_v19 = vsel %vm1123_vm1, %v4417_v26, 0.0  ;;  %6053 = vst [vmem:[#allocation66_spill] sm:$0xff] %v4431_v49  ;;  %v4438_v9 = vpop.permute.xlu0 %2806 }
 0x145   : > { %6050 = vst [vmem:[#allocation63_spill] sm:$0xff] %v4419_v8  ;;  %v1316_v54 = vsel %vm1123_vm1, %v4419_v8, 0.0  ;;  %v4426_v52 = vpop.f32.mrf.mxu0  ;;  %v1197_v14 = vadd.f32 %v1196_v19, %v4410_v6  ;;  %6056 = vst [vmem:[#allocation69_spill] sm:$0xff] %v4438_v9 }
 0x146   : > { %6051 = vst [vmem:[#allocation64_spill] sm:$0xff] %v4426_v52  ;;  %v4429_v62 = vpop.f32.mrf.mxu1  ;;  %v1317_v46 = vadd.f32 %v1316_v54, %v4413_v44 }
 0x147   : > { %6052 = vst [vmem:[#allocation65_spill] sm:$0xff] %v4429_v62  ;;  %1198 = vadd.xlane.f32.xlu0 %v1197_v14  ;;  %v4433_v12 = vpop.f32.mrf.mxu0  ;;  %v4454_v9 = vpop.permute.xlu1 %2811 }
 0x148   : > { %1314 = vadd.xlane.f32.xlu1 %v1313_v10  ;;  %6054 = vst [vmem:[#allocation67_spill] sm:$0xff] %v4433_v12  ;;  %v4435_v11 = vpop.f32.mrf.mxu1  ;;  %v1200_v8 = vsel %vm1123_vm1, %v4433_v12, 0.0  ;;  %6061 = vst [vmem:[#allocation74_spill] sm:$0xff] %v4454_v9 }
 0x149   : > { %6055 = vst [vmem:[#allocation68_spill] sm:$0xff] %v4435_v11  ;;  %v1320_v19 = vsel %vm1123_vm1, %v4435_v11, 0.0  ;;  %v4444_v26 = vpop.f32.mrf.mxu0  ;;  %v1201_v49 = vadd.f32 %v1200_v8, %v4426_v52 }
 0x14a   : > { %6057 = vst [vmem:[#allocation70_spill] sm:$0xff] %v4444_v26  ;;  %v4447_v10 = vpop.f32.mrf.mxu1  ;;  %v1321_v14 = vadd.f32 %v1320_v19, %v4429_v62 }
 0x14b   : > { %6058 = vst [vmem:[#allocation71_spill] sm:$0xff] %v4447_v10  ;;  %1318 = vadd.xlane.f32.xlu0 %v1317_v46  ;;  %v4450_v6 = vpop.f32.mrf.mxu0  ;;  %v4465_v46 = vpop.permute.xlu0 %2816 }
 0x14c   : > { %1202 = vadd.xlane.f32.xlu1 %v1201_v49  ;;  %6059 = vst [vmem:[#allocation72_spill] sm:$0xff] %v4450_v6  ;;  %v4452_v54 = vpop.f32.mrf.mxu1  ;;  %v1204_v12 = vsel %vm1123_vm1, %v4450_v6, 0.0  ;;  %6064 = vst [vmem:[#allocation77_spill] sm:$0xff] %v4465_v46  ;;  %v4481_v46 = vpop.permute.xlu1 %2821 }
 0x14d   : > { %6060 = vst [vmem:[#allocation73_spill] sm:$0xff] %v4452_v54  ;;  %v1324_v11 = vsel %vm1123_vm1, %v4452_v54, 0.0  ;;  %v4460_v44 = vpop.f32.mrf.mxu0  ;;  %v1205_v8 = vadd.f32 %v1204_v12, %v4444_v26  ;;  %6069 = vst [vmem:[#allocation82_spill] sm:$0xff] %v4481_v46 }
 0x14e   : > { %6062 = vst [vmem:[#allocation75_spill] sm:$0xff] %v4460_v44  ;;  %v4463_v52 = vpop.f32.mrf.mxu1  ;;  %v1325_v49 = vadd.f32 %v1324_v11, %v4447_v10 }
 0x14f   : > { %6063 = vst [vmem:[#allocation76_spill] sm:$0xff] %v4463_v52  ;;  %1206 = vadd.xlane.f32.xlu0 %v1205_v8  ;;  %v4468_v19 = vpop.f32.mrf.mxu0 }
 0x150   : > { %1322 = vadd.xlane.f32.xlu1 %v1321_v14  ;;  %6065 = vst [vmem:[#allocation78_spill] sm:$0xff] %v4468_v19  ;;  %v4470_v9 = vpop.f32.mrf.mxu1  ;;  %v1208_v62 = vsel %vm1123_vm1, %v4468_v19, 0.0  ;;  %v4488_v19 = vpop.permute.xlu0 %2826 }
 0x151   : > { %6066 = vst [vmem:[#allocation79_spill] sm:$0xff] %v4470_v9  ;;  %v1328_v54 = vsel %vm1123_vm1, %v4470_v9, 0.0  ;;  %v1209_v12 = vadd.f32 %v1208_v62, %v4460_v44  ;;  %v4477_v6 = vpop.f32.mrf.mxu0  ;;  %6072 = vst [vmem:[#allocation85_spill] sm:$0xff] %v4488_v19  ;;  %v4504_v19 = vpop.permute.xlu1 %2831 }
 0x152   : > { %6067 = vst [vmem:[#allocation80_spill] sm:$0xff] %v4477_v6  ;;  %v4479_v26 = vpop.f32.mrf.mxu1  ;;  %v1329_v11 = vadd.f32 %v1328_v54, %v4463_v52  ;;  %6077 = vst [vmem:[#allocation90_spill] sm:$0xff] %v4504_v19 }
 0x153   : > { %6068 = vst [vmem:[#allocation81_spill] sm:$0xff] %v4479_v26  ;;  %1326 = vadd.xlane.f32.xlu0 %v1325_v49  ;;  %v4484_v14 = vpop.f32.mrf.mxu0 }
 0x154   : > { %1210 = vadd.xlane.f32.xlu1 %v1209_v12  ;;  %6070 = vst [vmem:[#allocation83_spill] sm:$0xff] %v4484_v14  ;;  %v4486_v8 = vpop.f32.mrf.mxu1  ;;  %v1212_v9 = vsel %vm1123_vm1, %v4484_v14, 0.0 }
 0x155   : > { %6071 = vst [vmem:[#allocation84_spill] sm:$0xff] %v4486_v8  ;;  %v1332_v62 = vsel %vm1123_vm1, %v4486_v8, 0.0  ;;  %v1213_v44 = vadd.f32 %v1212_v9, %v4477_v6  ;;  %v4495_v10 = vpop.f32.mrf.mxu0 }
 0x156   : > { %6073 = vst [vmem:[#allocation86_spill] sm:$0xff] %v4495_v10  ;;  %v4497_v46 = vpop.f32.mrf.mxu1  ;;  %v1333_v54 = vadd.f32 %v1332_v62, %v4479_v26 }
 0x157   : > { %6074 = vst [vmem:[#allocation87_spill] sm:$0xff] %v4497_v46  ;;  %1214 = vadd.xlane.f32.xlu0 %v1213_v44  ;;  %v4500_v49 = vpop.f32.mrf.mxu0 }
 0x158   : > { %1330 = vadd.xlane.f32.xlu1 %v1329_v11  ;;  %6075 = vst [vmem:[#allocation88_spill] sm:$0xff] %v4500_v49  ;;  %v4502_v12 = vpop.f32.mrf.mxu1  ;;  %v1216_v52 = vsel %vm1123_vm1, %v4500_v49, 0.0  ;;  %v4515_v11 = vpop.permute.xlu0 %2836 }
 0x159   : > { %6076 = vst [vmem:[#allocation89_spill] sm:$0xff] %v4502_v12  ;;  %v1336_v9 = vsel %vm1123_vm1, %v4502_v12, 0.0  ;;  %v1217_v8 = vadd.f32 %v1216_v52, %v4495_v10  ;;  %v4511_v14 = vpop.f32.mrf.mxu0  ;;  %6080 = vst [vmem:[#allocation93_spill] sm:$0xff] %v4515_v11  ;;  %v4531_v11 = vpop.permute.xlu1 %2841 }
 0x15a   : > { %6078 = vst [vmem:[#allocation91_spill] sm:$0xff] %v4511_v14  ;;  %v4513_v6 = vpop.f32.mrf.mxu1  ;;  %v1337_v44 = vadd.f32 %v1336_v9, %v4497_v46  ;;  %6085 = vst [vmem:[#allocation98_spill] sm:$0xff] %v4531_v11 }
 0x15b   : > { %6079 = vst [vmem:[#allocation92_spill] sm:$0xff] %v4513_v6  ;;  %1334 = vadd.xlane.f32.xlu0 %v1333_v54  ;;  %v4518_v62 = vpop.f32.mrf.mxu0 }
 0x15c   : > { %1218 = vadd.xlane.f32.xlu1 %v1217_v8  ;;  %6081 = vst [vmem:[#allocation94_spill] sm:$0xff] %v4518_v62  ;;  %v4520_v19 = vpop.f32.mrf.mxu1  ;;  %v1220_v49 = vsel %vm1123_vm1, %v4518_v62, 0.0  ;;  %v4538_v46 = vpop.permute.xlu0 %2846 }
 0x15d   : > { %6082 = vst [vmem:[#allocation95_spill] sm:$0xff] %v4520_v19  ;;  %v1340_v52 = vsel %vm1123_vm1, %v4520_v19, 0.0  ;;  %v1221_v12 = vadd.f32 %v1220_v49, %v4511_v14  ;;  %v4527_v10 = vpop.f32.mrf.mxu0  ;;  %6088 = vst [vmem:[#allocation101_spill] sm:$0xff] %v4538_v46  ;;  %v4554_v46 = vpop.permute.xlu1 %2851 }
 0x15e   : > { %6083 = vst [vmem:[#allocation96_spill] sm:$0xff] %v4527_v10  ;;  %v4529_v26 = vpop.f32.mrf.mxu1  ;;  %v1341_v8 = vadd.f32 %v1340_v52, %v4513_v6  ;;  %6093 = vst [vmem:[#allocation106_spill] sm:$0xff] %v4554_v46 }
 0x15f   : > { %6084 = vst [vmem:[#allocation97_spill] sm:$0xff] %v4529_v26  ;;  %1222 = vadd.xlane.f32.xlu0 %v1221_v12  ;;  %v4534_v54 = vpop.f32.mrf.mxu0 }
 0x160   : > { %1338 = vadd.xlane.f32.xlu1 %v1337_v44  ;;  %6086 = vst [vmem:[#allocation99_spill] sm:$0xff] %v4534_v54  ;;  %v4536_v9 = vpop.f32.mrf.mxu1  ;;  %v1224_v19 = vsel %vm1123_vm1, %v4534_v54, 0.0 }
 0x161   : > { %6087 = vst [vmem:[#allocation100_spill] sm:$0xff] %v4536_v9  ;;  %v1344_v49 = vsel %vm1123_vm1, %v4536_v9, 0.0  ;;  %v1225_v62 = vadd.f32 %v1224_v19, %v4527_v10  ;;  %v4545_v14 = vpop.f32.mrf.mxu0 }
 0x162   : > { %6089 = vst [vmem:[#allocation102_spill] sm:$0xff] %v4545_v14  ;;  %v4547_v11 = vpop.f32.mrf.mxu1  ;;  %v1345_v12 = vadd.f32 %v1344_v49, %v4529_v26 }
 0x163   : > { %6090 = vst [vmem:[#allocation103_spill] sm:$0xff] %v4547_v11  ;;  %1342 = vadd.xlane.f32.xlu0 %v1341_v8  ;;  %v4550_v44 = vpop.f32.mrf.mxu0  ;;  %v4565_v8 = vpop.permute.xlu0 %2856 }
 0x164   : > { %1226 = vadd.xlane.f32.xlu1 %v1225_v62  ;;  %6091 = vst [vmem:[#allocation104_spill] sm:$0xff] %v4550_v44  ;;  %v4552_v52 = vpop.f32.mrf.mxu1  ;;  %v1228_v54 = vsel %vm1123_vm1, %v4550_v44, 0.0  ;;  %6096 = vst [vmem:[#allocation109_spill] sm:$0xff] %v4565_v8  ;;  %v4581_v8 = vpop.permute.xlu1 %2861 }
 0x165   : > { %6092 = vst [vmem:[#allocation105_spill] sm:$0xff] %v4552_v52  ;;  %v1348_v19 = vsel %vm1123_vm1, %v4552_v52, 0.0  ;;  %v1229_v9 = vadd.f32 %v1228_v54, %v4545_v14  ;;  %v4561_v10 = vpop.f32.mrf.mxu0  ;;  %6100 = vst [vmem:[#allocation113_spill] sm:$0xff] %v4581_v8 }
 0x166   : > { %6094 = vst [vmem:[#allocation107_spill] sm:$0xff] %v4561_v10  ;;  %v4563_v6 = vpop.f32.mrf.mxu1  ;;  %v1349_v62 = vadd.f32 %v1348_v19, %v4547_v11 }
 0x167   : > { %6095 = vst [vmem:[#allocation108_spill] sm:$0xff] %v4563_v6  ;;  %1230 = vadd.xlane.f32.xlu0 %v1229_v9  ;;  %v4568_v49 = vpop.f32.mrf.mxu0 }
 0x168   : > { %1346 = vadd.xlane.f32.xlu1 %v1345_v12  ;;  %6097 = vst [vmem:[#allocation110_spill] sm:$0xff] %v4568_v49  ;;  %v4570_v46 = vpop.f32.mrf.mxu1  ;;  %v1232_v26 = vsel %vm1123_vm1, %v4568_v49, 0.0  ;;  %v4588_v49 = vpop.permute.xlu0 %2866 }
 0x169   : > { %6098 = vst [vmem:[#allocation111_spill] sm:$0xff] %v4570_v46  ;;  %v1352_v54 = vsel %vm1123_vm1, %v4570_v46, 0.0  ;;  %v1233_v52 = vadd.f32 %v1232_v26, %v4561_v10  ;;  %v4577_v44 = vpop.f32.mrf.mxu0  ;;  %6103 = vst [vmem:[#allocation116_spill] sm:$0xff] %v4588_v49  ;;  %v4604_v49 = vpop.permute.xlu1 %2871 }
 0x16a   : > { %v4579_v14 = vpop.f32.mrf.mxu1  ;;  %v1353_v9 = vadd.f32 %v1352_v54, %v4563_v6  ;;  %6107 = vst [vmem:[#allocation120_spill] sm:$0xff] %v4604_v49 }
 0x16b   : > { %6099 = vst [vmem:[#allocation112_spill] sm:$0xff] %v4579_v14  ;;  %1350 = vadd.xlane.f32.xlu0 %v1349_v62  ;;  %v4584_v12 = vpop.f32.mrf.mxu0 }
 0x16c   : > { %1234 = vadd.xlane.f32.xlu1 %v1233_v52  ;;  %6101 = vst [vmem:[#allocation114_spill] sm:$0xff] %v4584_v12  ;;  %v4586_v19 = vpop.f32.mrf.mxu1  ;;  %v1236_v46 = vsel %vm1123_vm1, %v4584_v12, 0.0  ;;  %v4611_v12 = vpop.permute.xlu0 %2876 }
 0x16d   : > { %6102 = vst [vmem:[#allocation115_spill] sm:$0xff] %v4586_v19  ;;  %v1356_v26 = vsel %vm1123_vm1, %v4586_v19, 0.0  ;;  %v1237_v10 = vadd.f32 %v1236_v46, %v4577_v44  ;;  %v4595_v11 = vpop.f32.mrf.mxu0  ;;  %6108 = vst [vmem:[#allocation121_spill] sm:$0xff] %v4611_v12 }
 0x16e   : > { %6104 = vst [vmem:[#allocation117_spill] sm:$0xff] %v4595_v11  ;;  %v4597_v8 = vpop.f32.mrf.mxu1  ;;  %v1357_v52 = vadd.f32 %v1356_v26, %v4579_v14 }
 0x16f   : > { %1238 = vadd.xlane.f32.xlu0 %v1237_v10  ;;  %v4600_v62 = vpop.f32.mrf.mxu0  ;;  %v4614_v10 = vpop.permute.xlu1 %2881 }
 0x170   : > { %1354 = vadd.xlane.f32.xlu1 %v1353_v9  ;;  %6105 = vst [vmem:[#allocation118_spill] sm:$0xff] %v4600_v62  ;;  %v4602_v54 = vpop.f32.mrf.mxu1  ;;  %v1240_v6 = vsel %vm1123_vm1, %v4600_v62, 0.0  ;;  %6109 = vst [vmem:[#allocation122_spill] sm:$0xff] %v4614_v10  ;;  %v4616_v9 = vpop.permute.xlu0 %2886 }
 0x171   : > { %6106 = vst [vmem:[#allocation119_spill] sm:$0xff] %v4602_v54  ;;  %v1360_v46 = vsel %vm1123_vm1, %v4602_v54, 0.0  ;;  %v1241_v19 = vadd.f32 %v1240_v6, %v4595_v11  ;;  %6110 = vst [vmem:[#allocation123_spill] sm:$0xff] %v4616_v9 }
 0x172   : > { %v1361_v26 = vadd.f32 %v1360_v46, %v4597_v8 }
 0x173   : > { %1358 = vadd.xlane.f32.xlu0 %v1357_v52  ;;  %v4618_v49 = vpop.permute.xlu1 %2891 }
 0x174   : > { %1242 = vadd.xlane.f32.xlu1 %v1241_v19  ;;  %6111 = vst [vmem:[#allocation124_spill] sm:$0xff] %v4618_v49  ;;  %v4620_v14 = vpop.permute.xlu0 %2896 }
 0x175   : > { %6112 = vst [vmem:[#allocation125_spill] sm:$0xff] %v4620_v14 }
 0x177   : > { %v4622_v62 = vpop.permute.xlu1 %2901 }
 0x178   : > { %1362 = vadd.xlane.f32.xlu1 %v1361_v26  ;;  %6113 = vst [vmem:[#allocation126_spill] sm:$0xff] %v4622_v62  ;;  %v4624_v54 = vpop.permute.xlu0 %2906 }
 0x179   : > { %6114 = vst [vmem:[#allocation127_spill] sm:$0xff] %v4624_v54 }
 0x17b   : > { %v4626_v6 = vpop.permute.xlu1 %2911 }
 0x17c   : > { %6115 = vst [vmem:[#allocation128_spill] sm:$0xff] %v4626_v6 }
 0x188   : > { %v1127_v12 = vpop.xlane.xlu0 %1126 }
 0x189   : > { %v1364_v11 = vmul.f32 0.0051020407, %v1127_v12 }
 0x18b   : > { %v4629_v52 = vsub.f32 %v4112_v17, %v1364_v11  ;;  %v4632_v19 = vsub.f32 %v4118_v20, %v1364_v11 }
 0x18c   : > { %v1247_v26 = vpop.xlane.xlu0 %1246 }
 0x18d   : > { %6116 = vst [vmem:[#allocation129_spill] sm:$0xff] %v4629_v52  ;;  %6117 = vst [vmem:[#allocation130_spill] sm:$0xff] %v4632_v19  ;;  %v1251_v46 = vpop.xlane.xlu1 %1250  ;;  %v1545_v9 = vmul.f32 %v4632_v19, %v4632_v19  ;;  %v1394_v14 = vmul.f32 0.0051020407, %v1247_v26  ;;  %v1544_v62 = vmul.f32 %v4629_v52, %v4629_v52 }
 0x18e   : > { %v1395_v54 = vmul.f32 0.0051020407, %v1251_v46 }
 0x18f   : > { %v4639_v6 = vsub.f32 %v4114_v18, %v1394_v14  ;;  %v4642_v12 = vsub.f32 %v4120_v21, %v1394_v14  ;;  %v1664_v20 = vsel %vm1123_vm1, %v1545_v9, 0.0 }
 0x190   : > { %v1131_v17 = vpop.xlane.xlu0 %1130  ;;  %v1665_v52 = vadd.f32 %v1664_v20, %v1544_v62  ;;  %v4650_v46 = vsub.f32 %v4133_v28, %v1395_v54  ;;  %v4666_v28 = vsub.f32 %v4126_v24, %v1395_v54 }
 0x191   : > { %6118 = vst [vmem:[#allocation131_spill] sm:$0xff] %v4639_v6  ;;  %v1135_v49 = vpop.xlane.xlu1 %1134  ;;  %v1604_v11 = vmul.f32 %v4639_v6, %v4639_v6  ;;  %v1605_v26 = vmul.f32 %v4642_v12, %v4642_v12  ;;  %v1365_v10 = vmul.f32 0.0051020407, %v1131_v17 }
 0x192   : > { %v1366_v19 = vmul.f32 0.0051020407, %v1135_v49  ;;  %6119 = vst [vmem:[#allocation132_spill] sm:$0xff] %v4650_v46  ;;  %1666 = vadd.xlane.f32.xlu0 %v1665_v52  ;;  %6122 = vst [vmem:[#allocation135_spill] sm:$0xff] %v4666_v28 }
 0x193   : > { %v1784_v18 = vsel %vm1123_vm1, %v1605_v26, 0.0  ;;  %v4654_v21 = vsub.f32 %v4124_v23, %v1365_v10  ;;  %v4657_v14 = vsub.f32 %v4135_v29, %v1365_v10  ;;  %v1607_v10 = vmul.f32 %v4650_v46, %v4650_v46 }
 0x194   : > { %v4660_v9 = vsub.f32 %v4141_v32, %v1366_v19  ;;  %v4663_v6 = vsub.f32 %v4149_v37, %v1366_v19  ;;  %v1255_v49 = vpop.xlane.xlu0 %1254  ;;  %v1785_v26 = vadd.f32 %v1784_v18, %v1604_v11 }
 0x195   : > { %v1139_v62 = vpop.xlane.xlu1 %1138  ;;  %v1396_v17 = vmul.f32 0.0051020407, %v1255_v49  ;;  %v1546_v23 = vmul.f32 %v4654_v21, %v4654_v21  ;;  %v1547_v29 = vmul.f32 %v4657_v14, %v4657_v14 }
 0x196   : > { %6120 = vst [vmem:[#allocation133_spill] sm:$0xff] %v4660_v9  ;;  %6121 = vst [vmem:[#allocation134_spill] sm:$0xff] %v4663_v6  ;;  %v1367_v20 = vmul.f32 0.0051020407, %v1139_v62  ;;  %v1548_v32 = vmul.f32 %v4660_v9, %v4660_v9  ;;  %v1549_v37 = vmul.f32 %v4663_v6, %v4663_v6  ;;  %1786 = vadd.xlane.f32.xlu0 %v1785_v26 }
 0x197   : > { %v4679_v24 = vsub.f32 %v4143_v33, %v1396_v17  ;;  %v4682_v54 = vsub.f32 %v4151_v38, %v1396_v17  ;;  %v1668_v49 = vsel %vm1123_vm1, %v1547_v29, 0.0  ;;  %v1606_v62 = vmul.f32 %v4666_v28, %v4666_v28 }
 0x198   : > { %v4685_v52 = vsub.f32 %v4167_v47, %v1367_v20  ;;  %v1143_v11 = vpop.xlane.xlu0 %1142  ;;  %v1672_v18 = vsel %vm1123_vm1, %v1549_v37, 0.0  ;;  %v1669_v9 = vadd.f32 %v1668_v49, %v1546_v23  ;;  %v4696_v26 = vsub.f32 %v4159_v42, %v1367_v20 }
 0x199   : > { %6123 = vst [vmem:[#allocation136_spill] sm:$0xff] %v4679_v24  ;;  %v1259_v19 = vpop.xlane.xlu1 %1258  ;;  %v1608_v33 = vmul.f32 %v4679_v24, %v4679_v24  ;;  %v1609_v38 = vmul.f32 %v4682_v54, %v4682_v54  ;;  %v1368_v6 = vmul.f32 0.0051020407, %v1143_v11  ;;  %v1673_v47 = vadd.f32 %v1672_v18, %v1548_v32 }
 0x19a   : > { %v1397_v17 = vmul.f32 0.0051020407, %v1259_v19  ;;  %v1788_v29 = vsel %vm1123_vm1, %v1607_v10, 0.0  ;;  %v1551_v46 = vmul.f32 %v4685_v52, %v4685_v52  ;;  %1670 = vadd.xlane.f32.xlu1 %v1669_v9 }
 0x19b   : > { %v1792_v37 = vsel %vm1123_vm1, %v1609_v38, 0.0  ;;  %v4706_v24 = vsub.f32 %v4174_v51, %v1368_v6  ;;  %v4709_v19 = vsub.f32 %v4183_v56, %v1368_v6  ;;  %1674 = vadd.xlane.f32.xlu0 %v1673_v47  ;;  %v1789_v18 = vadd.f32 %v1788_v29, %v1606_v62 }
 0x19c   : > { %v4703_v28 = vsub.f32 %v4169_v48, %v1397_v17  ;;  %v1263_v23 = vpop.xlane.xlu0 %1262  ;;  %v4712_v20 = vsub.f32 %v4161_v43, %v1397_v17  ;;  %v1793_v11 = vadd.f32 %v1792_v37, %v1608_v33  ;;  %v1550_v56 = vmul.f32 %v4696_v26, %v4696_v26 }
 0x19d   : > { %v1147_v42 = vpop.xlane.xlu1 %1146  ;;  %v1398_v32 = vmul.f32 0.0051020407, %v1263_v23  ;;  %v1552_v48 = vmul.f32 %v4706_v24, %v4706_v24  ;;  %v1553_v51 = vmul.f32 %v4709_v19, %v4709_v19  ;;  %v1676_v17 = vsel %vm1123_vm1, %v1551_v46, 0.0 }
 0x19e   : > { %v1369_v10 = vmul.f32 0.0051020407, %v1147_v42  ;;  %v1611_v6 = vmul.f32 %v4703_v28, %v4703_v28  ;;  %v1610_v47 = vmul.f32 %v4712_v20, %v4712_v20  ;;  %1790 = vadd.xlane.f32.xlu1 %v1789_v18  ;;  %v1677_v42 = vadd.f32 %v1676_v17, %v1550_v56 }
 0x19f   : > { %v4723_v43 = vsub.f32 %v4177_v53, %v1398_v32  ;;  %v4726_v9 = vsub.f32 %v4185_v57, %v1398_v32  ;;  %1794 = vadd.xlane.f32.xlu0 %v1793_v11  ;;  %v1680_v62 = vsel %vm1123_vm1, %v1553_v51, 0.0 }
 0x1a0   : > { %v4729_v49 = vsub.f32 %v4199_v1, %v1369_v10  ;;  %v1151_v38 = vpop.xlane.xlu0 %1150  ;;  %v4740_v1 = vsub.f32 %v4193_v61, %v1369_v10  ;;  %v1681_v23 = vadd.f32 %v1680_v62, %v1552_v48  ;;  %v1796_v46 = vsel %vm1123_vm1, %v1611_v6, 0.0 }
 0x1a1   : > { %6124 = vst [vmem:[#allocation137_spill] sm:$0xff] %v4726_v9  ;;  %v1267_v33 = vpop.xlane.xlu1 %1266  ;;  %v1612_v53 = vmul.f32 %v4723_v43, %v4723_v43  ;;  %v1613_v57 = vmul.f32 %v4726_v9, %v4726_v9  ;;  %v1370_v29 = vmul.f32 0.0051020407, %v1151_v38  ;;  %v1797_v38 = vadd.f32 %v1796_v46, %v1610_v47 }
 0x1a2   : > { %v1399_v37 = vmul.f32 0.0051020407, %v1267_v33  ;;  %v1555_v11 = vmul.f32 %v4729_v49, %v4729_v49  ;;  %1678 = vadd.xlane.f32.xlu1 %v1677_v42  ;;  %v1554_v6 = vmul.f32 %v4740_v1, %v4740_v1 }
 0x1a3   : > { %v1800_v32 = vsel %vm1123_vm1, %v1613_v57, 0.0  ;;  %v4750_v9 = vsub.f32 %v4210_v25, %v1370_v29  ;;  %v4753_v61 = vsub.f32 %v4217_v35, %v1370_v29  ;;  %1682 = vadd.xlane.f32.xlu0 %v1681_v23 }
 0x1a4   : > { %v4747_v51 = vsub.f32 %v4201_v2, %v1399_v37  ;;  %v1271_v10 = vpop.xlane.xlu0 %1270  ;;  %v1801_v33 = vadd.f32 %v1800_v32, %v1612_v53  ;;  %v4762_v35 = vsub.f32 %v4197_v0, %v1399_v37  ;;  %v1684_v0 = vsel %vm1123_vm1, %v1555_v11, 0.0 }
 0x1a5   : > { %v1155_v48 = vpop.xlane.xlu1 %1154  ;;  %v1400_v18 = vmul.f32 0.0051020407, %v1271_v10  ;;  %v1556_v2 = vmul.f32 %v4750_v9, %v4750_v9  ;;  %v1557_v25 = vmul.f32 %v4753_v61, %v4753_v61  ;;  %v1685_v10 = vadd.f32 %v1684_v0, %v1554_v6 }
 0x1a6   : > { %v1371_v56 = vmul.f32 0.0051020407, %v1155_v48  ;;  %v1615_v62 = vmul.f32 %v4747_v51, %v4747_v51  ;;  %1798 = vadd.xlane.f32.xlu1 %v1797_v38  ;;  %v1614_v46 = vmul.f32 %v4762_v35, %v4762_v35 }
 0x1a7   : > { %v4767_v17 = vsub.f32 %v4213_v31, %v1400_v18  ;;  %v4770_v53 = vsub.f32 %v4219_v36, %v1400_v18  ;;  %1802 = vadd.xlane.f32.xlu0 %v1801_v33  ;;  %v1688_v47 = vsel %vm1123_vm1, %v1557_v25, 0.0 }
 0x1a8   : > { %v4773_v57 = vsub.f32 %v4233_v55, %v1371_v56  ;;  %v1159_v23 = vpop.xlane.xlu0 %1158  ;;  %v4782_v36 = vsub.f32 %v4226_v45, %v1371_v56  ;;  %v1689_v32 = vadd.f32 %v1688_v47, %v1556_v2  ;;  %v1804_v11 = vsel %vm1123_vm1, %v1615_v62, 0.0 }
 0x1a9   : > { %v1275_v29 = vpop.xlane.xlu1 %1274  ;;  %v1616_v37 = vmul.f32 %v4767_v17, %v4767_v17  ;;  %v1617_v31 = vmul.f32 %v4770_v53, %v4770_v53  ;;  %v1372_v55 = vmul.f32 0.0051020407, %v1159_v23  ;;  %v1805_v0 = vadd.f32 %v1804_v11, %v1614_v46 }
 0x1aa   : > { %v1401_v42 = vmul.f32 0.0051020407, %v1275_v29  ;;  %v1559_v18 = vmul.f32 %v4773_v57, %v4773_v57  ;;  %1686 = vadd.xlane.f32.xlu1 %v1685_v10 }
 0x1ab   : > { %v1808_v48 = vsel %vm1123_vm1, %v1617_v31, 0.0  ;;  %v4794_v45 = vsub.f32 %v4244_v5, %v1372_v55  ;;  %v4797_v56 = vsub.f32 %v4249_v40, %v1372_v55  ;;  %1690 = vadd.xlane.f32.xlu0 %v1689_v32 }
 0x1ac   : > { %v4791_v33 = vsub.f32 %v4235_v59, %v1401_v42  ;;  %v1279_v2 = vpop.xlane.xlu0 %1278  ;;  %v4800_v6 = vsub.f32 %v4229_v50, %v1401_v42  ;;  %v1809_v29 = vadd.f32 %v1808_v48, %v1616_v37  ;;  %v1558_v59 = vmul.f32 %v4782_v36, %v4782_v36 }
 0x1ad   : > { %v1163_v25 = vpop.xlane.xlu1 %1162  ;;  %v1402_v38 = vmul.f32 0.0051020407, %v1279_v2  ;;  %v1560_v5 = vmul.f32 %v4794_v45, %v4794_v45  ;;  %v1561_v40 = vmul.f32 %v4797_v56, %v4797_v56  ;;  %v1692_v32 = vsel %vm1123_vm1, %v1559_v18, 0.0 }
 0x1ae   : > { %v1373_v62 = vmul.f32 0.0051020407, %v1163_v25  ;;  %v1619_v23 = vmul.f32 %v4791_v33, %v4791_v33  ;;  %v1618_v10 = vmul.f32 %v4800_v6, %v4800_v6  ;;  %1806 = vadd.xlane.f32.xlu1 %v1805_v0  ;;  %v1693_v2 = vadd.f32 %v1692_v32, %v1558_v59 }
 0x1af   : > { %v4811_v47 = vsub.f32 %v4247_v27, %v1402_v38  ;;  %v4814_v50 = vsub.f32 %v4251_v41, %v1402_v38  ;;  %1810 = vadd.xlane.f32.xlu0 %v1809_v29  ;;  %v1696_v55 = vsel %vm1123_vm1, %v1561_v40, 0.0 }
 0x1b0   : > { %v4817_v37 = vsub.f32 %v4267_v58, %v1373_v62  ;;  %v1167_v42 = vpop.xlane.xlu0 %1166  ;;  %v4828_v58 = vsub.f32 %v4260_v34, %v1373_v62  ;;  %v1697_v11 = vadd.f32 %v1696_v55, %v1560_v5  ;;  %v1812_v18 = vsel %vm1123_vm1, %v1619_v23, 0.0 }
 0x1b1   : > { %v1283_v31 = vpop.xlane.xlu1 %1282  ;;  %v1620_v27 = vmul.f32 %v4811_v47, %v4811_v47  ;;  %v1621_v41 = vmul.f32 %v4814_v50, %v4814_v50  ;;  %v1374_v48 = vmul.f32 0.0051020407, %v1167_v42  ;;  %v3651_v23 = vmov 0  }
 0x1b2   : > { %v1403_v46 = vmul.f32 0.0051020407, %v1283_v31  ;;  %v1563_v38 = vmul.f32 %v4817_v37, %v4817_v37  ;;  %1694 = vadd.xlane.f32.xlu1 %v1693_v2  ;;  %3370 = vset.pattern.permute.xlu0 %v3651_v23  ;;  %v1562_v42 = vmul.f32 %v4828_v58, %v4828_v58 }
 0x1b3   : > { %v1816_v25 = vsel %vm1123_vm1, %v1621_v41, 0.0  ;;  %v4838_v40 = vsub.f32 %v4276_v4, %v1374_v48  ;;  %v4841_v34 = vsub.f32 %v4283_v63, %v1374_v48  ;;  %1698 = vadd.xlane.f32.xlu0 %v1697_v11  ;;  %v1813_v63 = vadd.f32 %v1812_v18, %v1618_v10  ;;  %3371 = vset.pattern.permute.xlu1 %v3651_v23 }
 0x1b4   : > { %v4835_v29 = vsub.f32 %v4269_v3, %v1403_v46  ;;  %v1287_v62 = vpop.xlane.xlu0 %1286  ;;  %v1817_v31 = vadd.f32 %v1816_v25, %v1620_v27  ;;  %v4850_v55 = vsub.f32 %v4263_v60, %v1403_v46  ;;  %v1700_v60 = vsel %vm1123_vm1, %v1563_v38, 0.0 }
 0x1b5   : > { %6125 = vst [vmem:[#allocation138_spill] sm:$0xff] %v4838_v40  ;;  %6126 = vst [vmem:[#allocation139_spill] sm:$0xff] %v4841_v34  ;;  %v1171_v5 = vpop.xlane.xlu1 %1170  ;;  %v1404_v59 = vmul.f32 0.0051020407, %v1287_v62  ;;  %v1564_v3 = vmul.f32 %v4838_v40, %v4838_v40  ;;  %v1565_v4 = vmul.f32 %v4841_v34, %v4841_v34  ;;  %v6141_v34 = vld [vmem:[#allocation38_spill] sm:$0xff]  ;;  %v6155_v40 = vld [vmem:[#allocation47_spill] sm:$0xff] }
 0x1b6   : > { %v1375_v0 = vmul.f32 0.0051020407, %v1171_v5  ;;  %v1623_v32 = vmul.f32 %v4835_v29, %v4835_v29  ;;  %1814 = vadd.xlane.f32.xlu1 %v1813_v63  ;;  %v1622_v62 = vmul.f32 %v4850_v55, %v4850_v55  ;;  %v1701_v5 = vadd.f32 %v1700_v60, %v1562_v42  ;;  %v6131_v42 = vld [vmem:[#allocation27_spill] sm:$0xff]  ;;  %v6132_v60 = vld [vmem:[#allocation29_spill] sm:$0xff] }
 0x1b7   : > { %v4855_v27 = vsub.f32 %v4279_v30, %v1404_v59  ;;  %v4858_v41 = vsub.f32 %v4285_v22, %v1404_v59  ;;  %1818 = vadd.xlane.f32.xlu0 %v1817_v31  ;;  %v1704_v10 = vsel %vm1123_vm1, %v1565_v4, 0.0 }
 0x1b8   : > { %v4861_v48 = vsub.f32 %v4299_v7, %v1375_v0  ;;  %v1175_v2 = vpop.xlane.xlu0 %1174  ;;  %v4870_v22 = vsub.f32 %v4294_v39, %v1375_v0  ;;  %v1705_v18 = vadd.f32 %v1704_v10, %v1564_v3  ;;  %v1820_v38 = vsel %vm1123_vm1, %v1623_v32, 0.0 }
 0x1b9   : > { %6127 = vst [vmem:[#allocation140_spill] sm:$0xff] %v4855_v27  ;;  %6128 = vst [vmem:[#allocation141_spill] sm:$0xff] %v4858_v41  ;;  %v1291_v11 = vpop.xlane.xlu1 %1290  ;;  %v1624_v46 = vmul.f32 %v4855_v27, %v4855_v27  ;;  %v1625_v30 = vmul.f32 %v4858_v41, %v4858_v41  ;;  %v1376_v7 = vmul.f32 0.0051020407, %v1175_v2  ;;  %v6139_v27 = vld [vmem:[#allocation36_spill] sm:$0xff] }
 0x1ba   : > { %v1405_v25 = vmul.f32 0.0051020407, %v1291_v11  ;;  %v1567_v31 = vmul.f32 %v4861_v48, %v4861_v48  ;;  %1702 = vadd.xlane.f32.xlu1 %v1701_v5 }
 0x1bb   : > { %v1824_v59 = vsel %vm1123_vm1, %v1625_v30, 0.0  ;;  %v4882_v39 = vsub.f32 %v4310_v16, %v1376_v7  ;;  %v4885_v0 = vsub.f32 %v4317_v13, %v1376_v7  ;;  %1706 = vadd.xlane.f32.xlu0 %v1705_v18  ;;  %v1821_v18 = vadd.f32 %v1820_v38, %v1622_v62  ;;  %v6138_v62 = vld [vmem:[#allocation32_spill] sm:$0xff] }
 0x1bc   : > { %v4879_v23 = vsub.f32 %v4301_v15, %v1405_v25  ;;  %v1295_v3 = vpop.xlane.xlu0 %1294  ;;  %v4888_v63 = vsub.f32 %v6131_v42, %v1405_v25  ;;  %v1825_v2 = vadd.f32 %v1824_v59, %v1624_v46  ;;  %v1566_v15 = vmul.f32 %v4870_v22, %v4870_v22  ;;  %v6134_v25 = vld [vmem:[#allocation31_spill] sm:$0xff] }
 0x1bd   : > { %6129 = vst [vmem:[#allocation142_spill] sm:$0xff] %v4882_v39  ;;  %6130 = vst [vmem:[#allocation143_spill] sm:$0xff] %v4885_v0  ;;  %v1179_v4 = vpop.xlane.xlu1 %1178  ;;  %v1406_v32 = vmul.f32 0.0051020407, %v1295_v3  ;;  %v1568_v16 = vmul.f32 %v4882_v39, %v4882_v39  ;;  %v1569_v13 = vmul.f32 %v4885_v0, %v4885_v0  ;;  %v6136_v46 = vld [vmem:[#allocation35_spill] sm:$0xff]  ;;  %v1708_v42 = vsel %vm1123_vm1, %v1567_v31, 0.0 }
 0x1be   : > { %v1377_v11 = vmul.f32 0.0051020407, %v1179_v4  ;;  %v1627_v10 = vmul.f32 %v4879_v23, %v4879_v23  ;;  %v1626_v0 = vmul.f32 %v4888_v63, %v4888_v63  ;;  %1822 = vadd.xlane.f32.xlu1 %v1821_v18  ;;  %v1709_v39 = vadd.f32 %v1708_v42, %v1566_v15  ;;  %v6143_v18 = vld [vmem:[#allocation40_spill] sm:$0xff] }
 0x1bf   : > { %v4899_v30 = vsub.f32 %v6132_v60, %v1406_v32  ;;  %v4902_v7 = vsub.f32 %v6134_v25, %v1406_v32  ;;  %1826 = vadd.xlane.f32.xlu0 %v1825_v2  ;;  %v1712_v4 = vsel %vm1123_vm1, %v1569_v13, 0.0 }
 0x1c0   : > { %v4905_v5 = vsub.f32 %v6136_v46, %v1377_v11  ;;  %v1183_v3 = vpop.xlane.xlu0 %1182  ;;  %v4916_v38 = vsub.f32 %v6138_v62, %v1377_v11  ;;  %v1713_v46 = vadd.f32 %v1712_v4, %v1568_v16  ;;  %v1828_v31 = vsel %vm1123_vm1, %v1627_v10, 0.0 }
 0x1c1   : > { %6133 = vst [vmem:[#allocation27_spill] sm:$0xff] %v4899_v30  ;;  %6135 = vst [vmem:[#allocation29_spill] sm:$0xff] %v4902_v7  ;;  %v1299_v59 = vpop.xlane.xlu1 %1298  ;;  %v1628_v60 = vmul.f32 %v4899_v30, %v4899_v30  ;;  %v1629_v32 = vmul.f32 %v4902_v7, %v4902_v7  ;;  %v1378_v25 = vmul.f32 0.0051020407, %v1183_v3  ;;  %v1829_v42 = vadd.f32 %v1828_v31, %v1626_v0 }
 0x1c2   : > { %6137 = vst [vmem:[#allocation31_spill] sm:$0xff] %v4905_v5  ;;  %v1407_v2 = vmul.f32 0.0051020407, %v1299_v59  ;;  %v1571_v41 = vmul.f32 %v4905_v5, %v4905_v5  ;;  %1710 = vadd.xlane.f32.xlu1 %v1709_v39  ;;  %v1570_v10 = vmul.f32 %v4916_v38, %v4916_v38  ;;  %v6147_v39 = vld [vmem:[#allocation39_spill] sm:$0xff] }
 0x1c3   : > { %v1832_v13 = vsel %vm1123_vm1, %v1629_v32, 0.0  ;;  %v4926_v7 = vsub.f32 %v6141_v34, %v1378_v25  ;;  %v4929_v11 = vsub.f32 %v6143_v18, %v1378_v25  ;;  %1714 = vadd.xlane.f32.xlu0 %v1713_v46  ;;  %v6145_v32 = vld [vmem:[#allocation33_spill] sm:$0xff]  ;;  %v6151_v18 = vld [vmem:[#allocation46_spill] sm:$0xff]  ;;  %v6173_v5 = vld [vmem:[#allocation59_spill] sm:$0xff] }
 0x1c4   : > { %v4923_v30 = vsub.f32 %v6139_v27, %v1407_v2  ;;  %v1303_v59 = vpop.xlane.xlu0 %1302  ;;  %v1833_v4 = vadd.f32 %v1832_v13, %v1628_v60  ;;  %v4938_v62 = vsub.f32 %v6145_v32, %v1407_v2  ;;  %v6149_v60 = vld [vmem:[#allocation41_spill] sm:$0xff]  ;;  %v1716_v2 = vsel %vm1123_vm1, %v1571_v41, 0.0 }
 0x1c5   : > { %6142 = vst [vmem:[#allocation32_spill] sm:$0xff] %v4926_v7  ;;  %6144 = vst [vmem:[#allocation36_spill] sm:$0xff] %v4929_v11  ;;  %v1187_v16 = vpop.xlane.xlu1 %1186  ;;  %v1408_v15 = vmul.f32 0.0051020407, %v1303_v59  ;;  %v1572_v27 = vmul.f32 %v4926_v7, %v4926_v7  ;;  %v1573_v34 = vmul.f32 %v4929_v11, %v4929_v11 }
 0x1c6   : > { %6140 = vst [vmem:[#allocation35_spill] sm:$0xff] %v4923_v30  ;;  %v1379_v3 = vmul.f32 0.0051020407, %v1187_v16  ;;  %6146 = vst [vmem:[#allocation38_spill] sm:$0xff] %v4938_v62  ;;  %v1631_v25 = vmul.f32 %v4923_v30, %v4923_v30  ;;  %1830 = vadd.xlane.f32.xlu1 %v1829_v42  ;;  %v1717_v30 = vadd.f32 %v1716_v2, %v1570_v10  ;;  %v6157_v42 = vld [vmem:[#allocation48_spill] sm:$0xff] }
 0x1c7   : > { %v4943_v46 = vsub.f32 %v6147_v39, %v1408_v15  ;;  %v4946_v13 = vsub.f32 %v6149_v60, %v1408_v15  ;;  %1834 = vadd.xlane.f32.xlu0 %v1833_v4  ;;  %v1720_v0 = vsel %vm1123_vm1, %v1573_v34, 0.0  ;;  %v6153_v39 = vld [vmem:[#allocation43_spill] sm:$0xff]  ;;  %v1630_v4 = vmul.f32 %v4938_v62, %v4938_v62  ;;  %v6161_v10 = vld [vmem:[#allocation44_spill] sm:$0xff]  ;;  %v6171_v62 = vld [vmem:[#allocation57_spill] sm:$0xff] }
 0x1c8   : > { %v4949_v59 = vsub.f32 %v6151_v18, %v1379_v3  ;;  %v1191_v7 = vpop.xlane.xlu0 %1190  ;;  %v4958_v15 = vsub.f32 %v6153_v39, %v1379_v3  ;;  %v1721_v11 = vadd.f32 %v1720_v0, %v1572_v27  ;;  %v1836_v41 = vsel %vm1123_vm1, %v1631_v25, 0.0 }
 0x1c9   : > { %6148 = vst [vmem:[#allocation40_spill] sm:$0xff] %v4943_v46  ;;  %6150 = vst [vmem:[#allocation33_spill] sm:$0xff] %v4946_v13  ;;  %v1307_v16 = vpop.xlane.xlu1 %1306  ;;  %v1632_v31 = vmul.f32 %v4943_v46, %v4943_v46  ;;  %v1633_v32 = vmul.f32 %v4946_v13, %v4946_v13  ;;  %v1380_v18 = vmul.f32 0.0051020407, %v1191_v7 }
 0x1ca   : > { %6152 = vst [vmem:[#allocation39_spill] sm:$0xff] %v4949_v59  ;;  %6154 = vst [vmem:[#allocation41_spill] sm:$0xff] %v4958_v15  ;;  %v1409_v60 = vmul.f32 0.0051020407, %v1307_v16  ;;  %v1575_v46 = vmul.f32 %v4949_v59, %v4949_v59  ;;  %v6159_v16 = vld [vmem:[#allocation51_spill] sm:$0xff]  ;;  %1718 = vadd.xlane.f32.xlu1 %v1717_v30 }
 0x1cb   : > { %v1840_v34 = vsel %vm1123_vm1, %v1633_v32, 0.0  ;;  %v4970_v3 = vsub.f32 %v6157_v42, %v1380_v18  ;;  %v4973_v7 = vsub.f32 %v6159_v16, %v1380_v18  ;;  %1722 = vadd.xlane.f32.xlu0 %v1721_v11  ;;  %v6163_v16 = vld [vmem:[#allocation49_spill] sm:$0xff] }
 0x1cc   : > { %v4967_v13 = vsub.f32 %v6155_v40, %v1409_v60  ;;  %v1311_v27 = vpop.xlane.xlu0 %1310  ;;  %v4976_v2 = vsub.f32 %v6161_v10, %v1409_v60  ;;  %v1841_v39 = vadd.f32 %v1840_v34, %v1632_v31  ;;  %v1574_v40 = vmul.f32 %v4958_v15, %v4958_v15  ;;  %v6165_v60 = vld [vmem:[#allocation52_spill] sm:$0xff] }
 0x1cd   : > { %6158 = vst [vmem:[#allocation43_spill] sm:$0xff] %v4970_v3  ;;  %6160 = vst [vmem:[#allocation47_spill] sm:$0xff] %v4973_v7  ;;  %v1195_v0 = vpop.xlane.xlu1 %1194  ;;  %v1410_v25 = vmul.f32 0.0051020407, %v1311_v27  ;;  %v1576_v42 = vmul.f32 %v4970_v3, %v4970_v3  ;;  %v1577_v18 = vmul.f32 %v4973_v7, %v4973_v7  ;;  %v1837_v27 = vadd.f32 %v1836_v41, %v1630_v4  ;;  %v6167_v31 = vld [vmem:[#allocation56_spill] sm:$0xff]  ;;  %v6169_v4 = vld [vmem:[#allocation54_spill] sm:$0xff] }
 0x1ce   : > { %6156 = vst [vmem:[#allocation46_spill] sm:$0xff] %v4967_v13  ;;  %6162 = vst [vmem:[#allocation48_spill] sm:$0xff] %v4976_v2  ;;  %v1381_v32 = vmul.f32 0.0051020407, %v1195_v0  ;;  %v1635_v11 = vmul.f32 %v4967_v13, %v4967_v13  ;;  %v1724_v7 = vsel %vm1123_vm1, %v1575_v46, 0.0  ;;  %v1634_v13 = vmul.f32 %v4976_v2, %v4976_v2 }
 0x1cf   : > { %v4987_v59 = vsub.f32 %v6163_v16, %v1410_v25  ;;  %v4990_v30 = vsub.f32 %v6165_v60, %v1410_v25  ;;  %1842 = vadd.xlane.f32.xlu0 %v1841_v39  ;;  %v1728_v3 = vsel %vm1123_vm1, %v1577_v18, 0.0  ;;  %1838 = vadd.xlane.f32.xlu1 %v1837_v27  ;;  %v1725_v15 = vadd.f32 %v1724_v7, %v1574_v40  ;;  %v6175_v27 = vld [vmem:[#allocation62_spill] sm:$0xff] }
 0x1d0   : > { %v4993_v34 = vsub.f32 %v6167_v31, %v1381_v32  ;;  %v1199_v10 = vpop.xlane.xlu0 %1198  ;;  %v5004_v41 = vsub.f32 %v6169_v4, %v1381_v32  ;;  %v1729_v31 = vadd.f32 %v1728_v3, %v1576_v42  ;;  %v1844_v46 = vsel %vm1123_vm1, %v1635_v11, 0.0 }
 0x1d1   : > { %6164 = vst [vmem:[#allocation51_spill] sm:$0xff] %v4987_v59  ;;  %6166 = vst [vmem:[#allocation44_spill] sm:$0xff] %v4990_v30  ;;  %v1315_v0 = vpop.xlane.xlu1 %1314  ;;  %v1636_v16 = vmul.f32 %v4987_v59, %v4987_v59  ;;  %v1637_v25 = vmul.f32 %v4990_v30, %v4990_v30  ;;  %v1382_v60 = vmul.f32 0.0051020407, %v1199_v10  ;;  %v1845_v10 = vadd.f32 %v1844_v46, %v1634_v13 }
 0x1d2   : > { %6168 = vst [vmem:[#allocation49_spill] sm:$0xff] %v4993_v34  ;;  %6170 = vst [vmem:[#allocation52_spill] sm:$0xff] %v5004_v41  ;;  %v1411_v39 = vmul.f32 0.0051020407, %v1315_v0  ;;  %v1579_v2 = vmul.f32 %v4993_v34, %v4993_v34  ;;  %v1578_v11 = vmul.f32 %v5004_v41, %v5004_v41  ;;  %v6187_v34 = vld [vmem:[#allocation68_spill] sm:$0xff] }
 0x1d3   : > { %v1848_v18 = vsel %vm1123_vm1, %v1637_v25, 0.0  ;;  %v5014_v30 = vsub.f32 %v6173_v5, %v1382_v60  ;;  %v5017_v32 = vsub.f32 %v6175_v27, %v1382_v60  ;;  %1730 = vadd.xlane.f32.xlu0 %v1729_v31  ;;  %1726 = vadd.xlane.f32.xlu1 %v1725_v15  ;;  %v6177_v25 = vld [vmem:[#allocation55_spill] sm:$0xff]  ;;  %v6179_v15 = vld [vmem:[#allocation60_spill] sm:$0xff] }
 0x1d4   : > { %v5011_v59 = vsub.f32 %v6171_v62, %v1411_v39  ;;  %v1319_v0 = vpop.xlane.xlu0 %1318  ;;  %v1849_v42 = vadd.f32 %v1848_v18, %v1636_v16  ;;  %v5026_v4 = vsub.f32 %v6177_v25, %v1411_v39  ;;  %v6181_v16 = vld [vmem:[#allocation63_spill] sm:$0xff]  ;;  %v1732_v39 = vsel %vm1123_vm1, %v1579_v2, 0.0  ;;  %v6205_v41 = vld [vmem:[#allocation80_spill] sm:$0xff] }
 0x1d5   : > { %6174 = vst [vmem:[#allocation54_spill] sm:$0xff] %v5014_v30  ;;  %6176 = vst [vmem:[#allocation57_spill] sm:$0xff] %v5017_v32  ;;  %v1203_v3 = vpop.xlane.xlu1 %1202  ;;  %v1412_v7 = vmul.f32 0.0051020407, %v1319_v0  ;;  %v1580_v62 = vmul.f32 %v5014_v30, %v5014_v30  ;;  %v1581_v5 = vmul.f32 %v5017_v32, %v5017_v32  ;;  %v6183_v27 = vld [vmem:[#allocation67_spill] sm:$0xff] }
 0x1d6   : > { %6172 = vst [vmem:[#allocation56_spill] sm:$0xff] %v5011_v59  ;;  %v1383_v40 = vmul.f32 0.0051020407, %v1203_v3  ;;  %6178 = vst [vmem:[#allocation59_spill] sm:$0xff] %v5026_v4  ;;  %v1639_v60 = vmul.f32 %v5011_v59, %v5011_v59  ;;  %v1733_v59 = vadd.f32 %v1732_v39, %v1578_v11  ;;  %v6193_v11 = vld [vmem:[#allocation65_spill] sm:$0xff] }
 0x1d7   : > { %v5031_v31 = vsub.f32 %v6179_v15, %v1412_v7  ;;  %v5034_v18 = vsub.f32 %v6181_v16, %v1412_v7  ;;  %1850 = vadd.xlane.f32.xlu0 %v1849_v42  ;;  %v1736_v13 = vsel %vm1123_vm1, %v1581_v5, 0.0  ;;  %1846 = vadd.xlane.f32.xlu1 %v1845_v10  ;;  %v6185_v15 = vld [vmem:[#allocation64_spill] sm:$0xff]  ;;  %v1638_v42 = vmul.f32 %v5026_v4, %v5026_v4  ;;  %v6189_v10 = vld [vmem:[#allocation70_spill] sm:$0xff]  ;;  %v6203_v4 = vld [vmem:[#allocation79_spill] sm:$0xff] }
 0x1d8   : > { %v5037_v0 = vsub.f32 %v6183_v27, %v1383_v40  ;;  %v1207_v30 = vpop.xlane.xlu0 %1206  ;;  %v5046_v7 = vsub.f32 %v6185_v15, %v1383_v40  ;;  %v1737_v32 = vadd.f32 %v1736_v13, %v1580_v62  ;;  %v1852_v2 = vsel %vm1123_vm1, %v1639_v60, 0.0 }
 0x1d9   : > { %6180 = vst [vmem:[#allocation62_spill] sm:$0xff] %v5031_v31  ;;  %6182 = vst [vmem:[#allocation55_spill] sm:$0xff] %v5034_v18  ;;  %v1323_v3 = vpop.xlane.xlu1 %1322  ;;  %v1640_v46 = vmul.f32 %v5031_v31, %v5031_v31  ;;  %v1641_v25 = vmul.f32 %v5034_v18, %v5034_v18  ;;  %v1384_v27 = vmul.f32 0.0051020407, %v1207_v30 }
 0x1da   : > { %6184 = vst [vmem:[#allocation60_spill] sm:$0xff] %v5037_v0  ;;  %6186 = vst [vmem:[#allocation63_spill] sm:$0xff] %v5046_v7  ;;  %v1413_v16 = vmul.f32 0.0051020407, %v1323_v3  ;;  %v1583_v31 = vmul.f32 %v5037_v0, %v5037_v0  ;;  %v6191_v3 = vld [vmem:[#allocation72_spill] sm:$0xff] }
 0x1db   : > { %v1856_v5 = vsel %vm1123_vm1, %v1641_v25, 0.0  ;;  %v5058_v40 = vsub.f32 %v6189_v10, %v1384_v27  ;;  %v5061_v30 = vsub.f32 %v6191_v3, %v1384_v27  ;;  %1738 = vadd.xlane.f32.xlu0 %v1737_v32  ;;  %1734 = vadd.xlane.f32.xlu1 %v1733_v59  ;;  %v6195_v3 = vld [vmem:[#allocation71_spill] sm:$0xff] }
 0x1dc   : > { %v5055_v18 = vsub.f32 %v6187_v34, %v1413_v16  ;;  %v1327_v62 = vpop.xlane.xlu0 %1326  ;;  %v5064_v39 = vsub.f32 %v6193_v11, %v1413_v16  ;;  %v1857_v15 = vadd.f32 %v1856_v5, %v1640_v46  ;;  %v1582_v34 = vmul.f32 %v5046_v7, %v5046_v7  ;;  %v6197_v16 = vld [vmem:[#allocation73_spill] sm:$0xff]  ;;  %v6199_v46 = vld [vmem:[#allocation78_spill] sm:$0xff] }
 0x1dd   : > { %6190 = vst [vmem:[#allocation64_spill] sm:$0xff] %v5058_v40  ;;  %6192 = vst [vmem:[#allocation68_spill] sm:$0xff] %v5061_v30  ;;  %v1211_v13 = vpop.xlane.xlu1 %1210  ;;  %v1414_v60 = vmul.f32 0.0051020407, %v1327_v62  ;;  %v1584_v10 = vmul.f32 %v5058_v40, %v5058_v40  ;;  %v1585_v27 = vmul.f32 %v5061_v30, %v5061_v30  ;;  %v1853_v62 = vadd.f32 %v1852_v2, %v1638_v42  ;;  %v6201_v42 = vld [vmem:[#allocation75_spill] sm:$0xff] }
 0x1de   : > { %6188 = vst [vmem:[#allocation67_spill] sm:$0xff] %v5055_v18  ;;  %6194 = vst [vmem:[#allocation70_spill] sm:$0xff] %v5064_v39  ;;  %v1385_v25 = vmul.f32 0.0051020407, %v1211_v13  ;;  %v1643_v32 = vmul.f32 %v5055_v18, %v5055_v18  ;;  %v1740_v30 = vsel %vm1123_vm1, %v1583_v31, 0.0  ;;  %v1642_v18 = vmul.f32 %v5064_v39, %v5064_v39 }
 0x1df   : > { %v5075_v0 = vsub.f32 %v6195_v3, %v1414_v60  ;;  %v5078_v59 = vsub.f32 %v6197_v16, %v1414_v60  ;;  %1858 = vadd.xlane.f32.xlu0 %v1857_v15  ;;  %v1744_v40 = vsel %vm1123_vm1, %v1585_v27, 0.0  ;;  %1854 = vadd.xlane.f32.xlu1 %v1853_v62  ;;  %v1741_v7 = vadd.f32 %v1740_v30, %v1582_v34  ;;  %v6207_v62 = vld [vmem:[#allocation83_spill] sm:$0xff] }
 0x1e0   : > { %v5081_v5 = vsub.f32 %v6199_v46, %v1385_v25  ;;  %v1215_v11 = vpop.xlane.xlu0 %1214  ;;  %v5092_v2 = vsub.f32 %v6201_v42, %v1385_v25  ;;  %v1745_v46 = vadd.f32 %v1744_v40, %v1584_v10  ;;  %v1860_v31 = vsel %vm1123_vm1, %v1643_v32, 0.0 }
 0x1e1   : > { %6196 = vst [vmem:[#allocation72_spill] sm:$0xff] %v5075_v0  ;;  %6198 = vst [vmem:[#allocation65_spill] sm:$0xff] %v5078_v59  ;;  %v1331_v13 = vpop.xlane.xlu1 %1330  ;;  %v1644_v3 = vmul.f32 %v5075_v0, %v5075_v0  ;;  %v1645_v60 = vmul.f32 %v5078_v59, %v5078_v59  ;;  %v1386_v16 = vmul.f32 0.0051020407, %v1215_v11  ;;  %v1861_v11 = vadd.f32 %v1860_v31, %v1642_v18 }
 0x1e2   : > { %6200 = vst [vmem:[#allocation71_spill] sm:$0xff] %v5081_v5  ;;  %6202 = vst [vmem:[#allocation73_spill] sm:$0xff] %v5092_v2  ;;  %v1415_v15 = vmul.f32 0.0051020407, %v1331_v13  ;;  %v1587_v39 = vmul.f32 %v5081_v5, %v5081_v5  ;;  %v1586_v32 = vmul.f32 %v5092_v2, %v5092_v2  ;;  %v6219_v5 = vld [vmem:[#allocation89_spill] sm:$0xff]  ;;  %v6236_v2 = vld [vmem:[#allocation102_spill] sm:$0xff] }
 0x1e3   : > { %v1864_v27 = vsel %vm1123_vm1, %v1645_v60, 0.0  ;;  %v5102_v59 = vsub.f32 %v6205_v41, %v1386_v16  ;;  %v5105_v25 = vsub.f32 %v6207_v62, %v1386_v16  ;;  %1746 = vadd.xlane.f32.xlu0 %v1745_v46  ;;  %1742 = vadd.xlane.f32.xlu1 %v1741_v7  ;;  %v6209_v60 = vld [vmem:[#allocation76_spill] sm:$0xff]  ;;  %v6211_v7 = vld [vmem:[#allocation81_spill] sm:$0xff] }
 0x1e4   : > { %v5099_v0 = vsub.f32 %v6203_v4, %v1415_v15  ;;  %v1335_v13 = vpop.xlane.xlu0 %1334  ;;  %v1865_v10 = vadd.f32 %v1864_v27, %v1644_v3  ;;  %v5114_v42 = vsub.f32 %v6209_v60, %v1415_v15  ;;  %v6213_v3 = vld [vmem:[#allocation84_spill] sm:$0xff]  ;;  %v1748_v15 = vsel %vm1123_vm1, %v1587_v39, 0.0 }
 0x1e5   : > { %6206 = vst [vmem:[#allocation75_spill] sm:$0xff] %v5102_v59  ;;  %6208 = vst [vmem:[#allocation79_spill] sm:$0xff] %v5105_v25  ;;  %v1219_v40 = vpop.xlane.xlu1 %1218  ;;  %v1416_v30 = vmul.f32 0.0051020407, %v1335_v13  ;;  %v1588_v4 = vmul.f32 %v5102_v59, %v5102_v59  ;;  %v1589_v41 = vmul.f32 %v5105_v25, %v5105_v25  ;;  %v6215_v62 = vld [vmem:[#allocation88_spill] sm:$0xff] }
 0x1e6   : > { %6204 = vst [vmem:[#allocation78_spill] sm:$0xff] %v5099_v0  ;;  %v1387_v34 = vmul.f32 0.0051020407, %v1219_v40  ;;  %6210 = vst [vmem:[#allocation80_spill] sm:$0xff] %v5114_v42  ;;  %v1647_v16 = vmul.f32 %v5099_v0, %v5099_v0  ;;  %v1749_v0 = vadd.f32 %v1748_v15, %v1586_v32  ;;  %v6225_v32 = vld [vmem:[#allocation87_spill] sm:$0xff] }
 0x1e7   : > { %v5119_v46 = vsub.f32 %v6211_v7, %v1416_v30  ;;  %v5122_v27 = vsub.f32 %v6213_v3, %v1416_v30  ;;  %1866 = vadd.xlane.f32.xlu0 %v1865_v10  ;;  %v1752_v18 = vsel %vm1123_vm1, %v1589_v41, 0.0  ;;  %1862 = vadd.xlane.f32.xlu1 %v1861_v11  ;;  %v6217_v7 = vld [vmem:[#allocation86_spill] sm:$0xff]  ;;  %v1646_v10 = vmul.f32 %v5114_v42, %v5114_v42  ;;  %v6221_v11 = vld [vmem:[#allocation91_spill] sm:$0xff]  ;;  %v6234_v42 = vld [vmem:[#allocation100_spill] sm:$0xff] }
 0x1e8   : > { %v5125_v13 = vsub.f32 %v6215_v62, %v1387_v34  ;;  %v1223_v59 = vpop.xlane.xlu0 %1222  ;;  %v5134_v30 = vsub.f32 %v6217_v7, %v1387_v34  ;;  %v1753_v25 = vadd.f32 %v1752_v18, %v1588_v4  ;;  %v1868_v39 = vsel %vm1123_vm1, %v1647_v16, 0.0 }
 0x1e9   : > { %6212 = vst [vmem:[#allocation83_spill] sm:$0xff] %v5119_v46  ;;  %6214 = vst [vmem:[#allocation76_spill] sm:$0xff] %v5122_v27  ;;  %v1339_v40 = vpop.xlane.xlu1 %1338  ;;  %v1648_v31 = vmul.f32 %v5119_v46, %v5119_v46  ;;  %v1649_v60 = vmul.f32 %v5122_v27, %v5122_v27  ;;  %v1388_v62 = vmul.f32 0.0051020407, %v1223_v59 }
 0x1ea   : > { %6216 = vst [vmem:[#allocation81_spill] sm:$0xff] %v5125_v13  ;;  %6218 = vst [vmem:[#allocation84_spill] sm:$0xff] %v5134_v30  ;;  %v1417_v3 = vmul.f32 0.0051020407, %v1339_v40  ;;  %v1591_v46 = vmul.f32 %v5125_v13, %v5125_v13  ;;  %v6223_v40 = vld [vmem:[#allocation94_spill] sm:$0xff] }
 0x1eb   : > { %v1872_v41 = vsel %vm1123_vm1, %v1649_v60, 0.0  ;;  %v5146_v34 = vsub.f32 %v6221_v11, %v1388_v62  ;;  %v5149_v59 = vsub.f32 %v6223_v40, %v1388_v62  ;;  %1754 = vadd.xlane.f32.xlu0 %v1753_v25  ;;  %1750 = vadd.xlane.f32.xlu1 %v1749_v0  ;;  %v6227_v40 = vld [vmem:[#allocation92_spill] sm:$0xff] }
 0x1ec   : > { %v5143_v27 = vsub.f32 %v6219_v5, %v1417_v3  ;;  %v1343_v4 = vpop.xlane.xlu0 %1342  ;;  %v5152_v15 = vsub.f32 %v6225_v32, %v1417_v3  ;;  %v1873_v7 = vadd.f32 %v1872_v41, %v1648_v31  ;;  %v1590_v5 = vmul.f32 %v5134_v30, %v5134_v30  ;;  %v6229_v3 = vld [vmem:[#allocation95_spill] sm:$0xff] }
 0x1ed   : > { %6222 = vst [vmem:[#allocation86_spill] sm:$0xff] %v5146_v34  ;;  %6224 = vst [vmem:[#allocation89_spill] sm:$0xff] %v5149_v59  ;;  %v1227_v18 = vpop.xlane.xlu1 %1226  ;;  %v1418_v16 = vmul.f32 0.0051020407, %v1343_v4  ;;  %v1592_v11 = vmul.f32 %v5146_v34, %v5146_v34  ;;  %v1593_v62 = vmul.f32 %v5149_v59, %v5149_v59  ;;  %v1869_v4 = vadd.f32 %v1868_v39, %v1646_v10  ;;  %v6231_v31 = vld [vmem:[#allocation99_spill] sm:$0xff]  ;;  %v6233_v10 = vld [vmem:[#allocation96_spill] sm:$0xff] }
 0x1ee   : > { %6220 = vst [vmem:[#allocation88_spill] sm:$0xff] %v5143_v27  ;;  %6226 = vst [vmem:[#allocation91_spill] sm:$0xff] %v5152_v15  ;;  %v1389_v60 = vmul.f32 0.0051020407, %v1227_v18  ;;  %v1651_v25 = vmul.f32 %v5143_v27, %v5143_v27  ;;  %v1756_v59 = vsel %vm1123_vm1, %v1591_v46, 0.0  ;;  %v1650_v27 = vmul.f32 %v5152_v15, %v5152_v15 }
 0x1ef   : > { %v5163_v13 = vsub.f32 %v6227_v40, %v1418_v16  ;;  %v5166_v0 = vsub.f32 %v6229_v3, %v1418_v16  ;;  %1874 = vadd.xlane.f32.xlu0 %v1873_v7  ;;  %v1760_v34 = vsel %vm1123_vm1, %v1593_v62, 0.0  ;;  %1870 = vadd.xlane.f32.xlu1 %v1869_v4  ;;  %v1757_v30 = vadd.f32 %v1756_v59, %v1590_v5  ;;  %v6238_v4 = vld [vmem:[#allocation104_spill] sm:$0xff] }
 0x1f0   : > { %v5169_v41 = vsub.f32 %v6231_v31, %v1389_v60  ;;  %v1231_v32 = vpop.xlane.xlu0 %1230  ;;  %v5180_v39 = vsub.f32 %v6233_v10, %v1389_v60  ;;  %v1761_v31 = vadd.f32 %v1760_v34, %v1592_v11  ;;  %v1876_v46 = vsel %vm1123_vm1, %v1651_v25, 0.0 }
 0x1f1   : > { %6228 = vst [vmem:[#allocation94_spill] sm:$0xff] %v5163_v13  ;;  %6230 = vst [vmem:[#allocation87_spill] sm:$0xff] %v5166_v0  ;;  %v1347_v18 = vpop.xlane.xlu1 %1346  ;;  %v1652_v40 = vmul.f32 %v5163_v13, %v5163_v13  ;;  %v1653_v16 = vmul.f32 %v5166_v0, %v5166_v0  ;;  %v1390_v3 = vmul.f32 0.0051020407, %v1231_v32  ;;  %v1877_v32 = vadd.f32 %v1876_v46, %v1650_v27 }
 0x1f2   : > { %6232 = vst [vmem:[#allocation92_spill] sm:$0xff] %v5169_v41  ;;  %v1419_v7 = vmul.f32 0.0051020407, %v1347_v18  ;;  %v1595_v15 = vmul.f32 %v5169_v41, %v5169_v41  ;;  %v1594_v25 = vmul.f32 %v5180_v39, %v5180_v39  ;;  %v6247_v41 = vld [vmem:[#allocation111_spill] sm:$0xff] }
 0x1f3   : > { %v1880_v62 = vsel %vm1123_vm1, %v1653_v16, 0.0  ;;  %v5190_v0 = vsub.f32 %v6236_v2, %v1390_v3  ;;  %v5193_v60 = vsub.f32 %v6238_v4, %v1390_v3  ;;  %1762 = vadd.xlane.f32.xlu0 %v1761_v31  ;;  %1758 = vadd.xlane.f32.xlu1 %v1757_v30  ;;  %v6240_v16 = vld [vmem:[#allocation97_spill] sm:$0xff]  ;;  %v6241_v30 = vld [vmem:[#allocation103_spill] sm:$0xff]  ;;  %v6245_v4 = vld [vmem:[#allocation110_spill] sm:$0xff] }
 0x1f4   : > { %v5187_v13 = vsub.f32 %v6234_v42, %v1419_v7  ;;  %v1351_v18 = vpop.xlane.xlu0 %1350  ;;  %v1881_v11 = vadd.f32 %v1880_v62, %v1652_v40  ;;  %v5202_v10 = vsub.f32 %v6240_v16, %v1419_v7  ;;  %v6243_v40 = vld [vmem:[#allocation105_spill] sm:$0xff]  ;;  %v1764_v7 = vsel %vm1123_vm1, %v1595_v15, 0.0 }
 0x1f5   : > { %6237 = vst [vmem:[#allocation99_spill] sm:$0xff] %v5190_v0  ;;  %6239 = vst [vmem:[#allocation96_spill] sm:$0xff] %v5193_v60  ;;  %v1235_v34 = vpop.xlane.xlu1 %1234  ;;  %v1420_v59 = vmul.f32 0.0051020407, %v1351_v18  ;;  %v1596_v42 = vmul.f32 %v5190_v0, %v5190_v0  ;;  %v1597_v2 = vmul.f32 %v5193_v60, %v5193_v60 }
 0x1f6   : > { %6235 = vst [vmem:[#allocation95_spill] sm:$0xff] %v5187_v13  ;;  %v1391_v5 = vmul.f32 0.0051020407, %v1235_v34  ;;  %v1655_v3 = vmul.f32 %v5187_v13, %v5187_v13  ;;  %v1765_v13 = vadd.f32 %v1764_v7, %v1594_v25 }
 0x1f7   : > { %v5207_v31 = vsub.f32 %v6241_v30, %v1420_v59  ;;  %v5210_v62 = vsub.f32 %v6243_v40, %v1420_v59  ;;  %1882 = vadd.xlane.f32.xlu0 %v1881_v11  ;;  %v1768_v27 = vsel %vm1123_vm1, %v1597_v2, 0.0  ;;  %1878 = vadd.xlane.f32.xlu1 %v1877_v32  ;;  %v6246_v30 = vld [vmem:[#allocation107_spill] sm:$0xff]  ;;  %v1654_v11 = vmul.f32 %v5202_v10, %v5202_v10  ;;  %v6250_v32 = vld [vmem:[#allocation114_spill] sm:$0xff] }
 0x1f8   : > { %v5213_v18 = vsub.f32 %v6245_v4, %v1391_v5  ;;  %v1239_v0 = vpop.xlane.xlu0 %1238  ;;  %v5222_v59 = vsub.f32 %v6246_v30, %v1391_v5  ;;  %v1769_v60 = vadd.f32 %v1768_v27, %v1596_v42  ;;  %v1884_v15 = vsel %vm1123_vm1, %v1655_v3, 0.0 }
 0x1f9   : > { %6242 = vst [vmem:[#allocation100_spill] sm:$0xff] %v5207_v31  ;;  %6244 = vst [vmem:[#allocation102_spill] sm:$0xff] %v5210_v62  ;;  %v1355_v34 = vpop.xlane.xlu1 %1354  ;;  %v1656_v46 = vmul.f32 %v5207_v31, %v5207_v31  ;;  %v1657_v16 = vmul.f32 %v5210_v62, %v5210_v62  ;;  %v1392_v4 = vmul.f32 0.0051020407, %v1239_v0 }
 0x1fa   : > { %v1421_v40 = vmul.f32 0.0051020407, %v1355_v34  ;;  %v1599_v31 = vmul.f32 %v5213_v18, %v5213_v18  ;;  %v1598_v3 = vmul.f32 %v5222_v59, %v5222_v59 }
 0x1fb   : > { %v1888_v2 = vsel %vm1123_vm1, %v1657_v16, 0.0  ;;  %v5234_v5 = vsub.f32 %v4577_v44, %v1392_v4  ;;  %v5237_v0 = vsub.f32 %v6250_v32, %v1392_v4  ;;  %1770 = vadd.xlane.f32.xlu0 %v1769_v60  ;;  %1766 = vadd.xlane.f32.xlu1 %v1765_v13  ;;  %v6252_v16 = vld [vmem:[#allocation108_spill] sm:$0xff]  ;;  %v6256_v32 = vld [vmem:[#allocation115_spill] sm:$0xff] }
 0x1fc   : > { %v5231_v62 = vsub.f32 %v6247_v41, %v1421_v40  ;;  %v1359_v42 = vpop.xlane.xlu0 %1358  ;;  %v1889_v7 = vadd.f32 %v1888_v2, %v1656_v46  ;;  %v5246_v30 = vsub.f32 %v6252_v16, %v1421_v40  ;;  %v6254_v4 = vld [vmem:[#allocation112_spill] sm:$0xff]  ;;  %v6258_v2 = vld [vmem:[#allocation118_spill] sm:$0xff]  ;;  %v1772_v40 = vsel %vm1123_vm1, %v1599_v31, 0.0 }
 0x1fd   : > { %6249 = vst [vmem:[#allocation97_spill] sm:$0xff] %v5234_v5  ;;  %6251 = vst [vmem:[#allocation103_spill] sm:$0xff] %v5237_v0  ;;  %v1243_v34 = vpop.xlane.xlu1 %1242  ;;  %v1422_v25 = vmul.f32 0.0051020407, %v1359_v42  ;;  %v1600_v41 = vmul.f32 %v5234_v5, %v5234_v5  ;;  %v1601_v44 = vmul.f32 %v5237_v0, %v5237_v0  ;;  %v1885_v42 = vadd.f32 %v1884_v15, %v1654_v11 }
 0x1fe   : > { %6248 = vst [vmem:[#allocation104_spill] sm:$0xff] %v5231_v62  ;;  %v1393_v27 = vmul.f32 0.0051020407, %v1243_v34  ;;  %6253 = vst [vmem:[#allocation105_spill] sm:$0xff] %v5246_v30  ;;  %v1659_v46 = vmul.f32 %v5231_v62, %v5231_v62  ;;  %v6262_v62 = vld [vmem:[#allocation119_spill] sm:$0xff] }
 0x1ff   : > { %v5249_v60 = vsub.f32 %v6254_v4, %v1422_v25  ;;  %v5252_v13 = vsub.f32 %v6256_v32, %v1422_v25  ;;  %1890 = vadd.xlane.f32.xlu0 %v1889_v7  ;;  %v1776_v0 = vsel %vm1123_vm1, %v1601_v44, 0.0  ;;  %1886 = vadd.xlane.f32.xlu1 %v1885_v42  ;;  %v1658_v4 = vmul.f32 %v5246_v30, %v5246_v30  ;;  %v6260_v32 = vld [vmem:[#allocation117_spill] sm:$0xff] }
 0x200   : > { %v5257_v34 = vsub.f32 %v6258_v2, %v1393_v27  ;;  %v1777_v15 = vadd.f32 %v1776_v0, %v1600_v41  ;;  %v5268_v2 = vsub.f32 %v6260_v32, %v1393_v27  ;;  %v1773_v7 = vadd.f32 %v1772_v40, %v1598_v3 }
 0x201   : > { %6255 = vst [vmem:[#allocation110_spill] sm:$0xff] %v5249_v60  ;;  %6257 = vst [vmem:[#allocation107_spill] sm:$0xff] %v5252_v13  ;;  %v1363_v5 = vpop.xlane.xlu1 %1362  ;;  %v1660_v16 = vmul.f32 %v5249_v60, %v5249_v60  ;;  %v1661_v25 = vmul.f32 %v5252_v13, %v5252_v13 }
 0x202   : > { %6259 = vst [vmem:[#allocation111_spill] sm:$0xff] %v5257_v34  ;;  %v1423_v11 = vmul.f32 0.0051020407, %v1363_v5  ;;  %6261 = vst [vmem:[#allocation114_spill] sm:$0xff] %v5268_v2  ;;  %v1603_v31 = vmul.f32 %v5257_v34, %v5257_v34  ;;  %v1892_v5 = vsel %vm1123_vm1, %v1659_v46, 0.0  ;;  %v1602_v0 = vmul.f32 %v5268_v2, %v5268_v2 }
 0x203   : > { %v1896_v44 = vsel %vm1123_vm1, %v1661_v25, 0.0  ;;  %1778 = vadd.xlane.f32.xlu0 %v1777_v15  ;;  %1774 = vadd.xlane.f32.xlu1 %v1773_v7  ;;  %v1893_v3 = vadd.f32 %v1892_v5, %v1658_v4 }
 0x204   : > { %v5274_v60 = vsub.f32 %v6262_v62, %v1423_v11  ;;  %v1897_v13 = vadd.f32 %v1896_v44, %v1660_v16  ;;  %v5280_v27 = vsub.f32 %v4597_v8, %v1423_v11  ;;  %v1780_v42 = vsel %vm1123_vm1, %v1603_v31, 0.0 }
 0x205   : > { %v1781_v40 = vadd.f32 %v1780_v42, %v1602_v0 }
 0x206   : > { %6263 = vst [vmem:[#allocation108_spill] sm:$0xff] %v5274_v60  ;;  %6264 = vst [vmem:[#allocation112_spill] sm:$0xff] %v5280_v27  ;;  %v1663_v41 = vmul.f32 %v5274_v60, %v5274_v60  ;;  %v1662_v62 = vmul.f32 %v5280_v27, %v5280_v27 }
 0x207   : > { %1898 = vadd.xlane.f32.xlu0 %v1897_v13  ;;  %1894 = vadd.xlane.f32.xlu1 %v1893_v3 }
 0x208   : > { %v1900_v46 = vsel %vm1123_vm1, %v1663_v41, 0.0 }
 0x209   : > { %v1901_v16 = vadd.f32 %v1900_v46, %v1662_v62 }
 0x20b   : > { %1782 = vadd.xlane.f32.xlu1 %v1781_v40 }
 0x20f   : > { %1902 = vadd.xlane.f32.xlu1 %v1901_v16 }
 0x21b   : > { %v1667_v25 = vpop.xlane.xlu0 %1666 }
 0x21c   : > { %v1904_v8 = vmul.f32 0.0051020407, %v1667_v25 }
 0x21e   : > { %v2024_v11 = vadd.f32 1e-05, %v1904_v8 }
 0x21f   : > { %v1787_v15 = vpop.xlane.xlu0 %1786 }
 0x220   : > { %3464 = vrsqrt.f32 %v2024_v11  ;;  %v1934_v4 = vmul.f32 0.0051020407, %v1787_v15  ;;  %v3584_v15 = vld [vmem:[%s3758_s13] sm:$0xff] }
 0x222   : > { %v2054_v32 = vadd.f32 1e-05, %v1934_v4 }
 0x223   : > { %v1671_v44 = vpop.xlane.xlu1 %1670 }
 0x224   : > { %v1675_v13 = vpop.xlane.xlu0 %1674  ;;  %3466 = vrsqrt.f32 %v2054_v32  ;;  %v1905_v31 = vmul.f32 0.0051020407, %v1671_v44 }
 0x225   : > { %v1906_v7 = vmul.f32 0.0051020407, %v1675_v13 }
 0x226   : > { %v2025_v0 = vadd.f32 1e-05, %v1905_v31 }
 0x227   : > { %v2026_v5 = vadd.f32 1e-05, %v1906_v7  ;;  %v1791_v42 = vpop.xlane.xlu1 %1790 }
 0x228   : > { %v1795_v3 = vpop.xlane.xlu0 %1794  ;;  %3468 = vrsqrt.f32 %v2025_v0  ;;  %v1935_v62 = vmul.f32 0.0051020407, %v1791_v42 }
 0x229   : > { %v1936_v41 = vmul.f32 0.0051020407, %v1795_v3  ;;  %3470 = vrsqrt.f32 %v2026_v5  ;;  %v3585_v3 = vld [vmem:[%s3758_s13 + $0xf0] sm:$0xff] }
 0x22a   : > { %v2055_v46 = vadd.f32 1e-05, %v1935_v62 }
 0x22b   : > { %v2056_v40 = vadd.f32 1e-05, %v1936_v41  ;;  %v1679_v25 = vpop.xlane.xlu1 %1678 }
 0x22c   : > { %v1683_v16 = vpop.xlane.xlu0 %1682  ;;  %3472 = vrsqrt.f32 %v2055_v46  ;;  %v1907_v11 = vmul.f32 0.0051020407, %v1679_v25 }
 0x22d   : > { %v3465_v8 = vpop.eup %3464  ;;  %3474 = vrsqrt.f32 %v2056_v40  ;;  %v1908_v32 = vmul.f32 0.0051020407, %v1683_v16 }
 0x22e   : > { %v2144_v4 = vmul.f32 %v3584_v15, %v3465_v8  ;;  %v2027_v13 = vadd.f32 1e-05, %v1907_v11  ;;  %v3586_v11 = vld [vmem:[%s3758_s13 + $0x8] sm:$0xff] }
 0x22f   : > { %v1799_v44 = vpop.xlane.xlu1 %1798  ;;  %v2028_v42 = vadd.f32 1e-05, %v1908_v32 }
 0x230   : > { %v1803_v7 = vpop.xlane.xlu0 %1802  ;;  %2206 = vperm.xlu0 %3370, %v2144_v4   ;;  %v1937_v0 = vmul.f32 0.0051020407, %v1799_v44  ;;  %3476 = vrsqrt.f32 %v2027_v13 }
 0x231   : > { %v3467_v31 = vpop.eup %3466  ;;  %v1938_v5 = vmul.f32 0.0051020407, %v1803_v7 }
 0x232   : > { %v2174_v41 = vmul.f32 %v3585_v3, %v3467_v31  ;;  %v2057_v62 = vadd.f32 1e-05, %v1937_v0 }
 0x233   : > { %v1687_v46 = vpop.xlane.xlu1 %1686  ;;  %v2058_v40 = vadd.f32 1e-05, %v1938_v5 }
 0x234   : > { %v1691_v60 = vpop.xlane.xlu0 %1690  ;;  %2356 = vperm.xlu1 %3371, %v2174_v41   ;;  %3478 = vrsqrt.f32 %v2057_v62  ;;  %v1909_v16 = vmul.f32 0.0051020407, %v1687_v46  ;;  %v3587_v41 = vld [vmem:[%s3758_s13 + $0x10] sm:$0xff]  ;;  %v3588_v62 = vld [vmem:[%s3758_s13 + $0xf8] sm:$0xff] }
 0x235   : > { %v3469_v25 = vpop.eup %3468  ;;  %3480 = vrsqrt.f32 %v2028_v42  ;;  %v1910_v13 = vmul.f32 0.0051020407, %v1691_v60  ;;  %v3589_v60 = vld [vmem:[%s3758_s13 + $0x100] sm:$0xff] }
 0x236   : > { %v2145_v15 = vmul.f32 %v3586_v11, %v3469_v25  ;;  %v3471_v4 = vpop.eup %3470  ;;  %3482 = vrsqrt.f32 %v2058_v40  ;;  %v2029_v31 = vadd.f32 1e-05, %v1909_v16 }
 0x237   : > { %v1807_v7 = vpop.xlane.xlu1 %1806  ;;  %v2146_v5 = vmul.f32 %v3587_v41, %v3471_v4  ;;  %v2030_v25 = vadd.f32 1e-05, %v1910_v13 }
 0x238   : > { %v1811_v8 = vpop.xlane.xlu0 %1810  ;;  %v1939_v44 = vmul.f32 0.0051020407, %v1807_v7  ;;  %2211 = vperm.xlu1 %3371, %v2145_v15  }
 0x239   : > { %v3473_v32 = vpop.eup %3472  ;;  %v1940_v11 = vmul.f32 0.0051020407, %v1811_v8 }
 0x23a   : > { %v2059_v0 = vadd.f32 1e-05, %v1939_v44  ;;  %v2175_v42 = vmul.f32 %v3588_v62, %v3473_v32  ;;  %v3475_v46 = vpop.eup %3474 }
 0x23b   : > { %v1695_v27 = vpop.xlane.xlu1 %1694  ;;  %v2176_v16 = vmul.f32 %v3589_v60, %v3475_v46  ;;  %v2060_v32 = vadd.f32 1e-05, %v1940_v11 }
 0x23c   : > { %v1699_v3 = vpop.xlane.xlu0 %1698  ;;  %3484 = vrsqrt.f32 %v2059_v0  ;;  %2216 = vperm.xlu1 %3371, %v2146_v5   ;;  %2361 = vperm.xlu0 %3370, %v2175_v42   ;;  %v1911_v41 = vmul.f32 0.0051020407, %v1695_v27  ;;  %v3590_v5 = vld [vmem:[%s3758_s13 + $0x18] sm:$0xff]  ;;  %v3591_v42 = vld [vmem:[%s3758_s13 + $0x108] sm:$0xff] }
 0x23d   : > { %3486 = vrsqrt.f32 %v2029_v31  ;;  %v3477_v15 = vpop.eup %3476  ;;  %v1912_v46 = vmul.f32 0.0051020407, %v1699_v3  ;;  %v3593_v3 = vld [vmem:[%s3758_s13 + $0x110] sm:$0xff] }
 0x23e   : > { %3488 = vrsqrt.f32 %v2030_v25  ;;  %v2147_v13 = vmul.f32 %v3590_v5, %v3477_v15  ;;  %v2031_v25 = vadd.f32 1e-05, %v1911_v41 }
 0x23f   : > { %v1815_v7 = vpop.xlane.xlu1 %1814  ;;  %v2032_v5 = vadd.f32 1e-05, %v1912_v46 }
 0x240   : > { %v1819_v40 = vpop.xlane.xlu0 %1818  ;;  %v1941_v44 = vmul.f32 0.0051020407, %v1815_v7  ;;  %2366 = vperm.xlu1 %3371, %v2176_v16   ;;  %v3592_v16 = vld [vmem:[%s3758_s13 + $0x20] sm:$0xff] }
 0x241   : > { %v3479_v4 = vpop.eup %3478 }
 0x242   : > { %v2061_v62 = vadd.f32 1e-05, %v1941_v44  ;;  %v2177_v8 = vmul.f32 %v3591_v42, %v3479_v4  ;;  %v3481_v31 = vpop.eup %3480  ;;  %v3594_v42 = vld [vmem:[%s3758_s13 + $0x118] sm:$0xff] }
 0x243   : > { %v1703_v34 = vpop.xlane.xlu1 %1702  ;;  %v3483_v60 = vpop.eup %3482  ;;  %v2148_v7 = vmul.f32 %v3592_v16, %v3481_v31  ;;  %v3595_v16 = vld [vmem:[%s3758_s13 + $0x28] sm:$0xff] }
 0x244   : > { %v1707_v0 = vpop.xlane.xlu0 %1706  ;;  %3490 = vrsqrt.f32 %v2061_v62  ;;  %v1913_v2 = vmul.f32 0.0051020407, %v1703_v34  ;;  %2221 = vperm.xlu1 %3371, %v2147_v13   ;;  %2371 = vperm.xlu0 %3370, %v2177_v8   ;;  %v1942_v62 = vmul.f32 0.0051020407, %v1819_v40 }
 0x245   : > { %3492 = vrsqrt.f32 %v2060_v32  ;;  %v2178_v32 = vmul.f32 %v3593_v3, %v3483_v60  ;;  %v1914_v31 = vmul.f32 0.0051020407, %v1707_v0  ;;  %v3596_v0 = vld [vmem:[%s3758_s13 + $0x30] sm:$0xff] }
 0x246   : > { %v2033_v11 = vadd.f32 1e-05, %v1913_v2  ;;  %v2062_v46 = vadd.f32 1e-05, %v1942_v62 }
 0x247   : > { %v1823_v44 = vpop.xlane.xlu1 %1822 }
 0x248   : > { %v1827_v27 = vpop.xlane.xlu0 %1826  ;;  %3494 = vrsqrt.f32 %v2033_v11  ;;  %v1943_v15 = vmul.f32 0.0051020407, %v1823_v44  ;;  %2226 = vperm.xlu1 %3371, %v2148_v7  }
 0x249   : > { %v3485_v4 = vpop.eup %3484  ;;  %3496 = vrsqrt.f32 %v2031_v25 }
 0x24a   : > { %v2063_v34 = vadd.f32 1e-05, %v1943_v15  ;;  %v2179_v41 = vmul.f32 %v3594_v42, %v3485_v4  ;;  %v3487_v2 = vpop.eup %3486  ;;  %v2034_v4 = vadd.f32 1e-05, %v1914_v31  ;;  %v3597_v42 = vld [vmem:[%s3758_s13 + $0x128] sm:$0xff] }
 0x24b   : > { %v1711_v8 = vpop.xlane.xlu1 %1710  ;;  %v3489_v11 = vpop.eup %3488  ;;  %v2149_v7 = vmul.f32 %v3595_v16, %v3487_v2  ;;  %v3598_v16 = vld [vmem:[%s3758_s13 + $0x120] sm:$0xff] }
 0x24c   : > { %v1715_v13 = vpop.xlane.xlu0 %1714  ;;  %3498 = vrsqrt.f32 %v2063_v34  ;;  %v1915_v30 = vmul.f32 0.0051020407, %v1711_v8  ;;  %2376 = vperm.xlu1 %3371, %v2178_v32   ;;  %2381 = vperm.xlu0 %3370, %v2179_v41   ;;  %v1944_v34 = vmul.f32 0.0051020407, %v1827_v27 }
 0x24d   : > { %3500 = vrsqrt.f32 %v2032_v5  ;;  %v2150_v5 = vmul.f32 %v3596_v0, %v3489_v11  ;;  %v1916_v31 = vmul.f32 0.0051020407, %v1715_v13 }
 0x24e   : > { %v2035_v40 = vadd.f32 1e-05, %v1915_v30 }
 0x24f   : > { %v1831_v44 = vpop.xlane.xlu1 %1830 }
 0x250   : > { %v1835_v25 = vpop.xlane.xlu0 %1834  ;;  %3502 = vrsqrt.f32 %v2035_v40  ;;  %v1945_v60 = vmul.f32 0.0051020407, %v1831_v44  ;;  %2231 = vperm.xlu1 %3371, %v2149_v7   ;;  %v2064_v40 = vadd.f32 1e-05, %v1944_v34  ;;  %v3599_v44 = vld [vmem:[%s3758_s13 + $0x48] sm:$0xff] }
 0x251   : > { %v3491_v15 = vpop.eup %3490  ;;  %3504 = vrsqrt.f32 %v2062_v46 }
 0x252   : > { %v2065_v3 = vadd.f32 1e-05, %v1945_v60  ;;  %v2181_v30 = vmul.f32 %v3597_v42, %v3491_v15  ;;  %v3493_v62 = vpop.eup %3492  ;;  %v3600_v42 = vld [vmem:[%s3758_s13 + $0x38] sm:$0xff] }
 0x253   : > { %v1719_v41 = vpop.xlane.xlu1 %1718  ;;  %v2180_v7 = vmul.f32 %v3598_v16, %v3493_v62 }
 0x254   : > { %v1723_v32 = vpop.xlane.xlu0 %1722  ;;  %3506 = vrsqrt.f32 %v2065_v3  ;;  %v1917_v2 = vmul.f32 0.0051020407, %v1719_v41  ;;  %2236 = vperm.xlu1 %3371, %v2150_v5   ;;  %2391 = vperm.xlu0 %3370, %v2181_v30   ;;  %v2036_v5 = vadd.f32 1e-05, %v1916_v31  ;;  %v3601_v41 = vld [vmem:[%s3758_s13 + $0x138] sm:$0xff] }
 0x255   : > { %v3495_v8 = vpop.eup %3494  ;;  %3508 = vrsqrt.f32 %v2034_v4  ;;  %v1946_v4 = vmul.f32 0.0051020407, %v1835_v25 }
 0x256   : > { %v2037_v27 = vadd.f32 1e-05, %v1917_v2  ;;  %v2153_v11 = vmul.f32 %v3599_v44, %v3495_v8  ;;  %v3497_v60 = vpop.eup %3496  ;;  %v3602_v44 = vld [vmem:[%s3758_s13 + $0x40] sm:$0xff] }
 0x257   : > { %v2151_v30 = vmul.f32 %v3600_v42, %v3497_v60 }
 0x258   : > { %v1843_v46 = vpop.xlane.xlu0 %1842  ;;  %v1839_v15 = vpop.xlane.xlu1 %1838  ;;  %3510 = vrsqrt.f32 %v2037_v27  ;;  %2386 = vperm.xlu1 %3371, %v2180_v7   ;;  %2251 = vperm.xlu0 %3370, %v2153_v11   ;;  %v2066_v7 = vadd.f32 1e-05, %v1946_v4 }
 0x259   : > { %v1947_v0 = vmul.f32 0.0051020407, %v1839_v15  ;;  %v3499_v3 = vpop.eup %3498  ;;  %3512 = vrsqrt.f32 %v2064_v40  ;;  %v1918_v40 = vmul.f32 0.0051020407, %v1723_v32  ;;  %v3603_v15 = vld [vmem:[%s3758_s13 + $0x58] sm:$0xff] }
 0x25a   : > { %v2183_v62 = vmul.f32 %v3601_v41, %v3499_v3  ;;  %v3501_v2 = vpop.eup %3500  ;;  %v1948_v32 = vmul.f32 0.0051020407, %v1843_v46 }
 0x25b   : > { %v2067_v34 = vadd.f32 1e-05, %v1947_v0  ;;  %v2152_v11 = vmul.f32 %v3602_v44, %v3501_v2 }
 0x25c   : > { %v1731_v13 = vpop.xlane.xlu0 %1730  ;;  %v1727_v8 = vpop.xlane.xlu1 %1726  ;;  %2241 = vperm.xlu1 %3371, %v2151_v30   ;;  %2401 = vperm.xlu0 %3370, %v2183_v62   ;;  %v2038_v30 = vadd.f32 1e-05, %v1918_v40  ;;  %v3604_v62 = vld [vmem:[%s3758_s13 + $0x130] sm:$0xff] }
 0x25d   : > { %3514 = vrsqrt.f32 %v2067_v34  ;;  %v1919_v16 = vmul.f32 0.0051020407, %v1727_v8  ;;  %v3503_v27 = vpop.eup %3502  ;;  %v3605_v8 = vld [vmem:[%s3758_s13 + $0x148] sm:$0xff]  ;;  %v1920_v46 = vmul.f32 0.0051020407, %v1731_v13 }
 0x25e   : > { %3516 = vrsqrt.f32 %v2036_v5  ;;  %v2155_v60 = vmul.f32 %v3603_v15, %v3503_v27  ;;  %v3505_v0 = vpop.eup %3504  ;;  %v2068_v15 = vadd.f32 1e-05, %v1948_v32 }
 0x25f   : > { %v2039_v31 = vadd.f32 1e-05, %v1919_v16  ;;  %v2182_v2 = vmul.f32 %v3604_v62, %v3505_v0 }
 0x260   : > { %v1851_v25 = vpop.xlane.xlu0 %1850  ;;  %v1847_v3 = vpop.xlane.xlu1 %1846  ;;  %2246 = vperm.xlu1 %3371, %v2152_v11   ;;  %2261 = vperm.xlu0 %3370, %v2155_v60   ;;  %v3606_v11 = vld [vmem:[%s3758_s13 + $0x50] sm:$0xff] }
 0x261   : > { %3518 = vrsqrt.f32 %v2039_v31  ;;  %v1949_v42 = vmul.f32 0.0051020407, %v1847_v3  ;;  %v3507_v34 = vpop.eup %3506 }
 0x262   : > { %3520 = vrsqrt.f32 %v2066_v7  ;;  %v3509_v5 = vpop.eup %3508  ;;  %v2185_v16 = vmul.f32 %v3605_v8, %v3507_v34  ;;  %v3608_v8 = vld [vmem:[%s3758_s13 + $0x140] sm:$0xff] }
 0x263   : > { %v2069_v4 = vadd.f32 1e-05, %v1949_v42  ;;  %v2154_v7 = vmul.f32 %v3606_v11, %v3509_v5  ;;  %v3607_v42 = vld [vmem:[%s3758_s13 + $0x68] sm:$0xff]  ;;  %v2040_v5 = vadd.f32 1e-05, %v1920_v46 }
 0x264   : > { %v1739_v41 = vpop.xlane.xlu0 %1738  ;;  %v1735_v27 = vpop.xlane.xlu1 %1734  ;;  %2396 = vperm.xlu1 %3371, %v2182_v2   ;;  %2411 = vperm.xlu0 %3370, %v2185_v16   ;;  %v1950_v2 = vmul.f32 0.0051020407, %v1851_v25 }
 0x265   : > { %3522 = vrsqrt.f32 %v2069_v4  ;;  %v1921_v44 = vmul.f32 0.0051020407, %v1735_v27  ;;  %v3511_v31 = vpop.eup %3510  ;;  %v3609_v27 = vld [vmem:[%s3758_s13 + $0x158] sm:$0xff] }
 0x266   : > { %3524 = vrsqrt.f32 %v2038_v30  ;;  %v3513_v40 = vpop.eup %3512  ;;  %v2157_v0 = vmul.f32 %v3607_v42, %v3511_v31  ;;  %v3610_v42 = vld [vmem:[%s3758_s13 + $0x60] sm:$0xff] }
 0x267   : > { %v2041_v60 = vadd.f32 1e-05, %v1921_v44  ;;  %v2184_v30 = vmul.f32 %v3608_v8, %v3513_v40  ;;  %v1922_v40 = vmul.f32 0.0051020407, %v1739_v41 }
 0x268   : > { %v1859_v3 = vpop.xlane.xlu0 %1858  ;;  %v1855_v62 = vpop.xlane.xlu1 %1854  ;;  %2256 = vperm.xlu1 %3371, %v2154_v7   ;;  %2271 = vperm.xlu0 %3370, %v2157_v0  }
 0x269   : > { %3526 = vrsqrt.f32 %v2041_v60  ;;  %v1951_v34 = vmul.f32 0.0051020407, %v1855_v62  ;;  %v2070_v60 = vadd.f32 1e-05, %v1950_v2  ;;  %v3611_v62 = vld [vmem:[%s3758_s13 + $0x78] sm:$0xff] }
 0x26a   : > { %v3515_v4 = vpop.eup %3514  ;;  %3528 = vrsqrt.f32 %v2068_v15 }
 0x26b   : > { %v3517_v16 = vpop.eup %3516  ;;  %v2071_v32 = vadd.f32 1e-05, %v1951_v34  ;;  %v2187_v44 = vmul.f32 %v3609_v27, %v3515_v4 }
 0x26c   : > { %v1747_v13 = vpop.xlane.xlu0 %1746  ;;  %v1743_v11 = vpop.xlane.xlu1 %1742  ;;  %2406 = vperm.xlu1 %3371, %v2184_v30   ;;  %v2156_v25 = vmul.f32 %v3610_v42, %v3517_v16  ;;  %v2042_v16 = vadd.f32 1e-05, %v1922_v40 }
 0x26d   : > { %3530 = vrsqrt.f32 %v2071_v32  ;;  %v1923_v31 = vmul.f32 0.0051020407, %v1743_v11  ;;  %2421 = vperm.xlu0 %3370, %v2187_v44   ;;  %v3612_v32 = vld [vmem:[%s3758_s13 + $0x150] sm:$0xff]  ;;  %v1952_v44 = vmul.f32 0.0051020407, %v1859_v3  ;;  %v3613_v11 = vld [vmem:[%s3758_s13 + $0x168] sm:$0xff] }
 0x26e   : > { %v3519_v7 = vpop.eup %3518  ;;  %3532 = vrsqrt.f32 %v2040_v5  ;;  %v3615_v3 = vld [vmem:[%s3758_s13 + $0x88] sm:$0xff] }
 0x26f   : > { %v3521_v0 = vpop.eup %3520  ;;  %v2043_v15 = vadd.f32 1e-05, %v1923_v31  ;;  %v2159_v34 = vmul.f32 %v3611_v62, %v3519_v7  ;;  %v3614_v62 = vld [vmem:[%s3758_s13 + $0x70] sm:$0xff] }
 0x270   : > { %v1867_v46 = vpop.xlane.xlu0 %1866  ;;  %v1863_v8 = vpop.xlane.xlu1 %1862  ;;  %2266 = vperm.xlu1 %3371, %v2156_v25   ;;  %v2186_v2 = vmul.f32 %v3612_v32, %v3521_v0 }
 0x271   : > { %3534 = vrsqrt.f32 %v2043_v15  ;;  %v1953_v4 = vmul.f32 0.0051020407, %v1863_v8  ;;  %2281 = vperm.xlu0 %3370, %v2159_v34   ;;  %v1924_v15 = vmul.f32 0.0051020407, %v1747_v13  ;;  %v2072_v34 = vadd.f32 1e-05, %v1952_v44 }
 0x272   : > { %v3523_v30 = vpop.eup %3522  ;;  %3536 = vrsqrt.f32 %v2070_v60 }
 0x273   : > { %v3525_v27 = vpop.eup %3524  ;;  %v2073_v5 = vadd.f32 1e-05, %v1953_v4  ;;  %v2189_v31 = vmul.f32 %v3613_v11, %v3523_v30  ;;  %v1954_v11 = vmul.f32 0.0051020407, %v1867_v46 }
 0x274   : > { %v1755_v41 = vpop.xlane.xlu0 %1754  ;;  %v1751_v42 = vpop.xlane.xlu1 %1750  ;;  %2416 = vperm.xlu1 %3371, %v2186_v2   ;;  %v2158_v60 = vmul.f32 %v3614_v62, %v3525_v27 }
 0x275   : > { %3538 = vrsqrt.f32 %v2073_v5  ;;  %v1925_v7 = vmul.f32 0.0051020407, %v1751_v42  ;;  %2431 = vperm.xlu0 %3370, %v2189_v31   ;;  %v2044_v5 = vadd.f32 1e-05, %v1924_v15  ;;  %v3617_v31 = vld [vmem:[%s3758_s13 + $0x178] sm:$0xff] }
 0x276   : > { %v3527_v25 = vpop.eup %3526  ;;  %3540 = vrsqrt.f32 %v2042_v16  ;;  %v3616_v16 = vld [vmem:[%s3758_s13 + $0x160] sm:$0xff]  ;;  %v1926_v15 = vmul.f32 0.0051020407, %v1755_v41  ;;  %v3620_v41 = vld [vmem:[%s3758_s13 + $0x170] sm:$0xff] }
 0x277   : > { %v2045_v0 = vadd.f32 1e-05, %v1925_v7  ;;  %v2161_v8 = vmul.f32 %v3615_v3, %v3527_v25  ;;  %v3529_v4 = vpop.eup %3528  ;;  %v3618_v3 = vld [vmem:[%s3758_s13 + $0x80] sm:$0xff] }
 0x278   : > { %v1875_v40 = vpop.xlane.xlu0 %1874  ;;  %v1871_v32 = vpop.xlane.xlu1 %1870  ;;  %2276 = vperm.xlu1 %3371, %v2158_v60   ;;  %v2188_v44 = vmul.f32 %v3616_v16, %v3529_v4  ;;  %v3619_v4 = vld [vmem:[%s3758_s13 + $0x98] sm:$0xff] }
 0x279   : > { %3542 = vrsqrt.f32 %v2045_v0  ;;  %v1955_v30 = vmul.f32 0.0051020407, %v1871_v32  ;;  %2291 = vperm.xlu0 %3370, %v2161_v8   ;;  %v2074_v0 = vadd.f32 1e-05, %v1954_v11 }
 0x27a   : > { %v3531_v2 = vpop.eup %3530  ;;  %3544 = vrsqrt.f32 %v2072_v34 }
 0x27b   : > { %v2075_v13 = vadd.f32 1e-05, %v1955_v30  ;;  %v2191_v42 = vmul.f32 %v3617_v31, %v3531_v2  ;;  %v3533_v7 = vpop.eup %3532 }
 0x27c   : > { %v1763_v27 = vpop.xlane.xlu0 %1762  ;;  %v1759_v25 = vpop.xlane.xlu1 %1758  ;;  %2426 = vperm.xlu1 %3371, %v2188_v44   ;;  %v2160_v8 = vmul.f32 %v3618_v3, %v3533_v7  ;;  %v2046_v44 = vadd.f32 1e-05, %v1926_v15 }
 0x27d   : > { %3546 = vrsqrt.f32 %v2075_v13  ;;  %v1927_v62 = vmul.f32 0.0051020407, %v1759_v25  ;;  %2441 = vperm.xlu0 %3370, %v2191_v42   ;;  %v3621_v42 = vld [vmem:[%s3758_s13 + $0x188] sm:$0xff] }
 0x27e   : > { %v3535_v60 = vpop.eup %3534  ;;  %3548 = vrsqrt.f32 %v2044_v5  ;;  %v1956_v5 = vmul.f32 0.0051020407, %v1875_v40  ;;  %v3622_v40 = vld [vmem:[%s3758_s13 + $0x90] sm:$0xff] }
 0x27f   : > { %v3537_v46 = vpop.eup %3536  ;;  %v2047_v34 = vadd.f32 1e-05, %v1927_v62  ;;  %v2163_v32 = vmul.f32 %v3619_v4, %v3535_v60 }
 0x280   : > { %v1883_v30 = vpop.xlane.xlu0 %1882  ;;  %v1879_v2 = vpop.xlane.xlu1 %1878  ;;  %2286 = vperm.xlu1 %3371, %v2160_v8   ;;  %v2190_v31 = vmul.f32 %v3620_v41, %v3537_v46  ;;  %v2076_v3 = vadd.f32 1e-05, %v1956_v5  ;;  %v1928_v8 = vmul.f32 0.0051020407, %v1763_v27 }
 0x281   : > { %3550 = vrsqrt.f32 %v2047_v34  ;;  %v1957_v16 = vmul.f32 0.0051020407, %v1879_v2  ;;  %2301 = vperm.xlu0 %3370, %v2163_v32   ;;  %v3623_v32 = vld [vmem:[%s3758_s13 + $0xa8] sm:$0xff]  ;;  %v1958_v27 = vmul.f32 0.0051020407, %v1883_v30 }
 0x282   : > { %v3539_v13 = vpop.eup %3538  ;;  %3552 = vrsqrt.f32 %v2074_v0  ;;  %v2048_v41 = vadd.f32 1e-05, %v1928_v8 }
 0x283   : > { %v2077_v11 = vadd.f32 1e-05, %v1957_v16  ;;  %v2193_v7 = vmul.f32 %v3621_v42, %v3539_v13  ;;  %v3541_v25 = vpop.eup %3540 }
 0x284   : > { %v1767_v62 = vpop.xlane.xlu1 %1766  ;;  %2436 = vperm.xlu1 %3371, %v2190_v31   ;;  %v1771_v0 = vpop.xlane.xlu0 %1770  ;;  %v2162_v4 = vmul.f32 %v3622_v40, %v3541_v25  ;;  %v3624_v31 = vld [vmem:[%s3758_s13 + $0x180] sm:$0xff] }
 0x285   : > { %3554 = vrsqrt.f32 %v2077_v11  ;;  %v1929_v60 = vmul.f32 0.0051020407, %v1767_v62  ;;  %2451 = vperm.xlu0 %3370, %v2193_v7   ;;  %v3625_v7 = vld [vmem:[%s3758_s13 + $0x198] sm:$0xff]  ;;  %v3626_v40 = vld [vmem:[%s3758_s13 + $0xa0] sm:$0xff]  ;;  %v1930_v30 = vmul.f32 0.0051020407, %v1771_v0 }
 0x286   : > { %v3543_v34 = vpop.eup %3542  ;;  %3556 = vrsqrt.f32 %v2046_v44  ;;  %v3629_v0 = vld [vmem:[%s3758_s13 + $0x1a8] sm:$0xff] }
 0x287   : > { %v2049_v15 = vadd.f32 1e-05, %v1929_v60  ;;  %v2165_v46 = vmul.f32 %v3623_v32, %v3543_v34  ;;  %v3545_v2 = vpop.eup %3544 }
 0x288   : > { %v1887_v16 = vpop.xlane.xlu1 %1886  ;;  %2296 = vperm.xlu1 %3371, %v2162_v4   ;;  %v2192_v42 = vmul.f32 %v3624_v31, %v3545_v2  ;;  %v1891_v62 = vpop.xlane.xlu0 %1890  ;;  %v2078_v4 = vadd.f32 1e-05, %v1958_v27 }
 0x289   : > { %3558 = vrsqrt.f32 %v2049_v15  ;;  %v1959_v13 = vmul.f32 0.0051020407, %v1887_v16  ;;  %2311 = vperm.xlu0 %3370, %v2165_v46   ;;  %v3627_v46 = vld [vmem:[%s3758_s13 + $0xb8] sm:$0xff] }
 0x28a   : > { %v3547_v11 = vpop.eup %3546  ;;  %3560 = vrsqrt.f32 %v2076_v3 }
 0x28b   : > { %v3549_v44 = vpop.eup %3548  ;;  %v2079_v5 = vadd.f32 1e-05, %v1959_v13  ;;  %v2195_v25 = vmul.f32 %v3625_v7, %v3547_v11 }
 0x28c   : > { %v1775_v60 = vpop.xlane.xlu1 %1774  ;;  %2446 = vperm.xlu1 %3371, %v2192_v42   ;;  %v2164_v3 = vmul.f32 %v3626_v40, %v3549_v44  ;;  %v1779_v31 = vpop.xlane.xlu0 %1778  ;;  %v2050_v44 = vadd.f32 1e-05, %v1930_v30 }
 0x28d   : > { %3562 = vrsqrt.f32 %v2079_v5  ;;  %v1931_v34 = vmul.f32 0.0051020407, %v1775_v60  ;;  %2461 = vperm.xlu0 %3370, %v2195_v25   ;;  %v1960_v5 = vmul.f32 0.0051020407, %v1891_v62 }
 0x28e   : > { %v3551_v15 = vpop.eup %3550  ;;  %3564 = vrsqrt.f32 %v2048_v41  ;;  %v3628_v41 = vld [vmem:[%s3758_s13 + $0x190] sm:$0xff] }
 0x28f   : > { %v3553_v8 = vpop.eup %3552  ;;  %v2051_v32 = vadd.f32 1e-05, %v1931_v34  ;;  %v2167_v2 = vmul.f32 %v3627_v46, %v3551_v15  ;;  %v2080_v40 = vadd.f32 1e-05, %v1960_v5  ;;  %v3632_v5 = vld [vmem:[%s3758_s13 + $0x1a0] sm:$0xff] }
 0x290   : > { %v1895_v16 = vpop.xlane.xlu1 %1894  ;;  %2306 = vperm.xlu1 %3371, %v2164_v3   ;;  %v2194_v42 = vmul.f32 %v3628_v41, %v3553_v8  ;;  %v3630_v3 = vld [vmem:[%s3758_s13 + $0xb0] sm:$0xff]  ;;  %v1932_v8 = vmul.f32 0.0051020407, %v1779_v31 }
 0x291   : > { %3566 = vrsqrt.f32 %v2051_v32  ;;  %v1961_v13 = vmul.f32 0.0051020407, %v1895_v16  ;;  %2321 = vperm.xlu0 %3370, %v2167_v2   ;;  %v1899_v2 = vpop.xlane.xlu0 %1898 }
 0x292   : > { %v3555_v11 = vpop.eup %3554  ;;  %3568 = vrsqrt.f32 %v2078_v4  ;;  %v3631_v4 = vld [vmem:[%s3758_s13 + $0xc8] sm:$0xff] }
 0x293   : > { %v3557_v7 = vpop.eup %3556  ;;  %v2081_v27 = vadd.f32 1e-05, %v1961_v13  ;;  %v2197_v25 = vmul.f32 %v3629_v0, %v3555_v11 }
 0x294   : > { %v1783_v60 = vpop.xlane.xlu1 %1782  ;;  %2456 = vperm.xlu1 %3371, %v2194_v42   ;;  %v2166_v62 = vmul.f32 %v3630_v3, %v3557_v7  ;;  %v2052_v7 = vadd.f32 1e-05, %v1932_v8  ;;  %v3636_v8 = vld [vmem:[%s3758_s13 + $0x1b0] sm:$0xff] }
 0x295   : > { %3570 = vrsqrt.f32 %v2081_v27  ;;  %v1933_v34 = vmul.f32 0.0051020407, %v1783_v60  ;;  %2471 = vperm.xlu0 %3370, %v2197_v25   ;;  %v3633_v27 = vld [vmem:[%s3758_s13 + $0x1b8] sm:$0xff] }
 0x296   : > { %v3559_v15 = vpop.eup %3558  ;;  %3572 = vrsqrt.f32 %v2050_v44  ;;  %v1962_v44 = vmul.f32 0.0051020407, %v1899_v2 }
 0x297   : > { %v3561_v32 = vpop.eup %3560  ;;  %v2053_v46 = vadd.f32 1e-05, %v1933_v34  ;;  %v2169_v30 = vmul.f32 %v3631_v4, %v3559_v15  ;;  %v3634_v34 = vld [vmem:[%s3758_s13 + $0xc0] sm:$0xff]  ;;  %v3637_v4 = vld [vmem:[%s3758_s13 + $0x1c8] sm:$0xff] }
 0x298   : > { %v1903_v16 = vpop.xlane.xlu1 %1902  ;;  %2316 = vperm.xlu1 %3371, %v2166_v62   ;;  %v2196_v41 = vmul.f32 %v3632_v5, %v3561_v32  ;;  %v2082_v60 = vadd.f32 1e-05, %v1962_v44 }
 0x299   : > { %3574 = vrsqrt.f32 %v2053_v46  ;;  %v1963_v13 = vmul.f32 0.0051020407, %v1903_v16  ;;  %2331 = vperm.xlu0 %3370, %v2169_v30  }
 0x29a   : > { %v3563_v11 = vpop.eup %3562  ;;  %3576 = vrsqrt.f32 %v2080_v40  ;;  %v3635_v40 = vld [vmem:[%s3758_s13 + $0xd8] sm:$0xff] }
 0x29b   : > { %v3565_v42 = vpop.eup %3564  ;;  %v2083_v31 = vadd.f32 1e-05, %v1963_v13  ;;  %v2199_v0 = vmul.f32 %v3633_v27, %v3563_v11  ;;  %v3638_v11 = vld [vmem:[%s3758_s13 + $0xd0] sm:$0xff]  ;;  %v3640_v27 = vld [vmem:[%s3758_s13 + $0x1c0] sm:$0xff] }
 0x29c   : > { %2466 = vperm.xlu1 %3371, %v2196_v41   ;;  %v2168_v15 = vmul.f32 %v3634_v34, %v3565_v42  ;;  %v3639_v41 = vld [vmem:[%s3758_s13 + $0xe8] sm:$0xff]  ;;  %v6265_v34 = vld [vmem:[#allocation129_spill] sm:$0xff] }
 0x29d   : > { %3578 = vrsqrt.f32 %v2083_v31  ;;  %2481 = vperm.xlu0 %3370, %v2199_v0  }
 0x29e   : > { %v3567_v25 = vpop.eup %3566  ;;  %3580 = vrsqrt.f32 %v2052_v7  ;;  %v2023_v7 = vld [vmem:[%s3758_s13 + $0x1d8] sm:$0xff] }
 0x29f   : > { %v2171_v3 = vmul.f32 %v3635_v40, %v3567_v25  ;;  %v3569_v62 = vpop.eup %3568  ;;  %3582 = vrsqrt.f32 %v2082_v60  ;;  %v6266_v40 = vld [vmem:[#allocation130_spill] sm:$0xff] }
 0x2a0   : > { %2326 = vperm.xlu1 %3371, %v2168_v15   ;;  %v2198_v46 = vmul.f32 %v3636_v8, %v3569_v62  ;;  %v6267_v62 = vld [vmem:[#allocation2_spill] sm:$0xff] }
 0x2a1   : > { %2341 = vperm.xlu0 %3370, %v2171_v3  }
 0x2a2   : > { %v3571_v32 = vpop.eup %3570 }
 0x2a3   : > { %v2201_v30 = vmul.f32 %v3637_v4, %v3571_v32  ;;  %v3573_v2 = vpop.eup %3572  ;;  %v3641_v4 = vld [vmem:[%s3758_s13 + $0xe0] sm:$0xff] }
 0x2a4   : > { %2476 = vperm.xlu1 %3371, %v2198_v46   ;;  %v2170_v5 = vmul.f32 %v3638_v11, %v3573_v2 }
 0x2a5   : > { %2491 = vperm.xlu0 %3370, %v2201_v30  }
 0x2a6   : > { %v3575_v16 = vpop.eup %3574 }
 0x2a7   : > { %v3577_v13 = vpop.eup %3576  ;;  %v2173_v42 = vmul.f32 %v3639_v41, %v3575_v16  ;;  %v6268_v16 = vld [vmem:[#allocation131_spill] sm:$0xff]  ;;  %v6269_v41 = vmov 1  }
 0x2a8   : > { %2336 = vperm.xlu1 %3371, %v2170_v5   ;;  %v2200_v0 = vmul.f32 %v3640_v27, %v3577_v13  ;;  %v2022_v5 = vld [vmem:[%s3758_s13 + $0x1d0] sm:$0xff] }
 0x2a9   : > { %2351 = vperm.xlu0 %3370, %v2173_v42   ;;  %v6270_v42 = vld [vmem:[#allocation45_spill] sm:$0xff] }
 0x2aa   : > { %v3579_v44 = vpop.eup %3578 }
 0x2ab   : > { %v2207_v31 = vpop.permute.xlu0 %2206  ;;  %v2203_v25 = vmul.f32 %v3579_v44, %v2023_v7  ;;  %v3581_v60 = vpop.eup %3580 }
 0x2ac   : > { %v2504_v15 = vmul.f32 %v2207_v31, %v6265_v34  ;;  %v2505_v3 = vmul.f32 %v2207_v31, %v6266_v40  ;;  %2486 = vperm.xlu1 %3371, %v2200_v0   ;;  %v2172_v30 = vmul.f32 %v3641_v4, %v3581_v60  ;;  %v3583_v2 = vpop.eup %3582  ;;  %v6271_v60 = vld [vmem:[#allocation4_spill] sm:$0xff]  ;;  %v6275_v4 = vld [vmem:[#allocation134_spill] sm:$0xff] }
 0x2ad   : > { %2501 = vperm.xlu0 %3370, %v2203_v25   ;;  %v2202_v27 = vmul.f32 %v3583_v2, %v2022_v5  ;;  %v6276_v2 = vld [vmem:[#allocation50_spill] sm:$0xff] }
 0x2ae   : > { %v2924_v32 = vadd.f32 %v6267_v62, %v2504_v15  ;;  %v2925_v8 = vadd.f32 %v6267_v62, %v2505_v3  ;;  %v6272_v62 = vld [vmem:[#allocation135_spill] sm:$0xff] }
 0x2af   : > { %v2357_v46 = vpop.permute.xlu1 %2356 }
 0x2b0   : > { %3044 = vst [vmem:[%s5352_s29] sm:$0xff] %v2924_v32  ;;  %3045 = vst.msk [vmem:[%s5352_s29 + $0x8] sm:$0xff] %vm1123_vm1, %v2925_v8  ;;  %v2564_v13 = vmul.f32 %v2357_v46, %v6268_v16  ;;  %v2565_v11 = vmul.f32 %v2357_v46, %v4642_v12  ;;  %2346 = vperm.xlu1 %3371, %v2172_v30   ;;  %v6273_v8 = vld [vmem:[#allocation132_spill] sm:$0xff]  ;;  %v6274_v46 = vld [vmem:[#allocation133_spill] sm:$0xff] }
 0x2b1   : > { %3372 = vset.pattern.permute.xlu0 %v6269_v41 }
 0x2b2   : > { %v2984_v44 = vadd.f32 %v6270_v42, %v2564_v13  ;;  %v2985_v31 = vadd.f32 %v6270_v42, %v2565_v11  ;;  %2916 = vperm.xlu0 %3372, %v2022_v5   ;;  %v6277_v11 = vld [vmem:[#allocation3_spill] sm:$0xff] }
 0x2b3   : > { %v2212_v0 = vpop.permute.xlu1 %2211 }
 0x2b4   : > { %3104 = vst [vmem:[%s5352_s29 + $0x1e0] sm:$0xff] %v2984_v44  ;;  %3105 = vst.msk [vmem:[%s5352_s29 + $0x1e8] sm:$0xff] %vm1123_vm1, %v2985_v31  ;;  %v2506_v25 = vmul.f32 %v2212_v0, %v4654_v21  ;;  %v2507_v12 = vmul.f32 %v2212_v0, %v4657_v14  ;;  %2496 = vperm.xlu1 %3371, %v2202_v27   ;;  %v6278_v31 = vld [vmem:[#allocation136_spill] sm:$0xff]  ;;  %v6279_v27 = vld [vmem:[#allocation53_spill] sm:$0xff] }
 0x2b6   : > { %v2926_v34 = vadd.f32 %v6271_v60, %v2506_v25  ;;  %v2927_v15 = vadd.f32 %v6271_v60, %v2507_v12 }
 0x2b7   : > { %v2362_v40 = vpop.permute.xlu0 %2361  ;;  %v2217_v3 = vpop.permute.xlu1 %2216 }
 0x2b8   : > { %3046 = vst [vmem:[%s5352_s29 + $0x10] sm:$0xff] %v2926_v34  ;;  %3047 = vst.msk [vmem:[%s5352_s29 + $0x18] sm:$0xff] %vm1123_vm1, %v2927_v15  ;;  %v2566_v32 = vmul.f32 %v2362_v40, %v6272_v62  ;;  %v2567_v21 = vmul.f32 %v2362_v40, %v6273_v8  ;;  %v2508_v14 = vmul.f32 %v2217_v3, %v6274_v46  ;;  %3373 = vset.pattern.permute.xlu1 %v6269_v41  ;;  %v6281_v8 = vld [vmem:[#allocation5_spill] sm:$0xff] }
 0x2b9   : > { %v2509_v30 = vmul.f32 %v2217_v3, %v6275_v4  ;;  %2921 = vperm.xlu1 %3373, %v2023_v7   ;;  %v6280_v3 = vld [vmem:[#allocation58_spill] sm:$0xff] }
 0x2ba   : > { %v2986_v16 = vadd.f32 %v6276_v2, %v2566_v32  ;;  %v2987_v13 = vadd.f32 %v6276_v2, %v2567_v21  ;;  %v2928_v5 = vadd.f32 %v6277_v11, %v2508_v14 }
 0x2bb   : > { %v2929_v42 = vadd.f32 %v6277_v11, %v2509_v30  ;;  %v2367_v44 = vpop.permute.xlu1 %2366 }
 0x2bc   : > { %3106 = vst [vmem:[%s5352_s29 + $0x1f0] sm:$0xff] %v2986_v16  ;;  %3107 = vst.msk [vmem:[%s5352_s29 + $0x1f8] sm:$0xff] %vm1123_vm1, %v2987_v13  ;;  %v2568_v41 = vmul.f32 %v2367_v44, %v6278_v31  ;;  %v2569_v7 = vmul.f32 %v2367_v44, %v4682_v54  ;;  %v6285_v31 = vld [vmem:[#allocation61_spill] sm:$0xff] }
 0x2bd   : > { %3048 = vst [vmem:[%s5352_s29 + $0x20] sm:$0xff] %v2928_v5  ;;  %3049 = vst.msk [vmem:[%s5352_s29 + $0x28] sm:$0xff] %vm1123_vm1, %v2929_v42  ;;  %v6284_v5 = vld [vmem:[#allocation66_spill] sm:$0xff] }
 0x2be   : > { %v2988_v0 = vadd.f32 %v6279_v27, %v2568_v41  ;;  %v2989_v25 = vadd.f32 %v6279_v27, %v2569_v7 }
 0x2bf   : > { %v2372_v12 = vpop.permute.xlu0 %2371  ;;  %v2222_v60 = vpop.permute.xlu1 %2221 }
 0x2c0   : > { %3108 = vst [vmem:[%s5352_s29 + $0x200] sm:$0xff] %v2988_v0  ;;  %3109 = vst.msk [vmem:[%s5352_s29 + $0x208] sm:$0xff] %vm1123_vm1, %v2989_v25  ;;  %v2570_v34 = vmul.f32 %v2372_v12, %v4712_v20  ;;  %v2571_v15 = vmul.f32 %v2372_v12, %v4703_v28  ;;  %v2510_v40 = vmul.f32 %v2222_v60, %v4696_v26  ;;  %v6282_v26 = vld [vmem:[#allocation6_spill] sm:$0xff] }
 0x2c1   : > { %v2511_v54 = vmul.f32 %v2222_v60, %v4685_v52 }
 0x2c2   : > { %v2990_v62 = vadd.f32 %v6280_v3, %v2570_v34  ;;  %v2991_v32 = vadd.f32 %v6280_v3, %v2571_v15  ;;  %v2930_v21 = vadd.f32 %v6281_v8, %v2510_v40  ;;  %v6287_v40 = vld [vmem:[#allocation74_spill] sm:$0xff] }
 0x2c3   : > { %v2931_v46 = vadd.f32 %v6281_v8, %v2511_v54  ;;  %v2227_v14 = vpop.permute.xlu1 %2226 }
 0x2c4   : > { %3110 = vst [vmem:[%s5352_s29 + $0x210] sm:$0xff] %v2990_v62  ;;  %3111 = vst.msk [vmem:[%s5352_s29 + $0x218] sm:$0xff] %vm1123_vm1, %v2991_v32  ;;  %v2512_v28 = vmul.f32 %v2227_v14, %v4706_v24  ;;  %v2513_v52 = vmul.f32 %v2227_v14, %v4709_v19  ;;  %v6283_v19 = vld [vmem:[#allocation137_spill] sm:$0xff]  ;;  %v6288_v62 = vld [vmem:[#allocation8_spill] sm:$0xff] }
 0x2c5   : > { %3050 = vst [vmem:[%s5352_s29 + $0x30] sm:$0xff] %v2930_v21  ;;  %3051 = vst.msk [vmem:[%s5352_s29 + $0x38] sm:$0xff] %vm1123_vm1, %v2931_v46  ;;  %v6289_v14 = vld [vmem:[#allocation11_spill] sm:$0xff] }
 0x2c6   : > { %v2932_v20 = vadd.f32 %v6282_v26, %v2512_v28  ;;  %v2933_v4 = vadd.f32 %v6282_v26, %v2513_v52  ;;  %v6290_v26 = vld [vmem:[#allocation69_spill] sm:$0xff] }
 0x2c7   : > { %v2382_v30 = vpop.permute.xlu0 %2381  ;;  %v2377_v2 = vpop.permute.xlu1 %2376 }
 0x2c8   : > { %3052 = vst [vmem:[%s5352_s29 + $0x40] sm:$0xff] %v2932_v20  ;;  %3053 = vst.msk [vmem:[%s5352_s29 + $0x48] sm:$0xff] %vm1123_vm1, %v2933_v4  ;;  %v2574_v16 = vmul.f32 %v2382_v30, %v4762_v35  ;;  %v2575_v13 = vmul.f32 %v2382_v30, %v4747_v51  ;;  %v2572_v24 = vmul.f32 %v2377_v2, %v4723_v43  ;;  %v6286_v35 = vld [vmem:[#allocation7_spill] sm:$0xff] }
 0x2c9   : > { %v2573_v11 = vmul.f32 %v2377_v2, %v6283_v19  ;;  %v6292_v19 = vld [vmem:[#allocation9_spill] sm:$0xff] }
 0x2ca   : > { %v2994_v42 = vadd.f32 %v6284_v5, %v2574_v16  ;;  %v2995_v44 = vadd.f32 %v6284_v5, %v2575_v13  ;;  %v2992_v41 = vadd.f32 %v6285_v31, %v2572_v24  ;;  %v6291_v16 = vld [vmem:[#allocation82_spill] sm:$0xff] }
 0x2cb   : > { %v2993_v7 = vadd.f32 %v6285_v31, %v2573_v11  ;;  %v2232_v27 = vpop.permute.xlu1 %2231  ;;  %v6293_v31 = vld [vmem:[#allocation13_spill] sm:$0xff] }
 0x2cc   : > { %3114 = vst [vmem:[%s5352_s29 + $0x230] sm:$0xff] %v2994_v42  ;;  %3115 = vst.msk [vmem:[%s5352_s29 + $0x238] sm:$0xff] %vm1123_vm1, %v2995_v44  ;;  %v2514_v43 = vmul.f32 %v2232_v27, %v4740_v1  ;;  %v2515_v51 = vmul.f32 %v2232_v27, %v4729_v49  ;;  %v6294_v27 = vld [vmem:[#allocation10_spill] sm:$0xff] }
 0x2cd   : > { %3112 = vst [vmem:[%s5352_s29 + $0x220] sm:$0xff] %v2992_v41  ;;  %3113 = vst.msk [vmem:[%s5352_s29 + $0x228] sm:$0xff] %vm1123_vm1, %v2993_v7 }
 0x2ce   : > { %v2934_v0 = vadd.f32 %v6286_v35, %v2514_v43  ;;  %v2935_v25 = vadd.f32 %v6286_v35, %v2515_v51 }
 0x2cf   : > { %v2392_v12 = vpop.permute.xlu0 %2391  ;;  %v2237_v60 = vpop.permute.xlu1 %2236 }
 0x2d0   : > { %3054 = vst [vmem:[%s5352_s29 + $0x50] sm:$0xff] %v2934_v0  ;;  %3055 = vst.msk [vmem:[%s5352_s29 + $0x58] sm:$0xff] %vm1123_vm1, %v2935_v25  ;;  %v2578_v34 = vmul.f32 %v2392_v12, %v4800_v6  ;;  %v2579_v15 = vmul.f32 %v2392_v12, %v4791_v33  ;;  %v2516_v1 = vmul.f32 %v2237_v60, %v4750_v9  ;;  %v6295_v25 = vld [vmem:[#allocation90_spill] sm:$0xff] }
 0x2d1   : > { %v2517_v49 = vmul.f32 %v2237_v60, %v4753_v61 }
 0x2d2   : > { %v2998_v54 = vadd.f32 %v6287_v40, %v2578_v34  ;;  %v2999_v3 = vadd.f32 %v6287_v40, %v2579_v15  ;;  %v2936_v32 = vadd.f32 %v6288_v62, %v2516_v1  ;;  %v6296_v34 = vld [vmem:[#allocation77_spill] sm:$0xff] }
 0x2d3   : > { %v2937_v8 = vadd.f32 %v6288_v62, %v2517_v49  ;;  %v2252_v21 = vpop.permute.xlu0 %2251  ;;  %v2387_v46 = vpop.permute.xlu1 %2386 }
 0x2d4   : > { %3118 = vst [vmem:[%s5352_s29 + $0x250] sm:$0xff] %v2998_v54  ;;  %3119 = vst.msk [vmem:[%s5352_s29 + $0x258] sm:$0xff] %vm1123_vm1, %v2999_v3  ;;  %v2522_v9 = vmul.f32 %v2252_v21, %v4828_v58  ;;  %v2523_v61 = vmul.f32 %v2252_v21, %v4817_v37  ;;  %v2576_v33 = vmul.f32 %v2387_v46, %v4767_v17  ;;  %v6299_v3 = vld [vmem:[#allocation139_spill] sm:$0xff] }
 0x2d5   : > { %3056 = vst [vmem:[%s5352_s29 + $0x60] sm:$0xff] %v2936_v32  ;;  %3057 = vst.msk [vmem:[%s5352_s29 + $0x68] sm:$0xff] %vm1123_vm1, %v2937_v8  ;;  %v2577_v6 = vmul.f32 %v2387_v46, %v4770_v53  ;;  %v6300_v32 = vld [vmem:[#allocation15_spill] sm:$0xff]  ;;  %v6301_v46 = vld [vmem:[#allocation12_spill] sm:$0xff] }
 0x2d6   : > { %v2942_v28 = vadd.f32 %v6289_v14, %v2522_v9  ;;  %v2943_v52 = vadd.f32 %v6289_v14, %v2523_v61  ;;  %v2996_v20 = vadd.f32 %v6290_v26, %v2576_v33 }
 0x2d7   : > { %v2997_v4 = vadd.f32 %v6290_v26, %v2577_v6  ;;  %v2402_v30 = vpop.permute.xlu0 %2401  ;;  %v2242_v2 = vpop.permute.xlu1 %2241  ;;  %v6304_v26 = vld [vmem:[#allocation140_spill] sm:$0xff] }
 0x2d8   : > { %3062 = vst [vmem:[%s5352_s29 + $0x90] sm:$0xff] %v2942_v28  ;;  %3063 = vst.msk [vmem:[%s5352_s29 + $0x98] sm:$0xff] %vm1123_vm1, %v2943_v52  ;;  %v2582_v17 = vmul.f32 %v2402_v30, %v4850_v55  ;;  %v2583_v53 = vmul.f32 %v2402_v30, %v4835_v29  ;;  %v2518_v37 = vmul.f32 %v2242_v2, %v4782_v36  ;;  %v6303_v28 = vld [vmem:[#allocation35_spill] sm:$0xff] }
 0x2d9   : > { %3116 = vst [vmem:[%s5352_s29 + $0x240] sm:$0xff] %v2996_v20  ;;  %3117 = vst.msk [vmem:[%s5352_s29 + $0x248] sm:$0xff] %vm1123_vm1, %v2997_v4  ;;  %v2519_v58 = vmul.f32 %v2242_v2, %v4773_v57  ;;  %v6305_v4 = vld [vmem:[#allocation141_spill] sm:$0xff]  ;;  %v6306_v2 = vld [vmem:[#allocation98_spill] sm:$0xff] }
 0x2da   : > { %v3002_v13 = vadd.f32 %v6291_v16, %v2582_v17  ;;  %v3003_v24 = vadd.f32 %v6291_v16, %v2583_v53  ;;  %v2938_v11 = vadd.f32 %v6292_v19, %v2518_v37  ;;  %v6307_v37 = vld [vmem:[#allocation85_spill] sm:$0xff] }
 0x2db   : > { %v2939_v5 = vadd.f32 %v6292_v19, %v2519_v58  ;;  %v2262_v42 = vpop.permute.xlu0 %2261  ;;  %v2247_v44 = vpop.permute.xlu1 %2246  ;;  %v6308_v19 = vld [vmem:[#allocation41_spill] sm:$0xff] }
 0x2dc   : > { %3122 = vst [vmem:[%s5352_s29 + $0x270] sm:$0xff] %v3002_v13  ;;  %3123 = vst.msk [vmem:[%s5352_s29 + $0x278] sm:$0xff] %vm1123_vm1, %v3003_v24  ;;  %v2526_v57 = vmul.f32 %v2262_v42, %v4870_v22  ;;  %v2527_v36 = vmul.f32 %v2262_v42, %v4861_v48  ;;  %v2520_v29 = vmul.f32 %v2247_v44, %v4794_v45 }
 0x2dd   : > { %3058 = vst [vmem:[%s5352_s29 + $0x70] sm:$0xff] %v2938_v11  ;;  %3059 = vst.msk [vmem:[%s5352_s29 + $0x78] sm:$0xff] %vm1123_vm1, %v2939_v5  ;;  %v2521_v55 = vmul.f32 %v2247_v44, %v4797_v56  ;;  %v6309_v5 = vld [vmem:[#allocation39_spill] sm:$0xff]  ;;  %v6310_v44 = vld [vmem:[#allocation142_spill] sm:$0xff] }
 0x2de   : > { %v2946_v41 = vadd.f32 %v6293_v31, %v2526_v57  ;;  %v2947_v7 = vadd.f32 %v6293_v31, %v2527_v36  ;;  %v2940_v43 = vadd.f32 %v6294_v27, %v2520_v29  ;;  %v6311_v36 = vld [vmem:[#allocation143_spill] sm:$0xff] }
 0x2df   : > { %v2941_v51 = vadd.f32 %v6294_v27, %v2521_v55  ;;  %v2412_v35 = vpop.permute.xlu0 %2411  ;;  %v2397_v0 = vpop.permute.xlu1 %2396  ;;  %v6312_v55 = vld [vmem:[#allocation17_spill] sm:$0xff] }
 0x2e0   : > { %3066 = vst [vmem:[%s5352_s29 + $0xb0] sm:$0xff] %v2946_v41  ;;  %3067 = vst.msk [vmem:[%s5352_s29 + $0xb8] sm:$0xff] %vm1123_vm1, %v2947_v7  ;;  %v2586_v45 = vmul.f32 %v2412_v35, %v4888_v63  ;;  %v2587_v56 = vmul.f32 %v2412_v35, %v4879_v23  ;;  %v2580_v48 = vmul.f32 %v2397_v0, %v4811_v47  ;;  %v6298_v63 = vld [vmem:[#allocation138_spill] sm:$0xff] }
 0x2e1   : > { %3060 = vst [vmem:[%s5352_s29 + $0x80] sm:$0xff] %v2940_v43  ;;  %3061 = vst.msk [vmem:[%s5352_s29 + $0x88] sm:$0xff] %vm1123_vm1, %v2941_v51  ;;  %v2581_v22 = vmul.f32 %v2397_v0, %v4814_v50  ;;  %v6297_v50 = vld [vmem:[#allocation31_spill] sm:$0xff]  ;;  %v6313_v7 = vld [vmem:[#allocation14_spill] sm:$0xff] }
 0x2e2   : > { %v3006_v12 = vadd.f32 %v6295_v25, %v2586_v45  ;;  %v3007_v60 = vadd.f32 %v6295_v25, %v2587_v56  ;;  %v3000_v15 = vadd.f32 %v6296_v34, %v2580_v48  ;;  %v6314_v0 = vld [vmem:[#allocation48_spill] sm:$0xff]  ;;  %v6315_v56 = vld [vmem:[#allocation46_spill] sm:$0xff] }
 0x2e3   : > { %v3001_v1 = vadd.f32 %v6296_v34, %v2581_v22  ;;  %v2272_v49 = vpop.permute.xlu0 %2271  ;;  %v2257_v40 = vpop.permute.xlu1 %2256  ;;  %v6316_v22 = vld [vmem:[#allocation27_spill] sm:$0xff]  ;;  %v6318_v34 = vld [vmem:[#allocation106_spill] sm:$0xff] }
 0x2e4   : > { %3126 = vst [vmem:[%s5352_s29 + $0x290] sm:$0xff] %v3006_v12  ;;  %3127 = vst.msk [vmem:[%s5352_s29 + $0x298] sm:$0xff] %vm1123_vm1, %v3007_v60  ;;  %v2530_v47 = vmul.f32 %v2272_v49, %v4916_v38  ;;  %v2531_v23 = vmul.f32 %v2272_v49, %v6297_v50  ;;  %v2524_v54 = vmul.f32 %v2257_v40, %v6298_v63  ;;  %v6302_v38 = vld [vmem:[#allocation38_spill] sm:$0xff]  ;;  %v6317_v12 = vld [vmem:[#allocation29_spill] sm:$0xff] }
 0x2e5   : > { %3120 = vst [vmem:[%s5352_s29 + $0x260] sm:$0xff] %v3000_v15  ;;  %3121 = vst.msk [vmem:[%s5352_s29 + $0x268] sm:$0xff] %vm1123_vm1, %v3001_v1  ;;  %v2525_v62 = vmul.f32 %v2257_v40, %v6299_v3  ;;  %v6319_v49 = vld [vmem:[#allocation93_spill] sm:$0xff]  ;;  %v6320_v63 = vld [vmem:[#allocation52_spill] sm:$0xff] }
 0x2e6   : > { %v2950_v8 = vadd.f32 %v6300_v32, %v2530_v47  ;;  %v2951_v21 = vadd.f32 %v6300_v32, %v2531_v23  ;;  %v2944_v9 = vadd.f32 %v6301_v46, %v2524_v54  ;;  %v6321_v3 = vld [vmem:[#allocation49_spill] sm:$0xff]  ;;  %v6322_v32 = vld [vmem:[#allocation32_spill] sm:$0xff] }
 0x2e7   : > { %v2945_v61 = vadd.f32 %v6301_v46, %v2525_v62  ;;  %v2407_v6 = vpop.permute.xlu1 %2406 }
 0x2e8   : > { %v2422_v33 = vpop.permute.xlu0 %2421  ;;  %3070 = vst [vmem:[%s5352_s29 + $0xd0] sm:$0xff] %v2950_v8  ;;  %3071 = vst.msk [vmem:[%s5352_s29 + $0xd8] sm:$0xff] %vm1123_vm1, %v2951_v21  ;;  %v2584_v20 = vmul.f32 %v2407_v6, %v6304_v26  ;;  %v2585_v30 = vmul.f32 %v2407_v6, %v6305_v4  ;;  %v6323_v21 = vld [vmem:[#allocation36_spill] sm:$0xff]  ;;  %v6326_v26 = vld [vmem:[#allocation59_spill] sm:$0xff] }
 0x2e9   : > { %3064 = vst [vmem:[%s5352_s29 + $0xa0] sm:$0xff] %v2944_v9  ;;  %3065 = vst.msk [vmem:[%s5352_s29 + $0xa8] sm:$0xff] %vm1123_vm1, %v2945_v61  ;;  %v2590_v14 = vmul.f32 %v2422_v33, %v6302_v38  ;;  %v2591_v52 = vmul.f32 %v2422_v33, %v6303_v28  ;;  %v6324_v9 = vld [vmem:[#allocation19_spill] sm:$0xff]  ;;  %v6325_v6 = vld [vmem:[#allocation16_spill] sm:$0xff] }
 0x2ea   : > { %v3004_v58 = vadd.f32 %v6307_v37, %v2584_v20  ;;  %v3005_v16 = vadd.f32 %v6307_v37, %v2585_v30  ;;  %v6327_v4 = vld [vmem:[#allocation56_spill] sm:$0xff] }
 0x2eb   : > { %v3010_v17 = vadd.f32 %v6306_v2, %v2590_v14  ;;  %v3011_v53 = vadd.f32 %v6306_v2, %v2591_v52  ;;  %v2267_v24 = vpop.permute.xlu1 %2266  ;;  %v6328_v2 = vld [vmem:[#allocation40_spill] sm:$0xff] }
 0x2ec   : > { %v2282_v13 = vpop.permute.xlu0 %2281  ;;  %3124 = vst [vmem:[%s5352_s29 + $0x280] sm:$0xff] %v3004_v58  ;;  %3125 = vst.msk [vmem:[%s5352_s29 + $0x288] sm:$0xff] %vm1123_vm1, %v3005_v16  ;;  %v2528_v57 = vmul.f32 %v2267_v24, %v6310_v44  ;;  %v2529_v29 = vmul.f32 %v2267_v24, %v6311_v36  ;;  %v6330_v58 = vld [vmem:[#allocation113_spill] sm:$0xff]  ;;  %v6332_v44 = vld [vmem:[#allocation63_spill] sm:$0xff] }
 0x2ed   : > { %3130 = vst [vmem:[%s5352_s29 + $0x2b0] sm:$0xff] %v3010_v17  ;;  %3131 = vst.msk [vmem:[%s5352_s29 + $0x2b8] sm:$0xff] %vm1123_vm1, %v3011_v53  ;;  %v2534_v11 = vmul.f32 %v2282_v13, %v6308_v19  ;;  %v2535_v42 = vmul.f32 %v2282_v13, %v6309_v5  ;;  %v6329_v53 = vld [vmem:[#allocation33_spill] sm:$0xff]  ;;  %v6333_v36 = vld [vmem:[#allocation60_spill] sm:$0xff] }
 0x2ee   : > { %v2948_v27 = vadd.f32 %v6313_v7, %v2528_v57  ;;  %v2949_v43 = vadd.f32 %v6313_v7, %v2529_v29  ;;  %v6331_v24 = vld [vmem:[#allocation101_spill] sm:$0xff] }
 0x2ef   : > { %v2954_v31 = vadd.f32 %v6312_v55, %v2534_v11  ;;  %v2955_v41 = vadd.f32 %v6312_v55, %v2535_v42  ;;  %v2417_v35 = vpop.permute.xlu1 %2416  ;;  %v6334_v55 = vld [vmem:[#allocation43_spill] sm:$0xff] }
 0x2f0   : > { %v2432_v51 = vpop.permute.xlu0 %2431  ;;  %3068 = vst [vmem:[%s5352_s29 + $0xc0] sm:$0xff] %v2948_v27  ;;  %3069 = vst.msk [vmem:[%s5352_s29 + $0xc8] sm:$0xff] %vm1123_vm1, %v2949_v43  ;;  %v2588_v25 = vmul.f32 %v2417_v35, %v6316_v22  ;;  %v2589_v60 = vmul.f32 %v2417_v35, %v6317_v12  ;;  %v6336_v27 = vld [vmem:[#allocation21_spill] sm:$0xff]  ;;  %v6337_v35 = vld [vmem:[#allocation18_spill] sm:$0xff] }
 0x2f1   : > { %3074 = vst [vmem:[%s5352_s29 + $0xf0] sm:$0xff] %v2954_v31  ;;  %3075 = vst.msk [vmem:[%s5352_s29 + $0xf8] sm:$0xff] %vm1123_vm1, %v2955_v41  ;;  %v2594_v45 = vmul.f32 %v2432_v51, %v6314_v0  ;;  %v2595_v48 = vmul.f32 %v2432_v51, %v6315_v56  ;;  %v6335_v41 = vld [vmem:[#allocation47_spill] sm:$0xff]  ;;  %v6338_v22 = vld [vmem:[#allocation70_spill] sm:$0xff] }
 0x2f2   : > { %v3008_v40 = vadd.f32 %v6319_v49, %v2588_v25  ;;  %v3009_v47 = vadd.f32 %v6319_v49, %v2589_v60  ;;  %v6339_v12 = vld [vmem:[#allocation67_spill] sm:$0xff] }
 0x2f3   : > { %v3014_v15 = vadd.f32 %v6318_v34, %v2594_v45  ;;  %v3015_v1 = vadd.f32 %v6318_v34, %v2595_v48  ;;  %v2277_v23 = vpop.permute.xlu1 %2276  ;;  %v6340_v34 = vld [vmem:[#allocation51_spill] sm:$0xff] }
 0x2f4   : > { %v2292_v50 = vpop.permute.xlu0 %2291  ;;  %3128 = vst [vmem:[%s5352_s29 + $0x2a0] sm:$0xff] %v3008_v40  ;;  %3129 = vst.msk [vmem:[%s5352_s29 + $0x2a8] sm:$0xff] %vm1123_vm1, %v3009_v47  ;;  %v2532_v8 = vmul.f32 %v2277_v23, %v6322_v32  ;;  %v2533_v46 = vmul.f32 %v2277_v23, %v6323_v21  ;;  %v6342_v40 = vld [vmem:[#allocation120_spill] sm:$0xff]  ;;  %v6343_v23 = vld [vmem:[#allocation109_spill] sm:$0xff] }
 0x2f5   : > { %3134 = vst [vmem:[%s5352_s29 + $0x2d0] sm:$0xff] %v3014_v15  ;;  %3135 = vst.msk [vmem:[%s5352_s29 + $0x2d8] sm:$0xff] %vm1123_vm1, %v3015_v1  ;;  %v2538_v54 = vmul.f32 %v2292_v50, %v6320_v63  ;;  %v2539_v62 = vmul.f32 %v2292_v50, %v6321_v3  ;;  %v6341_v1 = vld [vmem:[#allocation44_spill] sm:$0xff]  ;;  %v6344_v32 = vld [vmem:[#allocation73_spill] sm:$0xff] }
 0x2f6   : > { %v2952_v38 = vadd.f32 %v6325_v6, %v2532_v8  ;;  %v2953_v14 = vadd.f32 %v6325_v6, %v2533_v46  ;;  %v6345_v21 = vld [vmem:[#allocation71_spill] sm:$0xff] }
 0x2f7   : > { %v2958_v61 = vadd.f32 %v6324_v9, %v2538_v54  ;;  %v2959_v33 = vadd.f32 %v6324_v9, %v2539_v62  ;;  %v2427_v52 = vpop.permute.xlu1 %2426  ;;  %v6346_v9 = vld [vmem:[#allocation54_spill] sm:$0xff] }
 0x2f8   : > { %v2442_v28 = vpop.permute.xlu0 %2441  ;;  %3072 = vst [vmem:[%s5352_s29 + $0xe0] sm:$0xff] %v2952_v38  ;;  %3073 = vst.msk [vmem:[%s5352_s29 + $0xe8] sm:$0xff] %vm1123_vm1, %v2953_v14  ;;  %v2592_v17 = vmul.f32 %v2427_v52, %v6328_v2  ;;  %v2593_v37 = vmul.f32 %v2427_v52, %v6329_v53  ;;  %v6348_v38 = vld [vmem:[#allocation23_spill] sm:$0xff]  ;;  %v6349_v52 = vld [vmem:[#allocation20_spill] sm:$0xff] }
 0x2f9   : > { %3078 = vst [vmem:[%s5352_s29 + $0x110] sm:$0xff] %v2958_v61  ;;  %3079 = vst.msk [vmem:[%s5352_s29 + $0x118] sm:$0xff] %vm1123_vm1, %v2959_v33  ;;  %v2598_v20 = vmul.f32 %v2442_v28, %v6326_v26  ;;  %v2599_v30 = vmul.f32 %v2442_v28, %v6327_v4  ;;  %v6347_v33 = vld [vmem:[#allocation57_spill] sm:$0xff]  ;;  %v6350_v2 = vld [vmem:[#allocation80_spill] sm:$0xff] }
 0x2fa   : > { %v3012_v19 = vadd.f32 %v6331_v24, %v2592_v17  ;;  %v3013_v11 = vadd.f32 %v6331_v24, %v2593_v37  ;;  %v6351_v53 = vld [vmem:[#allocation78_spill] sm:$0xff] }
 0x2fb   : > { %v3018_v16 = vadd.f32 %v6330_v58, %v2598_v20  ;;  %v3019_v13 = vadd.f32 %v6330_v58, %v2599_v30  ;;  %v2287_v42 = vpop.permute.xlu1 %2286  ;;  %v6352_v58 = vld [vmem:[#allocation62_spill] sm:$0xff] }
 0x2fc   : > { %v2302_v5 = vpop.permute.xlu0 %2301  ;;  %3132 = vst [vmem:[%s5352_s29 + $0x2c0] sm:$0xff] %v3012_v19  ;;  %3133 = vst.msk [vmem:[%s5352_s29 + $0x2c8] sm:$0xff] %vm1123_vm1, %v3013_v11  ;;  %v2536_v31 = vmul.f32 %v2287_v42, %v6334_v55  ;;  %v2537_v7 = vmul.f32 %v2287_v42, %v6335_v41  ;;  %v6354_v19 = vld [vmem:[#allocation122_spill] sm:$0xff]  ;;  %v6355_v42 = vld [vmem:[#allocation116_spill] sm:$0xff] }
 0x2fd   : > { %3138 = vst [vmem:[%s5352_s29 + $0x2f0] sm:$0xff] %v3018_v16  ;;  %3139 = vst.msk [vmem:[%s5352_s29 + $0x2f8] sm:$0xff] %vm1123_vm1, %v3019_v13  ;;  %v2542_v57 = vmul.f32 %v2302_v5, %v6332_v44  ;;  %v2543_v29 = vmul.f32 %v2302_v5, %v6333_v36  ;;  %v6353_v13 = vld [vmem:[#allocation55_spill] sm:$0xff]  ;;  %v6356_v55 = vld [vmem:[#allocation84_spill] sm:$0xff] }
 0x2fe   : > { %v2956_v0 = vadd.f32 %v6337_v35, %v2536_v31  ;;  %v2957_v45 = vadd.f32 %v6337_v35, %v2537_v7  ;;  %v6357_v41 = vld [vmem:[#allocation81_spill] sm:$0xff] }
 0x2ff   : > { %v2962_v43 = vadd.f32 %v6336_v27, %v2542_v57  ;;  %v2963_v51 = vadd.f32 %v6336_v27, %v2543_v29  ;;  %v2437_v48 = vpop.permute.xlu1 %2436  ;;  %v6358_v27 = vld [vmem:[#allocation64_spill] sm:$0xff] }
 0x300   : > { %v2452_v56 = vpop.permute.xlu0 %2451  ;;  %3076 = vst [vmem:[%s5352_s29 + $0x100] sm:$0xff] %v2956_v0  ;;  %3077 = vst.msk [vmem:[%s5352_s29 + $0x108] sm:$0xff] %vm1123_vm1, %v2957_v45  ;;  %v2596_v15 = vmul.f32 %v2437_v48, %v6340_v34  ;;  %v2597_v49 = vmul.f32 %v2437_v48, %v6341_v1  ;;  %v6360_v0 = vld [vmem:[#allocation25_spill] sm:$0xff]  ;;  %v6361_v48 = vld [vmem:[#allocation22_spill] sm:$0xff] }
 0x301   : > { %3082 = vst [vmem:[%s5352_s29 + $0x130] sm:$0xff] %v2962_v43  ;;  %3083 = vst.msk [vmem:[%s5352_s29 + $0x138] sm:$0xff] %vm1123_vm1, %v2963_v51  ;;  %v2602_v25 = vmul.f32 %v2452_v56, %v6338_v22  ;;  %v2603_v60 = vmul.f32 %v2452_v56, %v6339_v12  ;;  %v6359_v51 = vld [vmem:[#allocation68_spill] sm:$0xff]  ;;  %v6362_v34 = vld [vmem:[#allocation91_spill] sm:$0xff] }
 0x302   : > { %v3016_v63 = vadd.f32 %v6343_v23, %v2596_v15  ;;  %v3017_v54 = vadd.f32 %v6343_v23, %v2597_v49  ;;  %v6363_v1 = vld [vmem:[#allocation88_spill] sm:$0xff] }
 0x303   : > { %v3022_v47 = vadd.f32 %v6342_v40, %v2602_v25  ;;  %v3023_v50 = vadd.f32 %v6342_v40, %v2603_v60  ;;  %v2297_v62 = vpop.permute.xlu1 %2296  ;;  %v6364_v40 = vld [vmem:[#allocation72_spill] sm:$0xff] }
 0x304   : > { %v2312_v3 = vpop.permute.xlu0 %2311  ;;  %3136 = vst [vmem:[%s5352_s29 + $0x2e0] sm:$0xff] %v3016_v63  ;;  %3137 = vst.msk [vmem:[%s5352_s29 + $0x2e8] sm:$0xff] %vm1123_vm1, %v3017_v54  ;;  %v2540_v61 = vmul.f32 %v2297_v62, %v6346_v9  ;;  %v2541_v6 = vmul.f32 %v2297_v62, %v6347_v33  ;;  %v6366_v63 = vld [vmem:[#allocation124_spill] sm:$0xff]  ;;  %v6367_v62 = vld [vmem:[#allocation121_spill] sm:$0xff] }
 0x305   : > { %3142 = vst [vmem:[%s5352_s29 + $0x310] sm:$0xff] %v3022_v47  ;;  %3143 = vst.msk [vmem:[%s5352_s29 + $0x318] sm:$0xff] %vm1123_vm1, %v3023_v50  ;;  %v2546_v8 = vmul.f32 %v2312_v3, %v6344_v32  ;;  %v2547_v46 = vmul.f32 %v2312_v3, %v6345_v21  ;;  %v6365_v50 = vld [vmem:[#allocation65_spill] sm:$0xff] }
 0x306   : > { %v2960_v26 = vadd.f32 %v6349_v52, %v2540_v61  ;;  %v2961_v20 = vadd.f32 %v6349_v52, %v2541_v6  ;;  %v6368_v61 = vld [vmem:[#allocation92_spill] sm:$0xff]  ;;  %v6369_v6 = vld [vmem:[#allocation75_spill] sm:$0xff] }
 0x307   : > { %v2966_v14 = vadd.f32 %v6348_v38, %v2546_v8  ;;  %v2967_v28 = vadd.f32 %v6348_v38, %v2547_v46  ;;  %v2447_v30 = vpop.permute.xlu1 %2446  ;;  %v6371_v52 = vld [vmem:[#allocation28_spill] sm:$0xff] }
 0x308   : > { %v2462_v4 = vpop.permute.xlu0 %2461  ;;  %3080 = vst [vmem:[%s5352_s29 + $0x120] sm:$0xff] %v2960_v26  ;;  %3081 = vst.msk [vmem:[%s5352_s29 + $0x128] sm:$0xff] %vm1123_vm1, %v2961_v20  ;;  %v2600_v16 = vmul.f32 %v2447_v30, %v6352_v58  ;;  %v2601_v24 = vmul.f32 %v2447_v30, %v6353_v13 }
 0x309   : > { %3086 = vst [vmem:[%s5352_s29 + $0x150] sm:$0xff] %v2966_v14  ;;  %3087 = vst.msk [vmem:[%s5352_s29 + $0x158] sm:$0xff] %vm1123_vm1, %v2967_v28  ;;  %v2606_v17 = vmul.f32 %v2462_v4, %v6350_v2  ;;  %v2607_v37 = vmul.f32 %v2462_v4, %v6351_v53  ;;  %v6370_v14 = vld [vmem:[#allocation79_spill] sm:$0xff]  ;;  %v6372_v4 = vld [vmem:[#allocation24_spill] sm:$0xff] }
 0x30a   : > { %v3020_v44 = vadd.f32 %v6355_v42, %v2600_v16  ;;  %v3021_v57 = vadd.f32 %v6355_v42, %v2601_v24  ;;  %v6374_v16 = vld [vmem:[#allocation83_spill] sm:$0xff]  ;;  %v6375_v24 = vld [vmem:[#allocation76_spill] sm:$0xff] }
 0x30b   : > { %v3026_v11 = vadd.f32 %v6354_v19, %v2606_v17  ;;  %v3027_v5 = vadd.f32 %v6354_v19, %v2607_v37  ;;  %v2307_v29 = vpop.permute.xlu1 %2306  ;;  %v6373_v37 = vld [vmem:[#allocation95_spill] sm:$0xff] }
 0x30c   : > { %v2322_v36 = vpop.permute.xlu0 %2321  ;;  %3140 = vst [vmem:[%s5352_s29 + $0x300] sm:$0xff] %v3020_v44  ;;  %3141 = vst.msk [vmem:[%s5352_s29 + $0x308] sm:$0xff] %vm1123_vm1, %v3021_v57  ;;  %v2544_v43 = vmul.f32 %v2307_v29, %v6358_v27  ;;  %v2545_v35 = vmul.f32 %v2307_v29, %v6359_v51  ;;  %v6377_v44 = vld [vmem:[#allocation123_spill] sm:$0xff]  ;;  %v6379_v27 = vld [vmem:[#allocation89_spill] sm:$0xff] }
 0x30d   : > { %3146 = vst [vmem:[%s5352_s29 + $0x330] sm:$0xff] %v3026_v11  ;;  %3147 = vst.msk [vmem:[%s5352_s29 + $0x338] sm:$0xff] %vm1123_vm1, %v3027_v5  ;;  %v2550_v31 = vmul.f32 %v2322_v36, %v6356_v55  ;;  %v2551_v7 = vmul.f32 %v2322_v36, %v6357_v41  ;;  %v6376_v11 = vld [vmem:[#allocation126_spill] sm:$0xff] }
 0x30e   : > { %v2964_v22 = vadd.f32 %v6361_v48, %v2544_v43  ;;  %v2965_v25 = vadd.f32 %v6361_v48, %v2545_v35  ;;  %v6378_v41 = vld [vmem:[#allocation86_spill] sm:$0xff] }
 0x30f   : > { %v2970_v45 = vadd.f32 %v6360_v0, %v2550_v31  ;;  %v2971_v56 = vadd.f32 %v6360_v0, %v2551_v7  ;;  %v2457_v60 = vpop.permute.xlu1 %2456  ;;  %v6380_v51 = vld [vmem:[#allocation34_spill] sm:$0xff] }
 0x310   : > { %v2472_v12 = vpop.permute.xlu0 %2471  ;;  %3084 = vst [vmem:[%s5352_s29 + $0x140] sm:$0xff] %v2964_v22  ;;  %3085 = vst.msk [vmem:[%s5352_s29 + $0x148] sm:$0xff] %vm1123_vm1, %v2965_v25  ;;  %v2604_v47 = vmul.f32 %v2457_v60, %v6364_v40  ;;  %v2605_v23 = vmul.f32 %v2457_v60, %v6365_v50  ;;  %v6386_v40 = vld [vmem:[#allocation128_spill] sm:$0xff] }
 0x311   : > { %3090 = vst [vmem:[%s5352_s29 + $0x170] sm:$0xff] %v2970_v45  ;;  %3091 = vst.msk [vmem:[%s5352_s29 + $0x178] sm:$0xff] %vm1123_vm1, %v2971_v56  ;;  %v2610_v15 = vmul.f32 %v2472_v12, %v6362_v34  ;;  %v2611_v49 = vmul.f32 %v2472_v12, %v6363_v1  ;;  %v6381_v45 = vld [vmem:[#allocation26_spill] sm:$0xff]  ;;  %v6383_v12 = vld [vmem:[#allocation104_spill] sm:$0xff] }
 0x312   : > { %v3024_v32 = vadd.f32 %v6367_v62, %v2604_v47  ;;  %v3025_v8 = vadd.f32 %v6367_v62, %v2605_v23  ;;  %v6384_v34 = vld [vmem:[#allocation94_spill] sm:$0xff]  ;;  %v6385_v1 = vld [vmem:[#allocation87_spill] sm:$0xff]  ;;  %v6387_v23 = vld [vmem:[#allocation125_spill] sm:$0xff] }
 0x313   : > { %v3030_v54 = vadd.f32 %v6366_v63, %v2610_v15  ;;  %v3031_v3 = vadd.f32 %v6366_v63, %v2611_v49  ;;  %v2317_v46 = vpop.permute.xlu1 %2316 }
 0x314   : > { %v2332_v21 = vpop.permute.xlu0 %2331  ;;  %3144 = vst [vmem:[%s5352_s29 + $0x320] sm:$0xff] %v3024_v32  ;;  %3145 = vst.msk [vmem:[%s5352_s29 + $0x328] sm:$0xff] %vm1123_vm1, %v3025_v8  ;;  %v2548_v38 = vmul.f32 %v2317_v46, %v6369_v6  ;;  %v2549_v28 = vmul.f32 %v2317_v46, %v6370_v14  ;;  %v6388_v32 = vld [vmem:[#allocation114_spill] sm:$0xff] }
 0x315   : > { %3150 = vst [vmem:[%s5352_s29 + $0x350] sm:$0xff] %v3030_v54  ;;  %3151 = vst.msk [vmem:[%s5352_s29 + $0x358] sm:$0xff] %vm1123_vm1, %v3031_v3  ;;  %v2554_v9 = vmul.f32 %v2332_v21, %v5180_v39  ;;  %v2555_v33 = vmul.f32 %v2332_v21, %v6368_v61  ;;  %v6389_v21 = vld [vmem:[#allocation111_spill] sm:$0xff] }
 0x316   : > { %v2968_v30 = vadd.f32 %v6372_v4, %v2548_v38  ;;  %v2969_v2 = vadd.f32 %v6372_v4, %v2549_v28  ;;  %v6392_v38 = vld [vmem:[#allocation42_spill] sm:$0xff] }
 0x317   : > { %v2974_v26 = vadd.f32 %v6371_v52, %v2554_v9  ;;  %v2975_v20 = vadd.f32 %v6371_v52, %v2555_v33  ;;  %v2467_v53 = vpop.permute.xlu1 %2466  ;;  %v6390_v9 = vld [vmem:[#allocation99_spill] sm:$0xff]  ;;  %v6391_v33 = vld [vmem:[#allocation96_spill] sm:$0xff]  ;;  %v6393_v52 = vld [vmem:[#allocation30_spill] sm:$0xff] }
 0x318   : > { %v2482_v17 = vpop.permute.xlu0 %2481  ;;  %3088 = vst [vmem:[%s5352_s29 + $0x160] sm:$0xff] %v2968_v30  ;;  %3089 = vst.msk [vmem:[%s5352_s29 + $0x168] sm:$0xff] %vm1123_vm1, %v2969_v2  ;;  %v2608_v13 = vmul.f32 %v2467_v53, %v6374_v16  ;;  %v2609_v19 = vmul.f32 %v2467_v53, %v6375_v24  ;;  %v6394_v30 = vld [vmem:[#allocation100_spill] sm:$0xff]  ;;  %v6397_v24 = vld [vmem:[#allocation97_spill] sm:$0xff] }
 0x319   : > { %3094 = vst [vmem:[%s5352_s29 + $0x190] sm:$0xff] %v2974_v26  ;;  %3095 = vst.msk [vmem:[%s5352_s29 + $0x198] sm:$0xff] %vm1123_vm1, %v2975_v20  ;;  %v2614_v39 = vmul.f32 %v2482_v17, %v5202_v10  ;;  %v2615_v58 = vmul.f32 %v2482_v17, %v6373_v37  ;;  %v6395_v17 = vld [vmem:[#allocation102_spill] sm:$0xff] }
 0x31a   : > { %v3028_v57 = vadd.f32 %v6377_v44, %v2608_v13  ;;  %v3029_v36 = vadd.f32 %v6377_v44, %v2609_v19 }
 0x31b   : > { %v3034_v5 = vadd.f32 %v6376_v11, %v2614_v39  ;;  %v3035_v42 = vadd.f32 %v6376_v11, %v2615_v58  ;;  %v2327_v55 = vpop.permute.xlu1 %2326  ;;  %v6396_v39 = vld [vmem:[#allocation127_spill] sm:$0xff] }
 0x31c   : > { %v2342_v29 = vpop.permute.xlu0 %2341  ;;  %3148 = vst [vmem:[%s5352_s29 + $0x340] sm:$0xff] %v3028_v57  ;;  %3149 = vst.msk [vmem:[%s5352_s29 + $0x348] sm:$0xff] %vm1123_vm1, %v3029_v36  ;;  %v2552_v7 = vmul.f32 %v2327_v55, %v6378_v41  ;;  %v2553_v43 = vmul.f32 %v2327_v55, %v6379_v27  ;;  %v6398_v11 = vld [vmem:[#allocation103_spill] sm:$0xff]  ;;  %v6400_v55 = vld [vmem:[#allocation110_spill] sm:$0xff] }
 0x31d   : > { %3154 = vst [vmem:[%s5352_s29 + $0x370] sm:$0xff] %v3034_v5  ;;  %3155 = vst.msk [vmem:[%s5352_s29 + $0x378] sm:$0xff] %vm1123_vm1, %v3035_v42  ;;  %v2558_v10 = vmul.f32 %v2342_v29, %v5222_v59  ;;  %v2559_v31 = vmul.f32 %v2342_v29, %v5213_v18  ;;  %v6382_v18 = vld [vmem:[#allocation105_spill] sm:$0xff] }
 0x31e   : > { %v2972_v56 = vadd.f32 %v6381_v45, %v2552_v7  ;;  %v2973_v48 = vadd.f32 %v6381_v45, %v2553_v43  ;;  %v6399_v42 = vld [vmem:[#allocation37_spill] sm:$0xff]  ;;  %v6402_v43 = vld [vmem:[#allocation112_spill] sm:$0xff] }
 0x31f   : > { %v2978_v35 = vadd.f32 %v6380_v51, %v2558_v10  ;;  %v2979_v0 = vadd.f32 %v6380_v51, %v2559_v31  ;;  %v2477_v25 = vpop.permute.xlu1 %2476  ;;  %v6401_v31 = vld [vmem:[#allocation107_spill] sm:$0xff] }
 0x320   : > { %v2492_v22 = vpop.permute.xlu0 %2491  ;;  %3092 = vst [vmem:[%s5352_s29 + $0x180] sm:$0xff] %v2972_v56  ;;  %3093 = vst.msk [vmem:[%s5352_s29 + $0x188] sm:$0xff] %vm1123_vm1, %v2973_v48  ;;  %v2612_v15 = vmul.f32 %v2477_v25, %v6384_v34  ;;  %v2613_v49 = vmul.f32 %v2477_v25, %v6385_v1 }
 0x321   : > { %3098 = vst [vmem:[%s5352_s29 + $0x1b0] sm:$0xff] %v2978_v35  ;;  %3099 = vst.msk [vmem:[%s5352_s29 + $0x1b8] sm:$0xff] %vm1123_vm1, %v2979_v0  ;;  %v2618_v59 = vmul.f32 %v2492_v22, %v6382_v18  ;;  %v2619_v60 = vmul.f32 %v2492_v22, %v6383_v12  ;;  %v6403_v35 = vld [vmem:[#allocation108_spill] sm:$0xff] }
 0x322   : > { %v3032_v63 = vadd.f32 %v6387_v23, %v2612_v15  ;;  %v3033_v54 = vadd.f32 %v6387_v23, %v2613_v49 }
 0x323   : > { %v3038_v47 = vadd.f32 %v6386_v40, %v2618_v59  ;;  %v3039_v50 = vadd.f32 %v6386_v40, %v2619_v60  ;;  %v2337_v62 = vpop.permute.xlu1 %2336 }
 0x324   : > { %v2352_v3 = vpop.permute.xlu0 %2351  ;;  %3152 = vst [vmem:[%s5352_s29 + $0x360] sm:$0xff] %v3032_v63  ;;  %3153 = vst.msk [vmem:[%s5352_s29 + $0x368] sm:$0xff] %vm1123_vm1, %v3033_v54  ;;  %v2556_v61 = vmul.f32 %v2337_v62, %v6390_v9  ;;  %v2557_v6 = vmul.f32 %v2337_v62, %v6391_v33 }
 0x325   : > { %3158 = vst [vmem:[%s5352_s29 + $0x390] sm:$0xff] %v3038_v47  ;;  %3159 = vst.msk [vmem:[%s5352_s29 + $0x398] sm:$0xff] %vm1123_vm1, %v3039_v50  ;;  %v2562_v8 = vmul.f32 %v2352_v3, %v6388_v32  ;;  %v2563_v46 = vmul.f32 %v2352_v3, %v6389_v21 }
 0x326   : > { %v2976_v26 = vadd.f32 %v6393_v52, %v2556_v61  ;;  %v2977_v20 = vadd.f32 %v6393_v52, %v2557_v6 }
 0x327   : > { %v2982_v14 = vadd.f32 %v6392_v38, %v2562_v8  ;;  %v2983_v28 = vadd.f32 %v6392_v38, %v2563_v46  ;;  %v2487_v4 = vpop.permute.xlu1 %2486 }
 0x328   : > { %3096 = vst [vmem:[%s5352_s29 + $0x1a0] sm:$0xff] %v2976_v26  ;;  %3097 = vst.msk [vmem:[%s5352_s29 + $0x1a8] sm:$0xff] %vm1123_vm1, %v2977_v20  ;;  %v2616_v2 = vmul.f32 %v2487_v4, %v6394_v30  ;;  %v2617_v53 = vmul.f32 %v2487_v4, %v6395_v17  ;;  %v2502_v16 = vpop.permute.xlu0 %2501 }
 0x329   : > { %3102 = vst [vmem:[%s5352_s29 + $0x1d0] sm:$0xff] %v2982_v14  ;;  %3103 = vst.msk [vmem:[%s5352_s29 + $0x1d8] sm:$0xff] %vm1123_vm1, %v2983_v28  ;;  %v2622_v51 = vmul.f32 %v2502_v16, %v6402_v43  ;;  %v2623_v0 = vmul.f32 %v2502_v16, %v6403_v35 }
 0x32a   : > { %v3036_v37 = vadd.f32 %v6396_v39, %v2616_v2  ;;  %v3037_v58 = vadd.f32 %v6396_v39, %v2617_v53 }
 0x32b   : > { %v2347_v13 = vpop.permute.xlu1 %2346 }
 0x32c   : > { %3156 = vst [vmem:[%s5352_s29 + $0x380] sm:$0xff] %v3036_v37  ;;  %3157 = vst.msk [vmem:[%s5352_s29 + $0x388] sm:$0xff] %vm1123_vm1, %v3037_v58  ;;  %v2560_v19 = vmul.f32 %v2347_v13, %v6397_v24  ;;  %v2561_v5 = vmul.f32 %v2347_v13, %v6398_v11 }
 0x32d   : > { %v2917_v29 = vpop.permute.xlu0 %2916 }
 0x32e   : > { %v2980_v44 = vadd.f32 %v6399_v42, %v2560_v19  ;;  %v2981_v57 = vadd.f32 %v6399_v42, %v2561_v5 }
 0x32f   : > { %v2497_v36 = vpop.permute.xlu1 %2496 }
 0x330   : > { %3100 = vst [vmem:[%s5352_s29 + $0x1c0] sm:$0xff] %v2980_v44  ;;  %3101 = vst.msk [vmem:[%s5352_s29 + $0x1c8] sm:$0xff] %vm1123_vm1, %v2981_v57  ;;  %v2620_v10 = vmul.f32 %v2497_v36, %v6400_v55  ;;  %v2621_v41 = vmul.f32 %v2497_v36, %v6401_v31 }
 0x332   : > { %v3040_v7 = vadd.f32 %v2917_v29, %v2620_v10  ;;  %v3041_v27 = vadd.f32 %v2917_v29, %v2621_v41 }
 0x334   : > { %3160 = vst [vmem:[%s5352_s29 + $0x3a0] sm:$0xff] %v3040_v7  ;;  %3161 = vst.msk [vmem:[%s5352_s29 + $0x3a8] sm:$0xff] %vm1123_vm1, %v3041_v27  ;;  %v2922_v45 = vpop.permute.xlu1 %2921 }
 0x335   : > { %v3042_v56 = vadd.f32 %v2922_v45, %v2622_v51  ;;  %v3043_v48 = vadd.f32 %v2922_v45, %v2623_v0 }
 0x337   : > { %3162 = vst [vmem:[%s5352_s29 + $0x3b0] sm:$0xff] %v3042_v56  ;;  %3163 = vst.msk [vmem:[%s5352_s29 + $0x3b8] sm:$0xff] %vm1123_vm1, %v3043_v48 }
 0x338 PF: > { %s14_s15 = sadd.s32 1, %s3648_s15  }
 0x339   : > { %p11_p4 = scmp.ge.s32.totalorder %s14_s15, 4  }
 0x33b   :  { %13 = sbr.rel (!%p11_p4) target bundleno = 1 (0x1), region = 69 }

</bundles_post_ra>
